<compile_context>
chip_gen: v7x
topology: tpu7x:2x2x1
jax: 0.10.0
libtpu: 0.0.40
codegen_flags: <defaults>
</compile_context>

<pallas_src>
import functools

import jax
import jax.numpy as jnp
from jax.experimental import pallas as pl
from jax.experimental.pallas import tpu as pltpu

N_HIDDEN = 256


def _dqn_kernel(x_ref,
                w0_ref, b0_ref,
                wh_ref, bh_ref,
                w4_ref, b4_ref,
                o_ref, *, split):
    cdt = w0_ref.dtype  # bf16 matmul-operand dtype

    def chain(x):
        # Input projection + ReLU (f32 accumulation on the MXU).
        h = jnp.dot(x.astype(cdt), w0_ref[...],
                    preferred_element_type=jnp.float32) + b0_ref[...]
        h = jnp.maximum(h, 0.0)
        # Three residual blocks: relu(Linear(h) + h).  Statically unrolled.
        for i in range(3):
            res = h
            h = jnp.dot(h.astype(cdt), wh_ref[i],
                        preferred_element_type=jnp.float32) + bh_ref[i]
            h = jnp.maximum(h + res, 0.0)
        # Output head (true n_actions width) + tanh/2 + 0.5.
        out = jnp.dot(h.astype(cdt), w4_ref[...],
                      preferred_element_type=jnp.float32) + b4_ref[...]
        return jnp.tanh(out) * 0.5 + 0.5

    if split:
        # Two independent half-tile chains: exposes ILP so the MXU is not
        # stalled behind the VPU/EUP phases of a single serial chain.
        half = x_ref.shape[0] // 2
        o_ref[pl.ds(0, half), :] = chain(x_ref[pl.ds(0, half), :])
        o_ref[pl.ds(half, half), :] = chain(x_ref[pl.ds(half, half), :])
    else:
        o_ref[...] = chain(x_ref[...])


def _round_up(x, m):
    return ((x + m - 1) // m) * m


def _pick_batch_tile(B):
    """Overhead-aware batch tile.

    - B < 16: single full-extent tile (legal; masked stores are a perf wart only).
    - B <= 512: one grid step covering the whole batch (overhead-bound regime;
      splitting only doubles per-step overhead on 1-TC parts).
    - B > 512: balanced tiles of <=512 rows, so every step keeps >=256 MXU rows
      and the grid has >=2 steps for v7x's two TensorCores.
    """
    if B < 16:
        return B
    if B <= 512:
        return _round_up(B, 16)
    n_steps = pl.cdiv(B, 512)
    return _round_up(pl.cdiv(B, n_steps), 16)


@functools.partial(jax.jit, static_argnames=("batch_tile",))
def dqn_forward(x, params, *, batch_tile=None):
    """x: (B, n_observations) f32.  params: list of (W_t (in,out), b (out,))."""
    B, n_obs = x.shape
    hidden = params[1][0].shape[0]
    n_actions = params[-1][0].shape[1]

    if batch_tile is None:
        batch_tile = _pick_batch_tile(B)

    B_pad = pl.cdiv(B, batch_tile) * batch_tile
    cdt = jnp.bfloat16

    # x stays f32 (no wrapper-side cast); only pad the batch if needed.
    x_p = x if B_pad == B else jnp.pad(x, ((0, B_pad - B), (0, 0)))

    (w0, b0), (w1, b1), (w2, b2), (w3, b3), (w4, b4) = params

    # bf16 matmul operands; f32 biases (bias/residual/ReLU/tanh stay f32).
    w0c = w0.astype(cdt)                                        # (n_obs, 256)
    whc = jnp.stack([w1, w2, w3]).astype(cdt)                   # (3, 256, 256)
    w4c = w4.astype(cdt)                                        # (256, n_actions)
    b0r = b0.reshape(1, hidden).astype(jnp.float32)             # (1, 256)
    bhr = jnp.stack([b1, b2, b3]).reshape(3, 1, hidden).astype(jnp.float32)
    b4r = b4.reshape(1, n_actions).astype(jnp.float32)          # (1, n_actions)

    def x_map(i):
        return (i, 0)

    def c2_map(i):
        return (0, 0)

    def c3_map(i):
        return (0, 0, 0)

    in_specs = [
        pl.BlockSpec((batch_tile, n_obs), x_map),
        pl.BlockSpec(w0c.shape, c2_map),
        pl.BlockSpec(b0r.shape, c2_map),
        pl.BlockSpec(whc.shape, c3_map),
        pl.BlockSpec(bhr.shape, c3_map),
        pl.BlockSpec(w4c.shape, c2_map),
        pl.BlockSpec(b4r.shape, c2_map),
    ]
    out_specs = pl.BlockSpec((batch_tile, n_actions), x_map)

    # Split each tile into two independent chains when the halves stay
    # sublane-aligned (>=16 rows each).
    split = (batch_tile % 16 == 0) and (batch_tile >= 32)

    # VMEM budget: double-buffered f32 x/out tiles + weights (x2 buffers) +
    # live f32 activation slabs for both half-chains; cap below v7x's 64 MiB.
    weight_bytes = (w0c.size + whc.size + w4c.size) * 2 \
        + (b0r.size + bhr.size + b4r.size) * 4
    io_bytes = 2 * batch_tile * n_obs * 4 + 2 * batch_tile * n_actions * 4
    act_bytes = 8 * batch_tile * hidden * 4
    vmem_limit = int(min(max(2 * weight_bytes + io_bytes + act_bytes + (4 << 20),
                             16 << 20), 48 << 20))

    out = pl.pallas_call(
        functools.partial(_dqn_kernel, split=split),
        out_shape=jax.ShapeDtypeStruct((B_pad, n_actions), jnp.float32),
        grid_spec=pltpu.PrefetchScalarGridSpec(
            num_scalar_prefetch=0,
            grid=(B_pad // batch_tile,),
            in_specs=in_specs,
            out_specs=out_specs,
        ),
        compiler_params=pltpu.CompilerParams(
            dimension_semantics=("parallel",),
            vmem_limit_bytes=vmem_limit,
        ),
    )(x_p, w0c, b0r, whc, bhr, w4c, b4r)

    return out if B_pad == B else out[:B]


def init_dqn_params(key, n_observations, n_actions, hidden=N_HIDDEN):
    """Deterministic synthetic init. Returns [(W_t (in,out), b (out,)) x 5]."""
    dims = [(n_observations, hidden),
            (hidden, hidden),
            (hidden, hidden),
            (hidden, hidden),
            (hidden, n_actions)]
    params = []
    for (fan_in, fan_out) in dims:
        key, kw, kb = jax.random.split(key, 3)
        bound = 1.0 / jnp.sqrt(fan_in)  # mimics PyTorch Linear default scale
        w = jax.random.uniform(kw, (fan_in, fan_out), jnp.float32,
                               minval=-bound, maxval=bound)
        b = jax.random.uniform(kb, (fan_out,), jnp.float32,
                               minval=-bound, maxval=bound)
        params.append((w, b))
    return params


def dqn_reference(x, params):
    """Plain-JAX f32 reference of the same forward, for a sanity check."""
    w0, b0 = params[0]
    h = jnp.maximum(x @ w0 + b0, 0.0)
    for w, b in params[1:4]:
        h = jnp.maximum(h @ w + b + h, 0.0)
    w4, b4 = params[4]
    out = h @ w4 + b4
    return jnp.tanh(out) * 0.5 + 0.5


if __name__ == "__main__":
    key = jax.random.PRNGKey(0)
    k_x, k_p = jax.random.split(key)

    B = 256             # auto batch_tile -> single 256-row tile, 1 grid step
    n_observations = 32
    n_actions = 8

    x = jax.random.normal(k_x, (B, n_observations), dtype=jnp.float32)
    params = init_dqn_params(k_p, n_observations, n_actions)

    out = dqn_forward(x, params)
    out = jax.block_until_ready(out)

    ref = dqn_reference(x, params)
    assert out.shape == (B, n_actions)
    max_err = float(jnp.max(jnp.abs(out - ref)))
    # bf16 matmul operands with f32 accumulation: small drift vs f32 reference.
    assert max_err < 5e-2, f"max abs error {max_err}"

    print("KERNEL_OK")
</pallas_src>

<mosaic_0001>
module attributes {stable_mosaic.version = 11 : i64} {
  func.func @_dqn_kernel(%arg0: i32, %arg1: memref<256x32xf32, #tpu.memory_space<vmem>>, %arg2: memref<32x256xbf16, #tpu.memory_space<vmem>>, %arg3: memref<1x256xf32, #tpu.memory_space<vmem>>, %arg4: memref<3x256x256xbf16, #tpu.memory_space<vmem>>, %arg5: memref<3x1x256xf32, #tpu.memory_space<vmem>>, %arg6: memref<256x8xbf16, #tpu.memory_space<vmem>>, %arg7: memref<1x8xf32, #tpu.memory_space<vmem>>, %arg8: memref<256x8xf32, #tpu.memory_space<vmem>>) attributes {dimension_semantics = [#tpu.dimension_semantics<parallel>], iteration_bounds = array<i64: 1>, scalar_prefetch = 0 : i64, scratch_operands = 0 : i64, tpu.core_type = #tpu.core_type<tc>, window_params = [{transform_indices = @transform_0, window_bounds = array<i64: 256, 32>}, {pipeline_mode = #tpu.pipeline_mode<synchronous>, transform_indices = @transform_1, window_bounds = array<i64: 32, 256>}, {pipeline_mode = #tpu.pipeline_mode<synchronous>, transform_indices = @transform_2, window_bounds = array<i64: 1, 256>}, {pipeline_mode = #tpu.pipeline_mode<synchronous>, transform_indices = @transform_3, window_bounds = array<i64: 3, 256, 256>}, {pipeline_mode = #tpu.pipeline_mode<synchronous>, transform_indices = @transform_4, window_bounds = array<i64: 3, 1, 256>}, {pipeline_mode = #tpu.pipeline_mode<synchronous>, transform_indices = @transform_5, window_bounds = array<i64: 256, 8>}, {pipeline_mode = #tpu.pipeline_mode<synchronous>, transform_indices = @transform_6, window_bounds = array<i64: 1, 8>}, {transform_indices = @transform_7, window_bounds = array<i64: 256, 8>}]} {
    %c0 = arith.constant 0 : index
    %c0_0 = arith.constant 0 : index
    %0 = vector.load %arg1[%c0, %c0_0] : memref<256x32xf32, #tpu.memory_space<vmem>>, vector<128x32xf32>
    %1 = arith.truncf %0 : vector<128x32xf32> to vector<128x32xbf16>
    %c0_1 = arith.constant 0 : index
    %c0_2 = arith.constant 0 : index
    %2 = vector.load %arg2[%c0_1, %c0_2] : memref<32x256xbf16, #tpu.memory_space<vmem>>, vector<32x256xbf16>
    %cst = arith.constant dense<0.000000e+00> : vector<128x256xf32>
    %3 = tpu.matmul %1, %2, %cst {dimension_numbers = #tpu.dot_dimension_numbers<[1], [0], [0], [1], [0, 0, 1, 1], [], []>} : vector<128x32xbf16>, vector<32x256xbf16>, vector<128x256xf32> -> vector<128x256xf32>
    %c0_3 = arith.constant 0 : index
    %c0_4 = arith.constant 0 : index
    %4 = vector.load %arg3[%c0_3, %c0_4] : memref<1x256xf32, #tpu.memory_space<vmem>>, vector<1x256xf32>
    %5 = vector.broadcast %4 : vector<1x256xf32> to vector<128x256xf32>
    %6 = arith.addf %3, %5 : vector<128x256xf32>
    %cst_5 = arith.constant 0.000000e+00 : f32
    %7 = vector.broadcast %cst_5 : f32 to vector<128x256xf32>
    %8 = arith.maximumf %6, %7 : vector<128x256xf32>
    %9 = arith.truncf %8 : vector<128x256xf32> to vector<128x256xbf16>
    %c0_6 = arith.constant 0 : index
    %c0_7 = arith.constant 0 : index
    %c0_8 = arith.constant 0 : index
    %10 = vector.load %arg4[%c0_6, %c0_7, %c0_8] : memref<3x256x256xbf16, #tpu.memory_space<vmem>>, vector<1x256x256xbf16>
    %11 = vector.shape_cast %10 : vector<1x256x256xbf16> to vector<256x256xbf16>
    %cst_9 = arith.constant dense<0.000000e+00> : vector<128x256xf32>
    %12 = tpu.matmul %9, %11, %cst_9 {dimension_numbers = #tpu.dot_dimension_numbers<[1], [0], [0], [1], [0, 0, 1, 1], [], []>} : vector<128x256xbf16>, vector<256x256xbf16>, vector<128x256xf32> -> vector<128x256xf32>
    %c0_10 = arith.constant 0 : index
    %c0_11 = arith.constant 0 : index
    %c0_12 = arith.constant 0 : index
    %13 = vector.load %arg5[%c0_10, %c0_11, %c0_12] : memref<3x1x256xf32, #tpu.memory_space<vmem>>, vector<1x1x256xf32>
    %14 = vector.shape_cast %13 : vector<1x1x256xf32> to vector<1x256xf32>
    %15 = vector.broadcast %14 : vector<1x256xf32> to vector<128x256xf32>
    %16 = arith.addf %12, %15 : vector<128x256xf32>
    %17 = arith.addf %16, %8 : vector<128x256xf32>
    %cst_13 = arith.constant 0.000000e+00 : f32
    %18 = vector.broadcast %cst_13 : f32 to vector<128x256xf32>
    %19 = arith.maximumf %17, %18 : vector<128x256xf32>
    %20 = arith.truncf %19 : vector<128x256xf32> to vector<128x256xbf16>
    %c1 = arith.constant 1 : index
    %c0_14 = arith.constant 0 : index
    %c0_15 = arith.constant 0 : index
    %21 = vector.load %arg4[%c1, %c0_14, %c0_15] : memref<3x256x256xbf16, #tpu.memory_space<vmem>>, vector<1x256x256xbf16>
    %22 = vector.shape_cast %21 : vector<1x256x256xbf16> to vector<256x256xbf16>
    %cst_16 = arith.constant dense<0.000000e+00> : vector<128x256xf32>
    %23 = tpu.matmul %20, %22, %cst_16 {dimension_numbers = #tpu.dot_dimension_numbers<[1], [0], [0], [1], [0, 0, 1, 1], [], []>} : vector<128x256xbf16>, vector<256x256xbf16>, vector<128x256xf32> -> vector<128x256xf32>
    %c1_17 = arith.constant 1 : index
    %c0_18 = arith.constant 0 : index
    %c0_19 = arith.constant 0 : index
    %24 = vector.load %arg5[%c1_17, %c0_18, %c0_19] : memref<3x1x256xf32, #tpu.memory_space<vmem>>, vector<1x1x256xf32>
    %25 = vector.shape_cast %24 : vector<1x1x256xf32> to vector<1x256xf32>
    %26 = vector.broadcast %25 : vector<1x256xf32> to vector<128x256xf32>
    %27 = arith.addf %23, %26 : vector<128x256xf32>
    %28 = arith.addf %27, %19 : vector<128x256xf32>
    %cst_20 = arith.constant 0.000000e+00 : f32
    %29 = vector.broadcast %cst_20 : f32 to vector<128x256xf32>
    %30 = arith.maximumf %28, %29 : vector<128x256xf32>
    %31 = arith.truncf %30 : vector<128x256xf32> to vector<128x256xbf16>
    %c2 = arith.constant 2 : index
    %c0_21 = arith.constant 0 : index
    %c0_22 = arith.constant 0 : index
    %32 = vector.load %arg4[%c2, %c0_21, %c0_22] : memref<3x256x256xbf16, #tpu.memory_space<vmem>>, vector<1x256x256xbf16>
    %33 = vector.shape_cast %32 : vector<1x256x256xbf16> to vector<256x256xbf16>
    %cst_23 = arith.constant dense<0.000000e+00> : vector<128x256xf32>
    %34 = tpu.matmul %31, %33, %cst_23 {dimension_numbers = #tpu.dot_dimension_numbers<[1], [0], [0], [1], [0, 0, 1, 1], [], []>} : vector<128x256xbf16>, vector<256x256xbf16>, vector<128x256xf32> -> vector<128x256xf32>
    %c2_24 = arith.constant 2 : index
    %c0_25 = arith.constant 0 : index
    %c0_26 = arith.constant 0 : index
    %35 = vector.load %arg5[%c2_24, %c0_25, %c0_26] : memref<3x1x256xf32, #tpu.memory_space<vmem>>, vector<1x1x256xf32>
    %36 = vector.shape_cast %35 : vector<1x1x256xf32> to vector<1x256xf32>
    %37 = vector.broadcast %36 : vector<1x256xf32> to vector<128x256xf32>
    %38 = arith.addf %34, %37 : vector<128x256xf32>
    %39 = arith.addf %38, %30 : vector<128x256xf32>
    %cst_27 = arith.constant 0.000000e+00 : f32
    %40 = vector.broadcast %cst_27 : f32 to vector<128x256xf32>
    %41 = arith.maximumf %39, %40 : vector<128x256xf32>
    %42 = arith.truncf %41 : vector<128x256xf32> to vector<128x256xbf16>
    %c0_28 = arith.constant 0 : index
    %c0_29 = arith.constant 0 : index
    %43 = vector.load %arg6[%c0_28, %c0_29] : memref<256x8xbf16, #tpu.memory_space<vmem>>, vector<256x8xbf16>
    %cst_30 = arith.constant dense<0.000000e+00> : vector<128x8xf32>
    %44 = tpu.matmul %42, %43, %cst_30 {dimension_numbers = #tpu.dot_dimension_numbers<[1], [0], [0], [1], [0, 0, 1, 1], [], []>} : vector<128x256xbf16>, vector<256x8xbf16>, vector<128x8xf32> -> vector<128x8xf32>
    %c0_31 = arith.constant 0 : index
    %c0_32 = arith.constant 0 : index
    %45 = vector.load %arg7[%c0_31, %c0_32] : memref<1x8xf32, #tpu.memory_space<vmem>>, vector<1x8xf32>
    %46 = vector.broadcast %45 : vector<1x8xf32> to vector<128x8xf32>
    %47 = arith.addf %44, %46 : vector<128x8xf32>
    %48 = math.tanh %47 : vector<128x8xf32>
    %cst_33 = arith.constant 5.000000e-01 : f32
    %49 = vector.broadcast %cst_33 : f32 to vector<128x8xf32>
    %50 = arith.mulf %48, %49 : vector<128x8xf32>
    %cst_34 = arith.constant 5.000000e-01 : f32
    %51 = vector.broadcast %cst_34 : f32 to vector<128x8xf32>
    %52 = arith.addf %50, %51 : vector<128x8xf32>
    %c0_35 = arith.constant 0 : index
    %c0_36 = arith.constant 0 : index
    %53 = vector.load %arg8[%c0_35, %c0_36] : memref<256x8xf32, #tpu.memory_space<vmem>>, vector<128x8xf32>
    tpu.vector_store %arg8[%c0_35, %c0_36], %52 {strides = array<i32>} : memref<256x8xf32, #tpu.memory_space<vmem>>, vector<128x8xf32>,
    %c128 = arith.constant 128 : index
    %c0_37 = arith.constant 0 : index
    %54 = vector.load %arg1[%c128, %c0_37] : memref<256x32xf32, #tpu.memory_space<vmem>>, vector<128x32xf32>
    %55 = arith.truncf %54 : vector<128x32xf32> to vector<128x32xbf16>
    %c0_38 = arith.constant 0 : index
    %c0_39 = arith.constant 0 : index
    %56 = vector.load %arg2[%c0_38, %c0_39] : memref<32x256xbf16, #tpu.memory_space<vmem>>, vector<32x256xbf16>
    %cst_40 = arith.constant dense<0.000000e+00> : vector<128x256xf32>
    %57 = tpu.matmul %55, %56, %cst_40 {dimension_numbers = #tpu.dot_dimension_numbers<[1], [0], [0], [1], [0, 0, 1, 1], [], []>} : vector<128x32xbf16>, vector<32x256xbf16>, vector<128x256xf32> -> vector<128x256xf32>
    %c0_41 = arith.constant 0 : index
    %c0_42 = arith.constant 0 : index
    %58 = vector.load %arg3[%c0_41, %c0_42] : memref<1x256xf32, #tpu.memory_space<vmem>>, vector<1x256xf32>
    %59 = vector.broadcast %58 : vector<1x256xf32> to vector<128x256xf32>
    %60 = arith.addf %57, %59 : vector<128x256xf32>
    %cst_43 = arith.constant 0.000000e+00 : f32
    %61 = vector.broadcast %cst_43 : f32 to vector<128x256xf32>
    %62 = arith.maximumf %60, %61 : vector<128x256xf32>
    %63 = arith.truncf %62 : vector<128x256xf32> to vector<128x256xbf16>
    %c0_44 = arith.constant 0 : index
    %c0_45 = arith.constant 0 : index
    %c0_46 = arith.constant 0 : index
    %64 = vector.load %arg4[%c0_44, %c0_45, %c0_46] : memref<3x256x256xbf16, #tpu.memory_space<vmem>>, vector<1x256x256xbf16>
    %65 = vector.shape_cast %64 : vector<1x256x256xbf16> to vector<256x256xbf16>
    %cst_47 = arith.constant dense<0.000000e+00> : vector<128x256xf32>
    %66 = tpu.matmul %63, %65, %cst_47 {dimension_numbers = #tpu.dot_dimension_numbers<[1], [0], [0], [1], [0, 0, 1, 1], [], []>} : vector<128x256xbf16>, vector<256x256xbf16>, vector<128x256xf32> -> vector<128x256xf32>
    %c0_48 = arith.constant 0 : index
    %c0_49 = arith.constant 0 : index
    %c0_50 = arith.constant 0 : index
    %67 = vector.load %arg5[%c0_48, %c0_49, %c0_50] : memref<3x1x256xf32, #tpu.memory_space<vmem>>, vector<1x1x256xf32>
    %68 = vector.shape_cast %67 : vector<1x1x256xf32> to vector<1x256xf32>
    %69 = vector.broadcast %68 : vector<1x256xf32> to vector<128x256xf32>
    %70 = arith.addf %66, %69 : vector<128x256xf32>
    %71 = arith.addf %70, %62 : vector<128x256xf32>
    %cst_51 = arith.constant 0.000000e+00 : f32
    %72 = vector.broadcast %cst_51 : f32 to vector<128x256xf32>
    %73 = arith.maximumf %71, %72 : vector<128x256xf32>
    %74 = arith.truncf %73 : vector<128x256xf32> to vector<128x256xbf16>
    %c1_52 = arith.constant 1 : index
    %c0_53 = arith.constant 0 : index
    %c0_54 = arith.constant 0 : index
    %75 = vector.load %arg4[%c1_52, %c0_53, %c0_54] : memref<3x256x256xbf16, #tpu.memory_space<vmem>>, vector<1x256x256xbf16>
    %76 = vector.shape_cast %75 : vector<1x256x256xbf16> to vector<256x256xbf16>
    %cst_55 = arith.constant dense<0.000000e+00> : vector<128x256xf32>
    %77 = tpu.matmul %74, %76, %cst_55 {dimension_numbers = #tpu.dot_dimension_numbers<[1], [0], [0], [1], [0, 0, 1, 1], [], []>} : vector<128x256xbf16>, vector<256x256xbf16>, vector<128x256xf32> -> vector<128x256xf32>
    %c1_56 = arith.constant 1 : index
    %c0_57 = arith.constant 0 : index
    %c0_58 = arith.constant 0 : index
    %78 = vector.load %arg5[%c1_56, %c0_57, %c0_58] : memref<3x1x256xf32, #tpu.memory_space<vmem>>, vector<1x1x256xf32>
    %79 = vector.shape_cast %78 : vector<1x1x256xf32> to vector<1x256xf32>
    %80 = vector.broadcast %79 : vector<1x256xf32> to vector<128x256xf32>
    %81 = arith.addf %77, %80 : vector<128x256xf32>
    %82 = arith.addf %81, %73 : vector<128x256xf32>
    %cst_59 = arith.constant 0.000000e+00 : f32
    %83 = vector.broadcast %cst_59 : f32 to vector<128x256xf32>
    %84 = arith.maximumf %82, %83 : vector<128x256xf32>
    %85 = arith.truncf %84 : vector<128x256xf32> to vector<128x256xbf16>
    %c2_60 = arith.constant 2 : index
    %c0_61 = arith.constant 0 : index
    %c0_62 = arith.constant 0 : index
    %86 = vector.load %arg4[%c2_60, %c0_61, %c0_62] : memref<3x256x256xbf16, #tpu.memory_space<vmem>>, vector<1x256x256xbf16>
    %87 = vector.shape_cast %86 : vector<1x256x256xbf16> to vector<256x256xbf16>
    %cst_63 = arith.constant dense<0.000000e+00> : vector<128x256xf32>
    %88 = tpu.matmul %85, %87, %cst_63 {dimension_numbers = #tpu.dot_dimension_numbers<[1], [0], [0], [1], [0, 0, 1, 1], [], []>} : vector<128x256xbf16>, vector<256x256xbf16>, vector<128x256xf32> -> vector<128x256xf32>
    %c2_64 = arith.constant 2 : index
    %c0_65 = arith.constant 0 : index
    %c0_66 = arith.constant 0 : index
    %89 = vector.load %arg5[%c2_64, %c0_65, %c0_66] : memref<3x1x256xf32, #tpu.memory_space<vmem>>, vector<1x1x256xf32>
    %90 = vector.shape_cast %89 : vector<1x1x256xf32> to vector<1x256xf32>
    %91 = vector.broadcast %90 : vector<1x256xf32> to vector<128x256xf32>
    %92 = arith.addf %88, %91 : vector<128x256xf32>
    %93 = arith.addf %92, %84 : vector<128x256xf32>
    %cst_67 = arith.constant 0.000000e+00 : f32
    %94 = vector.broadcast %cst_67 : f32 to vector<128x256xf32>
    %95 = arith.maximumf %93, %94 : vector<128x256xf32>
    %96 = arith.truncf %95 : vector<128x256xf32> to vector<128x256xbf16>
    %c0_68 = arith.constant 0 : index
    %c0_69 = arith.constant 0 : index
    %97 = vector.load %arg6[%c0_68, %c0_69] : memref<256x8xbf16, #tpu.memory_space<vmem>>, vector<256x8xbf16>
    %cst_70 = arith.constant dense<0.000000e+00> : vector<128x8xf32>
    %98 = tpu.matmul %96, %97, %cst_70 {dimension_numbers = #tpu.dot_dimension_numbers<[1], [0], [0], [1], [0, 0, 1, 1], [], []>} : vector<128x256xbf16>, vector<256x8xbf16>, vector<128x8xf32> -> vector<128x8xf32>
    %c0_71 = arith.constant 0 : index
    %c0_72 = arith.constant 0 : index
    %99 = vector.load %arg7[%c0_71, %c0_72] : memref<1x8xf32, #tpu.memory_space<vmem>>, vector<1x8xf32>
    %100 = vector.broadcast %99 : vector<1x8xf32> to vector<128x8xf32>
    %101 = arith.addf %98, %100 : vector<128x8xf32>
    %102 = math.tanh %101 : vector<128x8xf32>
    %cst_73 = arith.constant 5.000000e-01 : f32
    %103 = vector.broadcast %cst_73 : f32 to vector<128x8xf32>
    %104 = arith.mulf %102, %103 : vector<128x8xf32>
    %cst_74 = arith.constant 5.000000e-01 : f32
    %105 = vector.broadcast %cst_74 : f32 to vector<128x8xf32>
    %106 = arith.addf %104, %105 : vector<128x8xf32>
    %c128_75 = arith.constant 128 : index
    %c0_76 = arith.constant 0 : index
    %107 = vector.load %arg8[%c128_75, %c0_76] : memref<256x8xf32, #tpu.memory_space<vmem>>, vector<128x8xf32>
    tpu.vector_store %arg8[%c128_75, %c0_76], %106 {strides = array<i32>} : memref<256x8xf32, #tpu.memory_space<vmem>>, vector<128x8xf32>,
    return
  }
  func.func @transform_0(%arg0: i32) -> (i32, i32) {
    %c0_i32 = arith.constant 0 : i32
    %c0_i32_0 = arith.constant 0 : i32
    return %arg0, %c0_i32 : i32, i32
  }
  func.func @transform_1(%arg0: i32) -> (i32, i32) {
    %c0_i32 = arith.constant 0 : i32
    %c0_i32_0 = arith.constant 0 : i32
    %c0_i32_1 = arith.constant 0 : i32
    return %c0_i32, %c0_i32_0 : i32, i32
  }
  func.func @transform_2(%arg0: i32) -> (i32, i32) {
    %c0_i32 = arith.constant 0 : i32
    %c0_i32_0 = arith.constant 0 : i32
    %c0_i32_1 = arith.constant 0 : i32
    return %c0_i32, %c0_i32_0 : i32, i32
  }
  func.func @transform_3(%arg0: i32) -> (i32, i32, i32) {
    %c0_i32 = arith.constant 0 : i32
    %c0_i32_0 = arith.constant 0 : i32
    %c0_i32_1 = arith.constant 0 : i32
    %c0_i32_2 = arith.constant 0 : i32
    return %c0_i32, %c0_i32_0, %c0_i32_1 : i32, i32, i32
  }
  func.func @transform_4(%arg0: i32) -> (i32, i32, i32) {
    %c0_i32 = arith.constant 0 : i32
    %c0_i32_0 = arith.constant 0 : i32
    %c0_i32_1 = arith.constant 0 : i32
    %c0_i32_2 = arith.constant 0 : i32
    return %c0_i32, %c0_i32_0, %c0_i32_1 : i32, i32, i32
  }
  func.func @transform_5(%arg0: i32) -> (i32, i32) {
    %c0_i32 = arith.constant 0 : i32
    %c0_i32_0 = arith.constant 0 : i32
    %c0_i32_1 = arith.constant 0 : i32
    return %c0_i32, %c0_i32_0 : i32, i32
  }
  func.func @transform_6(%arg0: i32) -> (i32, i32) {
    %c0_i32 = arith.constant 0 : i32
    %c0_i32_0 = arith.constant 0 : i32
    %c0_i32_1 = arith.constant 0 : i32
    return %c0_i32, %c0_i32_0 : i32, i32
  }
  func.func @transform_7(%arg0: i32) -> (i32, i32) {
    %c0_i32 = arith.constant 0 : i32
    %c0_i32_0 = arith.constant 0 : i32
    return %arg0, %c0_i32 : i32, i32
  }
}

</mosaic_0001>

<bundles_post_ra>
// kernel: dqn_forward.1
= control target key start
LH: loop header
LB: loop body
LE: loop exit
PB: predicated region body
PF: predicated region fallthrough
CT: control target
= control target key end

     0   :  { %v7167_v1 = vmov 0   ;;  %vm87_vm0 = vcmask 261120   ;;  %vm1748_vm1 = vcmask 64512   ;;  %s7159_s1 = inlined_call_operand.vmem [shape: bf16[32,256], index: 1, kind: input, shape index: {}]   ;;  %s7160_s0 = inlined_call_operand.vmem [shape: f32[256,32], index: 0, kind: input, shape index: {}]   ;;  %s7161_s3 = inlined_call_operand.vmem [shape: bf16[3,256,256], index: 3, kind: input, shape index: {}]   ;;  %s7162_s2 = inlined_call_operand.vmem [shape: f32[1,256], index: 2, kind: input, shape index: {}]   ;;  %s7163_s4 = inlined_call_operand.vmem [shape: f32[3,1,256], index: 4, kind: input, shape index: {}]   ;;  %s7164_s5 = inlined_call_operand.vmem [shape: bf16[256,8], index: 5, kind: input, shape index: {}]   ;;  %s7165_s6 = inlined_call_operand.vmem [shape: f32[1,8], index: 6, kind: input, shape index: {}]   ;;  %s7166_s7 = inlined_call_operand.vmem [shape: f32[256,8], index: 7, kind: output, shape index: {}]  }
   0x1   :  { %v4028_v0 = vld [vmem:[%s7159_s1 + $0x4] ss:$8 sps:$4 sm:$0xff]   ;;  %144 = vmatprep.mubr.bf16.mxu0 %v7167_v1  ;;  %v4030_v2 = vld [vmem:[%s7159_s1] ss:$8 sps:$4 sm:$0xff]   ;;  %v4031_v3 = vld [vmem:[%s7159_s1 + $0x14] ss:$8 sps:$4 sm:$0xff]  }
   0x2   :  { %112 = vmatprep.subr.bf16.mxu0 %v4028_v0  ;;  %v4033_v4 = vld [vmem:[%s7159_s1 + $0x10] ss:$8 sps:$4 sm:$0xff]   ;;  %v27_v5 = vld [vmem:[%s7160_s0] sm:$0xff]  ;;  %v28_v6 = vld [vmem:[%s7160_s0 + $0x8] sm:$0xff] }
   0x3   :  { %113 = vmatpush1.bf16.msra.mxu0 %v4030_v2  ;;  %v43_v7 = vpack.c.bf16 %v28_v6, %v27_v5  ;;  %v4034_v8 = vld [vmem:[%s7161_s3 + $0x4] ss:$8 sps:$4 sm:$0xff]   ;;  %v4036_v9 = vld [vmem:[%s7161_s3] ss:$8 sps:$4 sm:$0xff]   ;;  %v29_v10 = vld [vmem:[%s7160_s0 + $0x10] sm:$0xff] }
   0x4   :  { %114 = vmatprep.subr.bf16.mxu0 %v4031_v3  ;;  %477 = vmatprep.subr.bf16.mxu1 %v4034_v8  ;;  %v4037_v11 = vld [vmem:[%s7161_s3 + $0x14] ss:$8 sps:$4 sm:$0xff]   ;;  %v4039_v13 = vld [vmem:[%s7161_s3 + $0x10] ss:$8 sps:$4 sm:$0xff]   ;;  %v4040_v14 = vld [vmem:[%s7161_s3 + $0x24] ss:$8 sps:$4 sm:$0xff]  }
   0x5   :  { %v30_v12 = vld [vmem:[%s7160_s0 + $0x18] sm:$0xff]  ;;  %478 = vmatpush1.bf16.msra.mxu1 %v4036_v9  ;;  %v4042_v16 = vld [vmem:[%s7161_s3 + $0x20] ss:$8 sps:$4 sm:$0xff]   ;;  %v4046_v21 = vld [vmem:[%s7161_s3 + $0x44] ss:$8 sps:$4 sm:$0xff]  }
   0x6   :  { %479 = vmatprep.subr.bf16.mxu1 %v4037_v11  ;;  %v44_v15 = vpack.c.bf16 %v30_v12, %v29_v10  ;;  %v4043_v17 = vld [vmem:[%s7161_s3 + $0x34] ss:$8 sps:$4 sm:$0xff]   ;;  %v31_v18 = vld [vmem:[%s7160_s0 + $0x20] sm:$0xff]  ;;  %v32_v19 = vld [vmem:[%s7160_s0 + $0x28] sm:$0xff] }
   0x7   :  { %115 = vmatpush1.bf16.msra.mxu0 %v4033_v4  ;;  %v4045_v20 = vld [vmem:[%s7161_s3 + $0x30] ss:$8 sps:$4 sm:$0xff]   ;;  %v45_v22 = vpack.c.bf16 %v32_v19, %v31_v18  ;;  %v4048_v23 = vld [vmem:[%s7161_s3 + $0x40] ss:$8 sps:$4 sm:$0xff]   ;;  %v4049_v24 = vld [vmem:[%s7161_s3 + $0x54] ss:$8 sps:$4 sm:$0xff]  }
   0x8   :  { %v33_v25 = vld [vmem:[%s7160_s0 + $0x30] sm:$0xff]  ;;  %v34_v26 = vld [vmem:[%s7160_s0 + $0x38] sm:$0xff]  ;;  %v4052_v28 = vld [vmem:[%s7161_s3 + $0x64] ss:$8 sps:$4 sm:$0xff]  }
   0x9   :  { %480 = vmatpush1.bf16.msra.mxu1 %v4039_v13  ;;  %v4051_v27 = vld [vmem:[%s7161_s3 + $0x50] ss:$8 sps:$4 sm:$0xff]   ;;  %v4054_v29 = vld [vmem:[%s7161_s3 + $0x60] ss:$8 sps:$4 sm:$0xff]   ;;  %v46_v30 = vpack.c.bf16 %v34_v26, %v33_v25  ;;  %v4055_v31 = vld [vmem:[%s7161_s3 + $0x74] ss:$8 sps:$4 sm:$0xff]  }
   0xa   :  { %3505 = vmatmul.mubr.msk.bf16.vlgmr.msra.gmra.mrb[0].mxu0 %vm87_vm0, %v43_v7  ;;  %481 = vmatprep.subr.bf16.mxu1 %v4040_v14  ;;  %v35_v32 = vld [vmem:[%s7160_s0 + $0x40] sm:$0xff]  ;;  %v36_v33 = vld [vmem:[%s7160_s0 + $0x48] sm:$0xff]  ;;  %v4057_v34 = vld [vmem:[%s7161_s3 + $0x70] ss:$8 sps:$4 sm:$0xff]  }
   0xb   :  { %154 = vmatprep.mubr.bf16.mxu0 %v7167_v1  ;;  %v4058_v35 = vld [vmem:[%s7161_s3 + $0x84] ss:$8 sps:$4 sm:$0xff]   ;;  %v4060_v36 = vld [vmem:[%s7161_s3 + $0x80] ss:$8 sps:$4 sm:$0xff]   ;;  %v47_v37 = vpack.c.bf16 %v36_v33, %v35_v32  ;;  %v4061_v38 = vld [vmem:[%s7161_s3 + $0x94] ss:$8 sps:$4 sm:$0xff]  }
   0xc   :  { %v37_v39 = vld [vmem:[%s7160_s0 + $0x50] sm:$0xff]  ;;  %v38_v40 = vld [vmem:[%s7160_s0 + $0x58] sm:$0xff]  ;;  %v4064_v42 = vld [vmem:[%s7161_s3 + $0xa4] ss:$8 sps:$4 sm:$0xff]  }
   0xd   :  { %482 = vmatpush1.bf16.msra.mxu1 %v4042_v16  ;;  %v4063_v41 = vld [vmem:[%s7161_s3 + $0x90] ss:$8 sps:$4 sm:$0xff]   ;;  %v4066_v43 = vld [vmem:[%s7161_s3 + $0xa0] ss:$8 sps:$4 sm:$0xff]   ;;  %v48_v44 = vpack.c.bf16 %v38_v40, %v37_v39  ;;  %v4067_v45 = vld [vmem:[%s7161_s3 + $0xb4] ss:$8 sps:$4 sm:$0xff]  }
   0xe   :  { %483 = vmatprep.subr.bf16.mxu1 %v4043_v17  ;;  %v39_v46 = vld [vmem:[%s7160_s0 + $0x60] sm:$0xff]  ;;  %v40_v47 = vld [vmem:[%s7160_s0 + $0x68] sm:$0xff]  ;;  %v4069_v48 = vld [vmem:[%s7161_s3 + $0xb0] ss:$8 sps:$4 sm:$0xff]  }
   0xf   :  { %v4070_v49 = vld [vmem:[%s7161_s3 + $0xc4] ss:$8 sps:$4 sm:$0xff]   ;;  %v4072_v50 = vld [vmem:[%s7161_s3 + $0xc0] ss:$8 sps:$4 sm:$0xff]   ;;  %v49_v51 = vpack.c.bf16 %v40_v47, %v39_v46  ;;  %v4073_v52 = vld [vmem:[%s7161_s3 + $0xd4] ss:$8 sps:$4 sm:$0xff]  }
  0x10   :  { %v41_v53 = vld [vmem:[%s7160_s0 + $0x70] sm:$0xff]  ;;  %v42_v54 = vld [vmem:[%s7160_s0 + $0x78] sm:$0xff]  ;;  %v4076_v57 = vld [vmem:[%s7161_s3 + $0xe4] ss:$8 sps:$4 sm:$0xff]  }
  0x11   :  { %484 = vmatpush1.bf16.msra.mxu1 %v4045_v20  ;;  %v50_v55 = vpack.c.bf16 %v42_v54, %v41_v53  ;;  %v4075_v56 = vld [vmem:[%s7161_s3 + $0xd0] ss:$8 sps:$4 sm:$0xff]   ;;  %v4078_v58 = vld [vmem:[%s7161_s3 + $0xe0] ss:$8 sps:$4 sm:$0xff]   ;;  %v4079_v59 = vld [vmem:[%s7161_s3 + $0xf4] ss:$8 sps:$4 sm:$0xff]  }
  0x12   :  { %3506 = vmatmul.mubr.msk.bf16.gmra.mrb[4].mxu0 %vm87_vm0, %v44_v15  ;;  %485 = vmatprep.subr.bf16.mxu1 %v4046_v21  ;;  %v4081_v60 = vld [vmem:[%s7161_s3 + $0xf0] ss:$8 sps:$4 sm:$0xff]   ;;  %v4082_v61 = vld [vmem:[%s7161_s3 + $0x100] ss:$8 sps:$4 sm:$0xff]   ;;  %v4084_v62 = vld [vmem:[%s7161_s3 + $0x104] ss:$8 sps:$4 sm:$0xff]  }
  0x13   :  { %164 = vmatprep.mubr.bf16.mxu0 %v7167_v1  ;;  %v4087_v63 = vld [vmem:[%s7161_s3 + $0x114] ss:$8 sps:$4 sm:$0xff]   ;;  %876 = vmatprep.subr.bf16.mxu0 %v4084_v62  ;;  %v4085_v0 = vld [vmem:[%s7161_s3 + $0x110] ss:$8 sps:$4 sm:$0xff]   ;;  %v4090_v2 = vld [vmem:[%s7161_s3 + $0x124] ss:$8 sps:$4 sm:$0xff]  }
  0x14   :  { %877 = vmatpush1.bf16.msra.mxu0 %v4082_v61  ;;  %v4088_v3 = vld [vmem:[%s7161_s3 + $0x120] ss:$8 sps:$4 sm:$0xff]   ;;  %v4093_v4 = vld [vmem:[%s7161_s3 + $0x134] ss:$8 sps:$4 sm:$0xff]   ;;  %v4091_v5 = vld [vmem:[%s7161_s3 + $0x130] ss:$8 sps:$4 sm:$0xff]  }
  0x15   :  { %486 = vmatpush1.bf16.msra.mxu1 %v4048_v23  ;;  %878 = vmatprep.subr.bf16.mxu0 %v4087_v63  ;;  %v4096_v6 = vld [vmem:[%s7161_s3 + $0x144] ss:$8 sps:$4 sm:$0xff]   ;;  %v4094_v7 = vld [vmem:[%s7161_s3 + $0x140] ss:$8 sps:$4 sm:$0xff]   ;;  %v4099_v8 = vld [vmem:[%s7161_s3 + $0x154] ss:$8 sps:$4 sm:$0xff]   ;;  %v57_v23 = vlaneseq }
  0x16   :  { %487 = vmatprep.subr.bf16.mxu1 %v4049_v24  ;;  %v4097_v9 = vld [vmem:[%s7161_s3 + $0x150] ss:$8 sps:$4 sm:$0xff]   ;;  %v4102_v10 = vld [vmem:[%s7161_s3 + $0x164] ss:$8 sps:$4 sm:$0xff]   ;;  %v4100_v11 = vld [vmem:[%s7161_s3 + $0x160] ss:$8 sps:$4 sm:$0xff]  }
  0x17   :  { %v4105_v12 = vld [vmem:[%s7161_s3 + $0x174] ss:$8 sps:$4 sm:$0xff]   ;;  %v4103_v13 = vld [vmem:[%s7161_s3 + $0x170] ss:$8 sps:$4 sm:$0xff]   ;;  %v4108_v14 = vld [vmem:[%s7161_s3 + $0x184] ss:$8 sps:$4 sm:$0xff]  }
  0x18   :  { %879 = vmatpush1.bf16.msra.mxu0 %v4085_v0  ;;  %v4106_v15 = vld [vmem:[%s7161_s3 + $0x180] ss:$8 sps:$4 sm:$0xff]   ;;  %v4111_v16 = vld [vmem:[%s7161_s3 + $0x194] ss:$8 sps:$4 sm:$0xff]   ;;  %v4109_v17 = vld [vmem:[%s7161_s3 + $0x190] ss:$8 sps:$4 sm:$0xff]  }
  0x19   :  { %488 = vmatpush1.bf16.msra.mxu1 %v4051_v27  ;;  %880 = vmatprep.subr.bf16.mxu0 %v4090_v2  ;;  %v4114_v18 = vld [vmem:[%s7161_s3 + $0x1a4] ss:$8 sps:$4 sm:$0xff]   ;;  %v4112_v19 = vld [vmem:[%s7161_s3 + $0x1a0] ss:$8 sps:$4 sm:$0xff]   ;;  %v4117_v20 = vld [vmem:[%s7161_s3 + $0x1b4] ss:$8 sps:$4 sm:$0xff]  }
  0x1a   :  { %3507 = vmatmul.mubr.msk.bf16.gmra.mrb[8].mxu0 %vm87_vm0, %v45_v22  ;;  %489 = vmatprep.subr.bf16.mxu1 %v4052_v28  ;;  %v4115_v21 = vld [vmem:[%s7161_s3 + $0x1b0] ss:$8 sps:$4 sm:$0xff]   ;;  %v4120_v22 = vld [vmem:[%s7161_s3 + $0x1c4] ss:$8 sps:$4 sm:$0xff]   ;;  %v4118_v24 = vld [vmem:[%s7161_s3 + $0x1c0] ss:$8 sps:$4 sm:$0xff]  }
  0x1b   :  { %174 = vmatprep.mubr.bf16.mxu0 %v7167_v1  ;;  %v58_v25 = vshrl.u32 %v57_v23, 7  ;;  %v55_v27 = vld [vmem:[%s7162_s2] sm:$0x3] }
  0x1c   :  { %881 = vmatpush1.bf16.msra.mxu0 %v4088_v3 }
  0x1d   :  { %490 = vmatpush1.bf16.msra.mxu1 %v4054_v29  ;;  %882 = vmatprep.subr.bf16.mxu0 %v4093_v4  ;;  %v4715_v26 = vsub.s32 1, %v58_v25  ;;  %v4720_v28 = vsub.s32 0, %v58_v25 }
  0x1e   :  { %491 = vmatprep.subr.bf16.mxu1 %v4055_v31 }
  0x1f   :  { %v4723_v29 = vrot.slane %v55_v27, %v4715_v26 }
  0x20   :  { %883 = vmatpush1.bf16.msra.mxu0 %v4091_v5 }
  0x21   :  { %492 = vmatpush1.bf16.msra.mxu1 %v4057_v34  ;;  %884 = vmatprep.subr.bf16.mxu0 %v4096_v6 }
  0x22   :  { %3508 = vmatmul.mubr.msk.bf16.gmra.mrb[12].mxu0 %vm87_vm0, %v46_v30  ;;  %493 = vmatprep.subr.bf16.mxu1 %v4058_v35  ;;  %v4726_v30 = vrot.slane %v55_v27, %v4720_v28 }
  0x23   :  { %184 = vmatprep.mubr.bf16.mxu0 %v7167_v1 }
  0x24   :  { %885 = vmatpush1.bf16.msra.mxu0 %v4094_v7 }
  0x25   :  { %494 = vmatpush1.bf16.msra.mxu1 %v4060_v36  ;;  %886 = vmatprep.subr.bf16.mxu0 %v4099_v8 }
  0x26   :  { %495 = vmatprep.subr.bf16.mxu1 %v4061_v38 }
  0x28   :  { %887 = vmatpush1.bf16.msra.mxu0 %v4097_v9 }
  0x29   :  { %496 = vmatpush1.bf16.msra.mxu1 %v4063_v41  ;;  %888 = vmatprep.subr.bf16.mxu0 %v4102_v10 }
  0x2a   :  { %3509 = vmatmul.mubr.msk.bf16.gmra.mrb[16].mxu0 %vm87_vm0, %v47_v37  ;;  %497 = vmatprep.subr.bf16.mxu1 %v4064_v42 }
  0x2b   :  { %194 = vmatprep.mubr.bf16.mxu0 %v7167_v1 }
  0x2c   :  { %889 = vmatpush1.bf16.msra.mxu0 %v4100_v11 }
  0x2d   :  { %498 = vmatpush1.bf16.msra.mxu1 %v4066_v43  ;;  %890 = vmatprep.subr.bf16.mxu0 %v4105_v12 }
  0x2e   :  { %499 = vmatprep.subr.bf16.mxu1 %v4067_v45 }
  0x30   :  { %891 = vmatpush1.bf16.msra.mxu0 %v4103_v13 }
  0x31   :  { %500 = vmatpush1.bf16.msra.mxu1 %v4069_v48  ;;  %892 = vmatprep.subr.bf16.mxu0 %v4108_v14 }
  0x32   :  { %3510 = vmatmul.mubr.msk.bf16.gmra.mrb[20].mxu0 %vm87_vm0, %v48_v44  ;;  %501 = vmatprep.subr.bf16.mxu1 %v4070_v49 }
  0x33   :  { %204 = vmatprep.mubr.bf16.mxu0 %v7167_v1 }
  0x34   :  { %893 = vmatpush1.bf16.msra.mxu0 %v4106_v15 }
  0x35   :  { %502 = vmatpush1.bf16.msra.mxu1 %v4072_v50  ;;  %894 = vmatprep.subr.bf16.mxu0 %v4111_v16 }
  0x36   :  { %503 = vmatprep.subr.bf16.mxu1 %v4073_v52 }
  0x38   :  { %895 = vmatpush1.bf16.msra.mxu0 %v4109_v17 }
  0x39   :  { %504 = vmatpush1.bf16.msra.mxu1 %v4075_v56  ;;  %896 = vmatprep.subr.bf16.mxu0 %v4114_v18 }
  0x3a   :  { %3511 = vmatmul.mubr.msk.bf16.gmra.mrb[24].mxu0 %vm87_vm0, %v49_v51  ;;  %505 = vmatprep.subr.bf16.mxu1 %v4076_v57 }
  0x3b   :  { %214 = vmatprep.mubr.bf16.mxu0 %v7167_v1 }
  0x3c   :  { %897 = vmatpush1.bf16.msra.mxu0 %v4112_v19 }
  0x3d   :  { %506 = vmatpush1.bf16.msra.mxu1 %v4078_v58  ;;  %898 = vmatprep.subr.bf16.mxu0 %v4117_v20 }
  0x3e   :  { %507 = vmatprep.subr.bf16.mxu1 %v4079_v59 }
  0x40   :  { %899 = vmatpush1.bf16.msra.mxu0 %v4115_v21 }
  0x41   :  { %508 = vmatpush1.bf16.msra.mxu1 %v4081_v60  ;;  %900 = vmatprep.subr.bf16.mxu0 %v4120_v22 }
  0x42   :  { %3512 = vmatmul.mubr.msk.bf16.gmra.mrb[28].mxu0 %vm87_vm0, %v50_v55 }
  0x44   :  { %901 = vmatpush1.bf16.msra.mxu0 %v4118_v24 }
  0xdd   :  { %v146_v31 = vpop.f32.mrb[0].mxu0 }
  0xde   :  { %v148_v32 = vpop.f32.mrb[1].mxu0  ;;  %v4732_v35 = vadd.f32 %v146_v31, %v4726_v30 }
  0xdf   :  { %v4729_v33 = vadd.f32 %v148_v32, %v4723_v29  ;;  %v150_v34 = vpop.f32.mrb[2].mxu0 }
  0xe0   :  { %v4735_v36 = vadd.f32 %v150_v34, %v4726_v30  ;;  %v152_v37 = vpop.f32.mrb[3].mxu0  ;;  %v225_v42 = vmax.f32 %v4732_v35, 0.0 }
  0xe1   :  { %v4738_v38 = vadd.f32 %v152_v37, %v4723_v29  ;;  %v226_v40 = vmax.f32 %v4729_v33, 0.0 }
  0xe2   :  { %v227_v39 = vmax.f32 %v4735_v36, 0.0 }
  0xe3   :  { %v228_v41 = vmax.f32 %v4738_v38, 0.0 }
  0xe4   :  { %v257_v45 = vpack.c.bf16 %v227_v39, %v225_v42 }
  0xe5   :  { %v156_v43 = vpop.f32.mrb[4].mxu0  ;;  %v258_v44 = vpack.c.bf16 %v228_v41, %v226_v40 }
  0xe6   :  { %v158_v46 = vpop.f32.mrb[5].mxu0  ;;  %v4756_v49 = vadd.f32 %v156_v43, %v4726_v30 }
  0xe7   :  { %v4753_v47 = vadd.f32 %v158_v46, %v4723_v29  ;;  %v160_v48 = vpop.f32.mrb[6].mxu0  ;;  %509 = vmatprep.mubr.bf16.mxu1 %v258_v44 }
  0xe8   :  { %v4759_v50 = vadd.f32 %v160_v48, %v4726_v30  ;;  %v162_v51 = vpop.f32.mrb[7].mxu0  ;;  %510 = vmatmul.mubr.bf16.vlgmr.msra.gmra.mrb[0].mxu1 %v257_v45  ;;  %v229_v56 = vmax.f32 %v4756_v49, 0.0 }
  0xe9   :  { %v4762_v52 = vadd.f32 %v162_v51, %v4723_v29  ;;  %v230_v54 = vmax.f32 %v4753_v47, 0.0 }
  0xea   :  { %v231_v53 = vmax.f32 %v4759_v50, 0.0 }
  0xeb   :  { %v232_v55 = vmax.f32 %v4762_v52, 0.0 }
  0xec   :  { %v259_v59 = vpack.c.bf16 %v231_v53, %v229_v56 }
  0xed   :  { %v260_v57 = vpack.c.bf16 %v232_v55, %v230_v54  ;;  %v166_v58 = vpop.f32.mrb[8].mxu0 }
  0xee   :  { %v168_v60 = vpop.f32.mrb[9].mxu0  ;;  %v4780_v63 = vadd.f32 %v166_v58, %v4726_v30 }
  0xef   :  { %v4777_v61 = vadd.f32 %v168_v60, %v4723_v29  ;;  %v170_v62 = vpop.f32.mrb[10].mxu0  ;;  %519 = vmatprep.mubr.bf16.mxu1 %v260_v57 }
  0xf0   :  { %v4783_v0 = vadd.f32 %v170_v62, %v4726_v30  ;;  %v172_v2 = vpop.f32.mrb[11].mxu0  ;;  %520 = vmatmul.mubr.bf16.gmra.mrb[4].mxu1 %v259_v59  ;;  %v233_v7 = vmax.f32 %v4780_v63, 0.0 }
  0xf1   :  { %v4786_v3 = vadd.f32 %v172_v2, %v4723_v29  ;;  %v234_v5 = vmax.f32 %v4777_v61, 0.0 }
  0xf2   :  { %v235_v4 = vmax.f32 %v4783_v0, 0.0 }
  0xf3   :  { %v236_v6 = vmax.f32 %v4786_v3, 0.0 }
  0xf4   :  { %v261_v10 = vpack.c.bf16 %v235_v4, %v233_v7 }
  0xf5   :  { %v262_v8 = vpack.c.bf16 %v236_v6, %v234_v5  ;;  %v176_v9 = vpop.f32.mrb[12].mxu0 }
  0xf6   :  { %v178_v11 = vpop.f32.mrb[13].mxu0  ;;  %v4804_v14 = vadd.f32 %v176_v9, %v4726_v30 }
  0xf7   :  { %v4801_v12 = vadd.f32 %v178_v11, %v4723_v29  ;;  %v180_v13 = vpop.f32.mrb[14].mxu0  ;;  %529 = vmatprep.mubr.bf16.mxu1 %v262_v8 }
  0xf8   :  { %v4807_v15 = vadd.f32 %v180_v13, %v4726_v30  ;;  %v182_v16 = vpop.f32.mrb[15].mxu0  ;;  %530 = vmatmul.mubr.bf16.gmra.mrb[8].mxu1 %v261_v10  ;;  %v237_v21 = vmax.f32 %v4804_v14, 0.0 }
  0xf9   :  { %v4810_v17 = vadd.f32 %v182_v16, %v4723_v29  ;;  %v238_v19 = vmax.f32 %v4801_v12, 0.0 }
  0xfa   :  { %v239_v18 = vmax.f32 %v4807_v15, 0.0 }
  0xfb   :  { %v240_v20 = vmax.f32 %v4810_v17, 0.0 }
  0xfc   :  { %v263_v24 = vpack.c.bf16 %v239_v18, %v237_v21 }
  0xfd   :  { %v264_v22 = vpack.c.bf16 %v240_v20, %v238_v19  ;;  %v186_v23 = vpop.f32.mrb[16].mxu0 }
  0xfe   :  { %v188_v25 = vpop.f32.mrb[17].mxu0  ;;  %v4828_v32 = vadd.f32 %v186_v23, %v4726_v30 }
  0xff   :  { %v4825_v27 = vadd.f32 %v188_v25, %v4723_v29  ;;  %v190_v31 = vpop.f32.mrb[18].mxu0  ;;  %539 = vmatprep.mubr.bf16.mxu1 %v264_v22 }
 0x100   :  { %v4831_v34 = vadd.f32 %v190_v31, %v4726_v30  ;;  %v192_v37 = vpop.f32.mrb[19].mxu0  ;;  %540 = vmatmul.mubr.bf16.gmra.mrb[12].mxu1 %v263_v24  ;;  %v241_v48 = vmax.f32 %v4828_v32, 0.0 }
 0x101   :  { %v4834_v43 = vadd.f32 %v192_v37, %v4723_v29  ;;  %v242_v45 = vmax.f32 %v4825_v27, 0.0 }
 0x102   :  { %v7182_v44 = vmax.f32 %v4831_v34, 0.0 }
 0x103   :  { %v7173_v46 = vmax.f32 %v4834_v43, 0.0 }
 0x104   :  { %v265_v58 = vpack.c.bf16 %v7182_v44, %v241_v48 }
 0x105   :  { %v266_v51 = vpack.c.bf16 %v7173_v46, %v242_v45  ;;  %v196_v57 = vpop.f32.mrb[20].mxu0 }
 0x106   :  { %v198_v59 = vpop.f32.mrb[21].mxu0  ;;  %v4852_v2 = vadd.f32 %v196_v57, %v4726_v30 }
 0x107   :  { %v4849_v60 = vadd.f32 %v198_v59, %v4723_v29  ;;  %v200_v62 = vpop.f32.mrb[22].mxu0  ;;  %549 = vmatprep.mubr.bf16.mxu1 %v266_v51 }
 0x108   :  { %v4855_v8 = vadd.f32 %v200_v62, %v4726_v30  ;;  %v202_v9 = vpop.f32.mrb[23].mxu0  ;;  %550 = vmatmul.mubr.bf16.gmra.mrb[16].mxu1 %v265_v58  ;;  %v7171_v22 = vmax.f32 %v4852_v2, 0.0 }
 0x109   :  { %v4858_v10 = vadd.f32 %v202_v9, %v4723_v29  ;;  %v7172_v13 = vmax.f32 %v4849_v60, 0.0 }
 0x10a   :  { %v7170_v11 = vmax.f32 %v4855_v8, 0.0 }
 0x10b   :  { %v7169_v16 = vmax.f32 %v4858_v10, 0.0 }
 0x10c   :  { %v267_v25 = vpack.c.bf16 %v7170_v11, %v7171_v22 }
 0x10d   :  { %v268_v23 = vpack.c.bf16 %v7169_v16, %v7172_v13  ;;  %v206_v24 = vpop.f32.mrb[24].mxu0 }
 0x10e   :  { %v208_v31 = vpop.f32.mrb[25].mxu0  ;;  %v4876_v57 = vadd.f32 %v206_v24, %v4726_v30 }
 0x10f   :  { %v4873_v37 = vadd.f32 %v208_v31, %v4723_v29  ;;  %v210_v51 = vpop.f32.mrb[26].mxu0  ;;  %559 = vmatprep.mubr.bf16.mxu1 %v268_v23 }
 0x110   :  { %v4879_v58 = vadd.f32 %v210_v51, %v4726_v30  ;;  %v212_v59 = vpop.f32.mrb[27].mxu0  ;;  %560 = vmatmul.mubr.bf16.gmra.mrb[20].mxu1 %v267_v25  ;;  %v7177_v16 = vmax.f32 %v4876_v57, 0.0 }
 0x111   :  { %v4882_v62 = vadd.f32 %v212_v59, %v4723_v29  ;;  %v7175_v1 = vmax.f32 %v4873_v37, 0.0 }
 0x112   :  { %v7176_v9 = vmax.f32 %v4879_v58, 0.0 }
 0x113   :  { %v7174_v31 = vmax.f32 %v4882_v62, 0.0 }
 0x114   :  { %v269_v25 = vpack.c.bf16 %v7176_v9, %v7177_v16 }
 0x115   :  { %v270_v23 = vpack.c.bf16 %v7174_v31, %v7175_v1  ;;  %v216_v24 = vpop.f32.mrb[28].mxu0 }
 0x116   :  { %v218_v51 = vpop.f32.mrb[29].mxu0  ;;  %v4900_v22 = vadd.f32 %v216_v24, %v4726_v30  ;;  %v4124_v24 = vld [vmem:[%s7161_s3 + $0x1e0] ss:$8 sps:$4 sm:$0xff]  }
 0x117   :  { %v4897_v59 = vadd.f32 %v218_v51, %v4723_v29  ;;  %v220_v11 = vpop.f32.mrb[30].mxu0  ;;  %569 = vmatprep.mubr.bf16.mxu1 %v270_v23 }
 0x118   :  { %v4903_v13 = vadd.f32 %v220_v11, %v4726_v30  ;;  %v222_v46 = vpop.f32.mrb[31].mxu0  ;;  %570 = vmatmul.mubr.bf16.gmra.mrb[24].mxu1 %v269_v25  ;;  %v7180_v16 = vmax.f32 %v4900_v22, 0.0  ;;  %v4126_v11 = vld [vmem:[%s7161_s3 + $0x1e4] ss:$8 sps:$4 sm:$0xff]   ;;  %v4129_v25 = vld [vmem:[%s7161_s3 + $0x1f4] ss:$8 sps:$4 sm:$0xff]  }
 0x119   :  { %v4906_v31 = vadd.f32 %v222_v46, %v4723_v29  ;;  %v7181_v9 = vmax.f32 %v4897_v59, 0.0  ;;  %v4123_v29 = vld [vmem:[%s7161_s3 + $0x1d4] ss:$8 sps:$4 sm:$0xff]   ;;  %v4121_v46 = vld [vmem:[%s7161_s3 + $0x1d0] ss:$8 sps:$4 sm:$0xff]  }
 0x11a   :  { %v7179_v1 = vmax.f32 %v4903_v13, 0.0  ;;  %902 = vmatprep.subr.bf16.mxu0 %v4123_v29  ;;  %v4132_v29 = vld [vmem:[%s7161_s3 + $0x204] ss:$8 sps:$4 sm:$0xff]  }
 0x11b   :  { %v7178_v51 = vmax.f32 %v4906_v31, 0.0  ;;  %903 = vmatpush1.bf16.msra.mxu0 %v4121_v46  ;;  %v4135_v46 = vld [vmem:[%s7161_s3 + $0x214] ss:$8 sps:$4 sm:$0xff]   ;;  %1275 = vmatprep.subr.bf16.mxu1 %v4132_v29  ;;  %v4144_v29 = vld [vmem:[%s7161_s3 + $0x244] ss:$8 sps:$4 sm:$0xff]  }
 0x11c   :  { %v271_v30 = vpack.c.bf16 %v7179_v1, %v7180_v16  ;;  %904 = vmatprep.subr.bf16.mxu0 %v4126_v11  ;;  %v4133_v11 = vld [vmem:[%s7161_s3 + $0x210] ss:$8 sps:$4 sm:$0xff]  }
 0x11d   :  { %v272_v23 = vpack.c.bf16 %v7178_v51, %v7181_v9 }
 0x11f   :  { %579 = vmatprep.mubr.bf16.mxu1 %v272_v23  ;;  %905 = vmatpush1.bf16.msra.mxu0 %v4124_v24  ;;  %v4127_v23 = vld [vmem:[%s7161_s3 + $0x1f0] ss:$8 sps:$4 sm:$0xff]   ;;  %v4138_v24 = vld [vmem:[%s7161_s3 + $0x224] ss:$8 sps:$4 sm:$0xff]  }
 0x120   :  { %580 = vmatmul.mubr.bf16.gmra.mrb[28].mxu1 %v271_v30  ;;  %906 = vmatprep.subr.bf16.mxu0 %v4129_v25  ;;  %v4130_v30 = vld [vmem:[%s7161_s3 + $0x200] ss:$8 sps:$4 sm:$0xff]  }
 0x121   :  { %1276 = vmatpush1.bf16.msra.mxu1 %v4130_v30  ;;  %v4136_v25 = vld [vmem:[%s7161_s3 + $0x220] ss:$8 sps:$4 sm:$0xff]   ;;  %v4139_v30 = vld [vmem:[%s7161_s3 + $0x230] ss:$8 sps:$4 sm:$0xff]  }
 0x122   :  { %1277 = vmatprep.subr.bf16.mxu1 %v4135_v46  ;;  %v4142_v46 = vld [vmem:[%s7161_s3 + $0x240] ss:$8 sps:$4 sm:$0xff]  }
 0x123   :  { %907 = vmatpush1.bf16.msra.mxu0 %v4127_v23  ;;  %v4141_v23 = vld [vmem:[%s7161_s3 + $0x234] ss:$8 sps:$4 sm:$0xff]  }
 0x125   :  { %1278 = vmatpush1.bf16.msra.mxu1 %v4133_v11  ;;  %v4147_v11 = vld [vmem:[%s7161_s3 + $0x254] ss:$8 sps:$4 sm:$0xff]  }
 0x126   :  { %1279 = vmatprep.subr.bf16.mxu1 %v4138_v24  ;;  %v4145_v24 = vld [vmem:[%s7161_s3 + $0x250] ss:$8 sps:$4 sm:$0xff]  }
 0x129   :  { %1280 = vmatpush1.bf16.msra.mxu1 %v4136_v25  ;;  %v4150_v25 = vld [vmem:[%s7161_s3 + $0x264] ss:$8 sps:$4 sm:$0xff]  }
 0x12a   :  { %1281 = vmatprep.subr.bf16.mxu1 %v4141_v23  ;;  %v4148_v23 = vld [vmem:[%s7161_s3 + $0x260] ss:$8 sps:$4 sm:$0xff]  }
 0x12d   :  { %1282 = vmatpush1.bf16.msra.mxu1 %v4139_v30  ;;  %v4153_v30 = vld [vmem:[%s7161_s3 + $0x274] ss:$8 sps:$4 sm:$0xff]  }
 0x12e   :  { %1283 = vmatprep.subr.bf16.mxu1 %v4144_v29  ;;  %v4151_v29 = vld [vmem:[%s7161_s3 + $0x270] ss:$8 sps:$4 sm:$0xff]  }
 0x131   :  { %1284 = vmatpush1.bf16.msra.mxu1 %v4142_v46  ;;  %v4156_v46 = vld [vmem:[%s7161_s3 + $0x284] ss:$8 sps:$4 sm:$0xff]  }
 0x132   :  { %1285 = vmatprep.subr.bf16.mxu1 %v4147_v11  ;;  %v4154_v11 = vld [vmem:[%s7161_s3 + $0x280] ss:$8 sps:$4 sm:$0xff]  }
 0x135   :  { %1286 = vmatpush1.bf16.msra.mxu1 %v4145_v24  ;;  %v4159_v24 = vld [vmem:[%s7161_s3 + $0x294] ss:$8 sps:$4 sm:$0xff]  }
 0x136   :  { %1287 = vmatprep.subr.bf16.mxu1 %v4150_v25  ;;  %v4157_v25 = vld [vmem:[%s7161_s3 + $0x290] ss:$8 sps:$4 sm:$0xff]  }
 0x139   :  { %1288 = vmatpush1.bf16.msra.mxu1 %v4148_v23  ;;  %v4162_v23 = vld [vmem:[%s7161_s3 + $0x2a4] ss:$8 sps:$4 sm:$0xff]  }
 0x13a   :  { %1289 = vmatprep.subr.bf16.mxu1 %v4153_v30  ;;  %v4160_v30 = vld [vmem:[%s7161_s3 + $0x2a0] ss:$8 sps:$4 sm:$0xff]  }
 0x13d   :  { %1290 = vmatpush1.bf16.msra.mxu1 %v4151_v29  ;;  %v4165_v29 = vld [vmem:[%s7161_s3 + $0x2b4] ss:$8 sps:$4 sm:$0xff]  }
 0x13e   :  { %1291 = vmatprep.subr.bf16.mxu1 %v4156_v46  ;;  %v4163_v46 = vld [vmem:[%s7161_s3 + $0x2b0] ss:$8 sps:$4 sm:$0xff]  }
 0x141   :  { %1292 = vmatpush1.bf16.msra.mxu1 %v4154_v11  ;;  %v4168_v11 = vld [vmem:[%s7161_s3 + $0x2c4] ss:$8 sps:$4 sm:$0xff]  }
 0x142   :  { %1293 = vmatprep.subr.bf16.mxu1 %v4159_v24  ;;  %v4166_v24 = vld [vmem:[%s7161_s3 + $0x2c0] ss:$8 sps:$4 sm:$0xff]  }
 0x145   :  { %1294 = vmatpush1.bf16.msra.mxu1 %v4157_v25  ;;  %v305_v25 = vld [vmem:[%s7163_s4] sm:$0x3] }
 0x146   :  { %1295 = vmatprep.subr.bf16.mxu1 %v4162_v23  ;;  %v5020_v23 = vrot.slane %v305_v25, %v4720_v28 }
 0x149   :  { %1296 = vmatpush1.bf16.msra.mxu1 %v4160_v30  ;;  %v5023_v30 = vrot.slane %v305_v25, %v4715_v26 }
 0x14a   :  { %1297 = vmatprep.subr.bf16.mxu1 %v4165_v29 }
 0x14d   :  { %1298 = vmatpush1.bf16.msra.mxu1 %v4163_v46 }
 0x14e   :  { %1299 = vmatprep.subr.bf16.mxu1 %v4168_v11 }
 0x151   :  { %1300 = vmatpush1.bf16.msra.mxu1 %v4166_v24 }
 0x1bb   :  { %v511_v29 = vpop.f32.mrb[0].mxu1 }
 0x1bc   :  { %v512_v51 = vadd.f32 %v511_v29, %v5020_v23  ;;  %v513_v46 = vpop.f32.mrb[1].mxu1 }
 0x1bd   :  { %v514_v1 = vadd.f32 %v513_v46, %v5023_v30  ;;  %v515_v16 = vpop.f32.mrb[2].mxu1 }
 0x1be   :  { %v516_v11 = vadd.f32 %v515_v16, %v5020_v23  ;;  %v517_v24 = vpop.f32.mrb[3].mxu1  ;;  %v5035_v25 = vadd.f32 %v512_v51, %v225_v42 }
 0x1bf   :  { %v5030_v9 = vadd.f32 %v514_v1, %v226_v40  ;;  %v518_v44 = vadd.f32 %v517_v24, %v5023_v30 }
 0x1c0   :  { %v5039_v29 = vadd.f32 %v516_v11, %v227_v39  ;;  %v622_v24 = vmax.f32 %v5035_v25, 0.0 }
 0x1c1   :  { %v5043_v46 = vadd.f32 %v518_v44, %v228_v41  ;;  %v623_v33 = vmax.f32 %v5030_v9, 0.0  ;;  %v4184_v9 = vld [vmem:[%s7164_s5 + $0x40] sm:$0xff]  }
 0x1c2   :  { %v624_v16 = vmax.f32 %v5039_v29, 0.0  ;;  %3883 = vmatprep.subr.bf16.mxu0 %v4184_v9 }
 0x1c3   :  { %v7183_v1 = vmax.f32 %v5043_v46, 0.0  ;;  %v521_v40 = vpop.f32.mrb[4].mxu1  ;;  %v7294_v25 = vmax.f32 %v5043_v46, 0.0 }
 0x1c4   :  { %v522_v35 = vadd.f32 %v521_v40, %v5020_v23  ;;  %v523_v42 = vpop.f32.mrb[5].mxu1  ;;  %v654_v41 = vpack.c.bf16 %v624_v16, %v622_v24 }
 0x1c5   :  { %v524_v36 = vadd.f32 %v523_v42, %v5023_v30  ;;  %v525_v39 = vpop.f32.mrb[6].mxu1  ;;  %v655_v38 = vpack.c.bf16 %v7183_v1, %v623_v33 }
 0x1c6   :  { %v526_v44 = vadd.f32 %v525_v39, %v5020_v23  ;;  %v527_v51 = vpop.f32.mrb[7].mxu1  ;;  %v5067_v42 = vadd.f32 %v522_v35, %v229_v56 }
 0x1c7   :  { %v5062_v11 = vadd.f32 %v524_v36, %v230_v54  ;;  %v528_v40 = vadd.f32 %v527_v51, %v5023_v30  ;;  %908 = vmatprep.mubr.bf16.mxu0 %v655_v38 }
 0x1c8   :  { %v5071_v1 = vadd.f32 %v526_v44, %v231_v53  ;;  %909 = vmatmul.mubr.bf16.vlgmr.msra.gmra.mrb[32].mxu0 %v654_v41  ;;  %v626_v49 = vmax.f32 %v5067_v42, 0.0  ;;  %v4189_v42 = vld [vmem:[%s7164_s5 + $0x10] sm:$0xff]  }
 0x1c9   :  { %v5075_v39 = vadd.f32 %v528_v40, %v232_v55  ;;  %v627_v54 = vmax.f32 %v5062_v11, 0.0 }
 0x1ca   :  { %v628_v47 = vmax.f32 %v5071_v1, 0.0 }
 0x1cb   :  { %v629_v36 = vmax.f32 %v5075_v39, 0.0  ;;  %v531_v38 = vpop.f32.mrb[8].mxu1 }
 0x1cc   :  { %v532_v56 = vadd.f32 %v531_v38, %v5020_v23  ;;  %v533_v35 = vpop.f32.mrb[9].mxu1  ;;  %v656_v44 = vpack.c.bf16 %v628_v47, %v626_v49 }
 0x1cd   :  { %v534_v50 = vadd.f32 %v533_v35, %v5023_v30  ;;  %v535_v53 = vpop.f32.mrb[10].mxu1  ;;  %v657_v52 = vpack.c.bf16 %v629_v36, %v627_v54 }
 0x1ce   :  { %v536_v55 = vadd.f32 %v535_v53, %v5020_v23  ;;  %v537_v41 = vpop.f32.mrb[11].mxu1  ;;  %v5099_v38 = vadd.f32 %v532_v56, %v233_v7 }
 0x1cf   :  { %v5094_v51 = vadd.f32 %v534_v50, %v234_v5  ;;  %v538_v40 = vadd.f32 %v537_v41, %v5023_v30  ;;  %918 = vmatprep.mubr.bf16.mxu0 %v657_v52 }
 0x1d0   :  { %v5103_v35 = vadd.f32 %v536_v55, %v235_v4  ;;  %919 = vmatmul.mubr.bf16.gmra.mrb[36].mxu0 %v656_v44  ;;  %v630_v63 = vmax.f32 %v5099_v38, 0.0  ;;  %v4194_v38 = vld [vmem:[%s7164_s5 + $0x68] sm:$0xff]  }
 0x1d1   :  { %v5107_v53 = vadd.f32 %v538_v40, %v236_v6  ;;  %v631_v5 = vmax.f32 %v5094_v51, 0.0 }
 0x1d2   :  { %v632_v61 = vmax.f32 %v5103_v35, 0.0 }
 0x1d3   :  { %v633_v50 = vmax.f32 %v5107_v53, 0.0  ;;  %v541_v52 = vpop.f32.mrb[12].mxu1 }
 0x1d4   :  { %v542_v7 = vadd.f32 %v541_v52, %v5020_v23  ;;  %v543_v56 = vpop.f32.mrb[13].mxu1  ;;  %v658_v41 = vpack.c.bf16 %v632_v61, %v630_v63 }
 0x1d5   :  { %v544_v0 = vadd.f32 %v543_v56, %v5023_v30  ;;  %v545_v4 = vpop.f32.mrb[14].mxu1  ;;  %v659_v3 = vpack.c.bf16 %v633_v50, %v631_v5 }
 0x1d6   :  { %v546_v6 = vadd.f32 %v545_v4, %v5020_v23  ;;  %v547_v55 = vpop.f32.mrb[15].mxu1  ;;  %v5131_v52 = vadd.f32 %v542_v7, %v237_v21 }
 0x1d7   :  { %v5126_v44 = vadd.f32 %v544_v0, %v238_v19  ;;  %v548_v40 = vadd.f32 %v547_v55, %v5023_v30  ;;  %928 = vmatprep.mubr.bf16.mxu0 %v659_v3 }
 0x1d8   :  { %v5135_v56 = vadd.f32 %v546_v6, %v239_v18  ;;  %929 = vmatmul.mubr.bf16.gmra.mrb[40].mxu0 %v658_v41  ;;  %v7189_v14 = vmax.f32 %v5131_v52, 0.0 }
 0x1d9   :  { %v5139_v4 = vadd.f32 %v548_v40, %v240_v20  ;;  %v7185_v19 = vmax.f32 %v5126_v44, 0.0 }
 0x1da   :  { %v7186_v12 = vmax.f32 %v5135_v56, 0.0 }
 0x1db   :  { %v7184_v0 = vmax.f32 %v5139_v4, 0.0  ;;  %v551_v3 = vpop.f32.mrb[16].mxu1 }
 0x1dc   :  { %v552_v21 = vadd.f32 %v551_v3, %v5020_v23  ;;  %v553_v7 = vpop.f32.mrb[17].mxu1  ;;  %v660_v55 = vpack.c.bf16 %v7186_v12, %v7189_v14 }
 0x1dd   :  { %v554_v15 = vadd.f32 %v553_v7, %v5023_v30  ;;  %v555_v18 = vpop.f32.mrb[18].mxu1  ;;  %v661_v17 = vpack.c.bf16 %v7184_v0, %v7185_v19  ;;  %v7280_v7 = vmax.f32 %v4831_v34, 0.0  ;;  %v7281_v0 = vmax.f32 %v4834_v43, 0.0 }
 0x1de   :  { %v556_v20 = vadd.f32 %v555_v18, %v5020_v23  ;;  %v557_v6 = vpop.f32.mrb[19].mxu1  ;;  %v5163_v3 = vadd.f32 %v552_v21, %v241_v48 }
 0x1df   :  { %v5158_v41 = vadd.f32 %v554_v15, %v242_v45  ;;  %v558_v40 = vadd.f32 %v557_v6, %v5023_v30  ;;  %938 = vmatprep.mubr.bf16.mxu0 %v661_v17 }
 0x1e0   :  { %v5167_v18 = vadd.f32 %v556_v20, %v7280_v7  ;;  %939 = vmatmul.mubr.bf16.gmra.mrb[44].mxu0 %v660_v55  ;;  %v7193_v32 = vmax.f32 %v5163_v3, 0.0 }
 0x1e1   :  { %v5171_v19 = vadd.f32 %v558_v40, %v7281_v0  ;;  %v7188_v45 = vmax.f32 %v5158_v41, 0.0  ;;  %v7282_v40 = vmax.f32 %v4849_v60, 0.0 }
 0x1e2   :  { %v7190_v27 = vmax.f32 %v5167_v18, 0.0 }
 0x1e3   :  { %v7187_v15 = vmax.f32 %v5171_v19, 0.0  ;;  %v561_v17 = vpop.f32.mrb[20].mxu1 }
 0x1e4   :  { %v562_v48 = vadd.f32 %v561_v17, %v5020_v23  ;;  %v563_v21 = vpop.f32.mrb[21].mxu1  ;;  %v662_v55 = vpack.c.bf16 %v7190_v27, %v7193_v32 }
 0x1e5   :  { %v564_v34 = vadd.f32 %v563_v21, %v5023_v30  ;;  %v565_v20 = vpop.f32.mrb[22].mxu1  ;;  %v663_v43 = vpack.c.bf16 %v7187_v15, %v7188_v45  ;;  %v7283_v21 = vmax.f32 %v4852_v2, 0.0  ;;  %v7284_v15 = vmax.f32 %v4855_v8, 0.0 }
 0x1e6   :  { %v566_v0 = vadd.f32 %v565_v20, %v5020_v23  ;;  %v567_v6 = vpop.f32.mrb[23].mxu1  ;;  %v7285_v45 = vmax.f32 %v4858_v10, 0.0 }
 0x1e7   :  { %v5190_v7 = vadd.f32 %v564_v34, %v7282_v40  ;;  %v568_v17 = vadd.f32 %v567_v6, %v5023_v30  ;;  %948 = vmatprep.mubr.bf16.mxu0 %v663_v43  ;;  %v5195_v12 = vadd.f32 %v562_v48, %v7283_v21 }
 0x1e8   :  { %v5199_v20 = vadd.f32 %v566_v0, %v7284_v15  ;;  %949 = vmatmul.mubr.bf16.gmra.mrb[48].mxu0 %v662_v55 }
 0x1e9   :  { %v5203_v14 = vadd.f32 %v568_v17, %v7285_v45  ;;  %v7192_v34 = vmax.f32 %v5190_v7, 0.0  ;;  %v642_v2 = vmax.f32 %v5195_v12, 0.0  ;;  %v7286_v17 = vmax.f32 %v4873_v37, 0.0 }
 0x1ea   :  { %v7194_v60 = vmax.f32 %v5199_v20, 0.0 }
 0x1eb   :  { %v7191_v6 = vmax.f32 %v5203_v14, 0.0  ;;  %v571_v43 = vpop.f32.mrb[24].mxu1 }
 0x1ec   :  { %v572_v48 = vadd.f32 %v571_v43, %v5020_v23  ;;  %v573_v40 = vpop.f32.mrb[25].mxu1  ;;  %v664_v55 = vpack.c.bf16 %v7194_v60, %v642_v2 }
 0x1ed   :  { %v574_v8 = vadd.f32 %v573_v40, %v5023_v30  ;;  %v575_v15 = vpop.f32.mrb[26].mxu1  ;;  %v665_v10 = vpack.c.bf16 %v7191_v6, %v7192_v34  ;;  %v7287_v40 = vmax.f32 %v4876_v57, 0.0  ;;  %v7288_v6 = vmax.f32 %v4879_v58, 0.0 }
 0x1ee   :  { %v576_v45 = vadd.f32 %v575_v15, %v5020_v23  ;;  %v577_v0 = vpop.f32.mrb[27].mxu1  ;;  %v7289_v34 = vmax.f32 %v4882_v62, 0.0 }
 0x1ef   :  { %v5222_v21 = vadd.f32 %v574_v8, %v7286_v17  ;;  %v578_v43 = vadd.f32 %v577_v0, %v5023_v30  ;;  %958 = vmatprep.mubr.bf16.mxu0 %v665_v10  ;;  %v5227_v27 = vadd.f32 %v572_v48, %v7287_v40 }
 0x1f0   :  { %v5231_v15 = vadd.f32 %v576_v45, %v7288_v6  ;;  %959 = vmatmul.mubr.bf16.gmra.mrb[52].mxu0 %v664_v55 }
 0x1f1   :  { %v5235_v32 = vadd.f32 %v578_v43, %v7289_v34  ;;  %v7196_v8 = vmax.f32 %v5222_v21, 0.0  ;;  %v646_v57 = vmax.f32 %v5227_v27, 0.0  ;;  %v7290_v43 = vmax.f32 %v4897_v59, 0.0 }
 0x1f2   :  { %v648_v37 = vmax.f32 %v5231_v15, 0.0 }
 0x1f3   :  { %v7195_v0 = vmax.f32 %v5235_v32, 0.0  ;;  %v581_v10 = vpop.f32.mrb[28].mxu1 }
 0x1f4   :  { %v582_v48 = vadd.f32 %v581_v10, %v5020_v23  ;;  %v583_v17 = vpop.f32.mrb[29].mxu1  ;;  %v666_v55 = vpack.c.bf16 %v648_v37, %v646_v57 }
 0x1f5   :  { %v584_v58 = vadd.f32 %v583_v17, %v5023_v30  ;;  %v585_v6 = vpop.f32.mrb[30].mxu1  ;;  %v667_v62 = vpack.c.bf16 %v7195_v0, %v7196_v8  ;;  %v7291_v17 = vmax.f32 %v4900_v22, 0.0  ;;  %v7292_v0 = vmax.f32 %v4903_v13, 0.0 }
 0x1f6   :  { %v586_v34 = vadd.f32 %v585_v6, %v5020_v23  ;;  %v587_v45 = vpop.f32.mrb[31].mxu1  ;;  %v7293_v6 = vmax.f32 %v4906_v31, 0.0  ;;  %v4171_v31 = vld [vmem:[%s7161_s3 + $0x2d4] ss:$8 sps:$4 sm:$0xff]  }
 0x1f7   :  { %v5254_v40 = vadd.f32 %v584_v58, %v7290_v43  ;;  %v588_v10 = vadd.f32 %v587_v45, %v5023_v30  ;;  %968 = vmatprep.mubr.bf16.mxu0 %v667_v62  ;;  %v5259_v60 = vadd.f32 %v582_v48, %v7291_v17  ;;  %1301 = vmatprep.subr.bf16.mxu1 %v4171_v31  ;;  %v4174_v48 = vld [vmem:[%s7161_s3 + $0x2e4] ss:$8 sps:$4 sm:$0xff]   ;;  %v4177_v45 = vld [vmem:[%s7161_s3 + $0x2f4] ss:$8 sps:$4 sm:$0xff]  }
 0x1f8   :  { %v5263_v23 = vadd.f32 %v586_v34, %v7292_v0  ;;  %969 = vmatmul.mubr.bf16.gmra.mrb[56].mxu0 %v666_v55  ;;  %v4169_v0 = vld [vmem:[%s7161_s3 + $0x2d0] ss:$8 sps:$4 sm:$0xff]   ;;  %v4172_v34 = vld [vmem:[%s7161_s3 + $0x2e0] ss:$8 sps:$4 sm:$0xff]   ;;  %v4180_v43 = vld [vmem:[%s7159_s1 + $0x4] ss:$8 sps:$4 sm:$0xff]  }
 0x1f9   :  { %v5267_v8 = vadd.f32 %v588_v10, %v7293_v6  ;;  %v7202_v58 = vmax.f32 %v5254_v40, 0.0  ;;  %v7199_v62 = vmax.f32 %v5259_v60, 0.0  ;;  %1302 = vmatpush1.bf16.msra.mxu1 %v4169_v0  ;;  %v4175_v55 = vld [vmem:[%s7161_s3 + $0x2f0] ss:$8 sps:$4 sm:$0xff]   ;;  %v3577_v10 = vld [vmem:[%s7163_s4 + $0x2] sm:$0x3] }
 0x1fa   :  { %v7198_v59 = vmax.f32 %v5263_v23, 0.0  ;;  %1303 = vmatprep.subr.bf16.mxu1 %v4174_v48  ;;  %v5306_v17 = vrot.slane %v3577_v10, %v4720_v28  ;;  %v5309_v6 = vrot.slane %v3577_v10, %v4715_v26 }
 0x1fb   :  { %v7197_v30 = vmax.f32 %v5267_v8, 0.0 }
 0x1fc   :  { %v668_v22 = vpack.c.bf16 %v7198_v59, %v7199_v62 }
 0x1fd   :  { %v669_v13 = vpack.c.bf16 %v7197_v30, %v7202_v58  ;;  %1304 = vmatpush1.bf16.msra.mxu1 %v4172_v34 }
 0x1fe   :  { %1305 = vmatprep.subr.bf16.mxu1 %v4177_v45 }
 0x1ff   :  { %978 = vmatprep.mubr.bf16.mxu0 %v669_v13 }
 0x200   :  { %979 = vmatmul.mubr.bf16.gmra.mrb[60].mxu0 %v668_v22 }
 0x201   :  { %1306 = vmatpush1.bf16.msra.mxu1 %v4175_v55 }
 0x202   :  { %1849 = vmatprep.subr.bf16.mxu1 %v4180_v43 }
 0x29b   :  { %v910_v13 = vpop.f32.mrb[32].mxu0 }
 0x29c   :  { %v911_v22 = vadd.f32 %v910_v13, %v5306_v17  ;;  %v912_v31 = vpop.f32.mrb[33].mxu0 }
 0x29d   :  { %v913_v0 = vadd.f32 %v912_v31, %v5309_v6  ;;  %v914_v48 = vpop.f32.mrb[34].mxu0 }
 0x29e   :  { %v5315_v34 = vadd.f32 %v911_v22, %v622_v24  ;;  %v915_v45 = vadd.f32 %v914_v48, %v5306_v17  ;;  %v916_v55 = vpop.f32.mrb[35].mxu0  ;;  %v4185_v22 = vld [vmem:[%s7164_s5] sm:$0xff]  }
 0x29f   :  { %v5320_v43 = vadd.f32 %v913_v0, %v623_v33  ;;  %v917_v10 = vadd.f32 %v916_v55, %v5309_v6  ;;  %v4178_v0 = vld [vmem:[%s7159_s1] ss:$8 sps:$4 sm:$0xff]   ;;  %3884 = vmatpush3.bf16.msra.mxu0 %v4185_v22 }
 0x2a0   :  { %v1021_v30 = vmax.f32 %v5315_v34, 0.0  ;;  %v5326_v13 = vadd.f32 %v915_v45, %v624_v16  ;;  %v4183_v45 = vld [vmem:[%s7159_s1 + $0x14] ss:$8 sps:$4 sm:$0xff]   ;;  %v4186_v55 = vld [vmem:[%s7164_s5 + $0x48] sm:$0xff]  }
 0x2a1   :  { %v7201_v31 = vmax.f32 %v5320_v43, 0.0  ;;  %v5331_v24 = vadd.f32 %v917_v10, %v7294_v25  ;;  %3885 = vmatprep.subr.bf16.mxu0 %v4186_v55 }
 0x2a2   :  { %v1023_v33 = vmax.f32 %v5326_v13, 0.0  ;;  %v4200_v13 = vld [vmem:[%s7161_s3] ss:$8 sps:$4 sm:$0xff]  }
 0x2a3   :  { %v7200_v29 = vmax.f32 %v5331_v24, 0.0  ;;  %v920_v16 = vpop.f32.mrb[36].mxu0 }
 0x2a4   :  { %v921_v46 = vadd.f32 %v920_v16, %v5306_v17  ;;  %v922_v48 = vpop.f32.mrb[37].mxu0  ;;  %v4187_v16 = vld [vmem:[%s7164_s5 + $0x8] sm:$0xff]   ;;  %v1053_v22 = vpack.c.bf16 %v1023_v33, %v1021_v30 }
 0x2a5   :  { %v923_v10 = vadd.f32 %v922_v48, %v5309_v6  ;;  %v924_v25 = vpop.f32.mrb[38].mxu0  ;;  %v1054_v9 = vpack.c.bf16 %v7200_v29, %v7201_v31  ;;  %v4188_v48 = vld [vmem:[%s7164_s5 + $0x50] sm:$0xff]   ;;  %3886 = vmatpush3.bf16.msra.mxu0 %v4187_v16 }
 0x2a6   :  { %v925_v59 = vadd.f32 %v924_v25, %v5306_v17  ;;  %v926_v62 = vpop.f32.mrb[39].mxu0  ;;  %v5369_v29 = vadd.f32 %v921_v46, %v626_v49  ;;  %v4181_v25 = vld [vmem:[%s7159_s1 + $0x10] ss:$8 sps:$4 sm:$0xff]   ;;  %3887 = vmatprep.subr.bf16.mxu0 %v4188_v48 }
 0x2a7   :  { %v5373_v31 = vadd.f32 %v923_v10, %v627_v54  ;;  %v927_v58 = vadd.f32 %v926_v62, %v5309_v6  ;;  %1307 = vmatprep.mubr.bf16.mxu1 %v1054_v9  ;;  %v4190_v54 = vld [vmem:[%s7164_s5 + $0x58] sm:$0xff]   ;;  %v4192_v10 = vld [vmem:[%s7164_s5 + $0x60] sm:$0xff]  }
 0x2a8   :  { %v5381_v55 = vadd.f32 %v925_v59, %v628_v47  ;;  %1308 = vmatmul.mubr.bf16.vlgmr.msra.gmra.mrb[32].mxu1 %v1053_v22  ;;  %v1025_v47 = vmax.f32 %v5369_v29, 0.0 }
 0x2a9   :  { %v5388_v11 = vadd.f32 %v927_v58, %v629_v36  ;;  %1850 = vmatpush1.bf16.msra.mxu1 %v4178_v0  ;;  %v1026_v49 = vmax.f32 %v5373_v31, 0.0  ;;  %3888 = vmatpush3.bf16.msra.mxu0 %v4189_v42  ;;  %v4191_v58 = vld [vmem:[%s7164_s5 + $0x18] sm:$0xff]   ;;  %v4208_v31 = vld [vmem:[%s7161_s3 + $0x24] ss:$8 sps:$4 sm:$0xff]  }
 0x2aa   :  { %v1027_v1 = vmax.f32 %v5381_v55, 0.0  ;;  %1851 = vmatprep.subr.bf16.mxu1 %v4183_v45  ;;  %3889 = vmatprep.subr.bf16.mxu0 %v4190_v54 }
 0x2ab   :  { %v1028_v59 = vmax.f32 %v5388_v11, 0.0  ;;  %v930_v62 = vpop.f32.mrb[40].mxu0 }
 0x2ac   :  { %v931_v39 = vadd.f32 %v930_v62, %v5306_v17  ;;  %v932_v36 = vpop.f32.mrb[41].mxu0  ;;  %v1055_v22 = vpack.c.bf16 %v1027_v1, %v1025_v47  ;;  %v4193_v62 = vld [vmem:[%s7164_s5 + $0x20] sm:$0xff]  }
 0x2ad   :  { %v933_v0 = vadd.f32 %v932_v36, %v5309_v6  ;;  %v934_v46 = vpop.f32.mrb[42].mxu0  ;;  %v1056_v45 = vpack.c.bf16 %v1028_v59, %v1026_v49  ;;  %1852 = vmatpush1.bf16.msra.mxu1 %v4181_v25  ;;  %3890 = vmatpush3.bf16.msra.mxu0 %v4191_v58 }
 0x2ae   :  { %v935_v9 = vadd.f32 %v934_v46, %v5306_v17  ;;  %v936_v16 = vpop.f32.mrb[43].mxu0  ;;  %v5421_v25 = vadd.f32 %v931_v39, %v630_v63  ;;  %3891 = vmatprep.subr.bf16.mxu0 %v4192_v10 }
 0x2af   :  { %v5416_v48 = vadd.f32 %v933_v0, %v631_v5  ;;  %v937_v42 = vadd.f32 %v936_v16, %v5309_v6  ;;  %1317 = vmatprep.mubr.bf16.mxu1 %v1056_v45  ;;  %v4196_v45 = vld [vmem:[%s7164_s5 + $0x70] sm:$0xff]  }
 0x2b0   :  { %v5425_v54 = vadd.f32 %v935_v9, %v632_v61  ;;  %1318 = vmatmul.mubr.bf16.gmra.mrb[36].mxu1 %v1055_v22  ;;  %v4195_v61 = vld [vmem:[%s7164_s5 + $0x28] sm:$0xff]   ;;  %v1029_v53 = vmax.f32 %v5421_v25, 0.0  ;;  %v7295_v22 = vmax.f32 %v5126_v44, 0.0  ;;  %v7298_v44 = vmax.f32 %v5139_v4, 0.0 }
 0x2b1   :  { %v5432_v51 = vadd.f32 %v937_v42, %v633_v50  ;;  %v1030_v5 = vmax.f32 %v5416_v48, 0.0  ;;  %3892 = vmatpush3.bf16.msra.mxu0 %v4193_v62  ;;  %v4214_v48 = vld [vmem:[%s7161_s3 + $0x44] ss:$8 sps:$4 sm:$0xff]  }
 0x2b2   :  { %v7206_v35 = vmax.f32 %v5425_v54, 0.0  ;;  %3893 = vmatprep.subr.bf16.mxu0 %v4194_v38  ;;  %v7296_v38 = vmax.f32 %v5131_v52, 0.0 }
 0x2b3   :  { %v7203_v63 = vmax.f32 %v5432_v51, 0.0  ;;  %v940_v39 = vpop.f32.mrb[44].mxu0  ;;  %v7316_v25 = vmax.f32 %v5432_v51, 0.0 }
 0x2b4   :  { %v941_v50 = vadd.f32 %v940_v39, %v5306_v17  ;;  %v942_v36 = vpop.f32.mrb[45].mxu0  ;;  %v1057_v16 = vpack.c.bf16 %v7206_v35, %v1029_v53 }
 0x2b5   :  { %v943_v58 = vadd.f32 %v942_v36, %v5309_v6  ;;  %v944_v0 = vpop.f32.mrb[46].mxu0  ;;  %v1058_v46 = vpack.c.bf16 %v7203_v63, %v1030_v5  ;;  %v7297_v36 = vmax.f32 %v5135_v56, 0.0  ;;  %3894 = vmatpush3.bf16.msra.mxu0 %v4195_v61  ;;  %v4197_v63 = vld [vmem:[%s7164_s5 + $0x30] sm:$0xff]  }
 0x2b6   :  { %v945_v10 = vadd.f32 %v944_v0, %v5306_v17  ;;  %v946_v9 = vpop.f32.mrb[47].mxu0  ;;  %v5465_v39 = vadd.f32 %v941_v50, %v7296_v38  ;;  %3895 = vmatprep.subr.bf16.mxu0 %v4196_v45 }
 0x2b7   :  { %v5460_v42 = vadd.f32 %v943_v58, %v7295_v22  ;;  %v947_v62 = vadd.f32 %v946_v9, %v5309_v6  ;;  %1327 = vmatprep.mubr.bf16.mxu1 %v1058_v46 }
 0x2b8   :  { %v5469_v0 = vadd.f32 %v945_v10, %v7297_v36  ;;  %1328 = vmatmul.mubr.bf16.gmra.mrb[40].mxu1 %v1057_v16  ;;  %v1033_v10 = vmax.f32 %v5465_v39, 0.0  ;;  %v7299_v36 = vmax.f32 %v5158_v41, 0.0 }
 0x2b9   :  { %v5476_v58 = vadd.f32 %v947_v62, %v7298_v44  ;;  %v7205_v46 = vmax.f32 %v5460_v42, 0.0  ;;  %3896 = vmatpush3.bf16.msra.mxu0 %v4197_v63 }
 0x2ba   :  { %v7209_v52 = vmax.f32 %v5469_v0, 0.0 }
 0x2bb   :  { %v7204_v50 = vmax.f32 %v5476_v58, 0.0  ;;  %v950_v56 = vpop.f32.mrb[48].mxu0  ;;  %v7319_v39 = vmax.f32 %v5476_v58, 0.0 }
 0x2bc   :  { %v951_v61 = vadd.f32 %v950_v56, %v5306_v17  ;;  %v952_v9 = vpop.f32.mrb[49].mxu0  ;;  %v1059_v38 = vpack.c.bf16 %v7209_v52, %v1033_v10  ;;  %v7300_v56 = vmax.f32 %v5163_v3, 0.0 }
 0x2bd   :  { %v953_v16 = vadd.f32 %v952_v9, %v5309_v6  ;;  %v954_v22 = vpop.f32.mrb[50].mxu0  ;;  %v1060_v4 = vpack.c.bf16 %v7204_v50, %v7205_v46  ;;  %v7301_v50 = vmax.f32 %v5167_v18, 0.0  ;;  %v7302_v46 = vmax.f32 %v5171_v19, 0.0 }
 0x2be   :  { %v955_v45 = vadd.f32 %v954_v22, %v5306_v17  ;;  %v956_v62 = vpop.f32.mrb[51].mxu0  ;;  %v5500_v9 = vadd.f32 %v951_v61, %v7300_v56 }
 0x2bf   :  { %v5495_v44 = vadd.f32 %v953_v16, %v7299_v36  ;;  %v957_v63 = vadd.f32 %v956_v62, %v5309_v6  ;;  %1337 = vmatprep.mubr.bf16.mxu1 %v1060_v4 }
 0x2c0   :  { %v5504_v22 = vadd.f32 %v955_v45, %v7301_v50  ;;  %1338 = vmatmul.mubr.bf16.gmra.mrb[44].mxu1 %v1059_v38  ;;  %v1037_v3 = vmax.f32 %v5500_v9, 0.0 }
 0x2c1   :  { %v5508_v35 = vadd.f32 %v957_v63, %v7302_v46  ;;  %v7208_v16 = vmax.f32 %v5495_v44, 0.0  ;;  %v7303_v63 = vmax.f32 %v5190_v7, 0.0 }
 0x2c2   :  { %v1039_v41 = vmax.f32 %v5504_v22, 0.0 }
 0x2c3   :  { %v7207_v62 = vmax.f32 %v5508_v35, 0.0  ;;  %v960_v4 = vpop.f32.mrb[52].mxu0  ;;  %v7321_v9 = vmax.f32 %v5508_v35, 0.0 }
 0x2c4   :  { %v961_v61 = vadd.f32 %v960_v4, %v5306_v17  ;;  %v962_v36 = vpop.f32.mrb[53].mxu0  ;;  %v1061_v38 = vpack.c.bf16 %v1039_v41, %v1037_v3 }
 0x2c5   :  { %v963_v18 = vadd.f32 %v962_v36, %v5309_v6  ;;  %v964_v50 = vpop.f32.mrb[54].mxu0  ;;  %v1062_v19 = vpack.c.bf16 %v7207_v62, %v7208_v16  ;;  %v7304_v62 = vmax.f32 %v5199_v20, 0.0  ;;  %v7305_v16 = vmax.f32 %v5203_v14, 0.0 }
 0x2c6   :  { %v965_v46 = vadd.f32 %v964_v50, %v5306_v17  ;;  %v966_v45 = vpop.f32.mrb[55].mxu0  ;;  %v5532_v36 = vadd.f32 %v961_v61, %v642_v2 }
 0x2c7   :  { %v5527_v56 = vadd.f32 %v963_v18, %v7303_v63  ;;  %v967_v4 = vadd.f32 %v966_v45, %v5309_v6  ;;  %1347 = vmatprep.mubr.bf16.mxu1 %v1062_v19  ;;  %v7306_v63 = vmax.f32 %v5222_v21, 0.0 }
 0x2c8   :  { %v5536_v50 = vadd.f32 %v965_v46, %v7304_v62  ;;  %1348 = vmatmul.mubr.bf16.gmra.mrb[48].mxu1 %v1061_v38  ;;  %v1041_v12 = vmax.f32 %v5532_v36, 0.0 }
 0x2c9   :  { %v5540_v52 = vadd.f32 %v967_v4, %v7305_v16  ;;  %v7211_v18 = vmax.f32 %v5527_v56, 0.0 }
 0x2ca   :  { %v7212_v7 = vmax.f32 %v5536_v50, 0.0 }
 0x2cb   :  { %v7210_v45 = vmax.f32 %v5540_v52, 0.0  ;;  %v970_v19 = vpop.f32.mrb[56].mxu0  ;;  %v7324_v36 = vmax.f32 %v5540_v52, 0.0 }
 0x2cc   :  { %v971_v2 = vadd.f32 %v970_v19, %v5306_v17  ;;  %v972_v61 = vpop.f32.mrb[57].mxu0  ;;  %v1063_v38 = vpack.c.bf16 %v7212_v7, %v1041_v12 }
 0x2cd   :  { %v973_v20 = vadd.f32 %v972_v61, %v5309_v6  ;;  %v974_v62 = vpop.f32.mrb[58].mxu0  ;;  %v1064_v14 = vpack.c.bf16 %v7210_v45, %v7211_v18  ;;  %v7307_v45 = vmax.f32 %v5235_v32, 0.0 }
 0x2ce   :  { %v975_v16 = vadd.f32 %v974_v62, %v5306_v17  ;;  %v976_v46 = vpop.f32.mrb[59].mxu0  ;;  %v5564_v61 = vadd.f32 %v971_v2, %v646_v57 }
 0x2cf   :  { %v5559_v4 = vadd.f32 %v973_v20, %v7306_v63  ;;  %v977_v19 = vadd.f32 %v976_v46, %v5309_v6  ;;  %1357 = vmatprep.mubr.bf16.mxu1 %v1064_v14  ;;  %v7308_v63 = vmax.f32 %v5254_v40, 0.0 }
 0x2d0   :  { %v5568_v62 = vadd.f32 %v975_v16, %v648_v37  ;;  %1358 = vmatmul.mubr.bf16.gmra.mrb[52].mxu1 %v1063_v38  ;;  %v7220_v27 = vmax.f32 %v5564_v61, 0.0 }
 0x2d1   :  { %v5572_v18 = vadd.f32 %v977_v19, %v7307_v45  ;;  %v7214_v20 = vmax.f32 %v5559_v4, 0.0 }
 0x2d2   :  { %v7219_v21 = vmax.f32 %v5568_v62, 0.0 }
 0x2d3   :  { %v7213_v46 = vmax.f32 %v5572_v18, 0.0  ;;  %v980_v14 = vpop.f32.mrb[60].mxu0 }
 0x2d4   :  { %v981_v57 = vadd.f32 %v980_v14, %v5306_v17  ;;  %v982_v2 = vpop.f32.mrb[61].mxu0  ;;  %v1065_v38 = vpack.c.bf16 %v7219_v21, %v7220_v27 }
 0x2d5   :  { %v983_v15 = vadd.f32 %v982_v2, %v5309_v6  ;;  %v984_v37 = vpop.f32.mrb[62].mxu0  ;;  %v1066_v32 = vpack.c.bf16 %v7213_v46, %v7214_v20  ;;  %v7309_v2 = vmax.f32 %v5259_v60, 0.0  ;;  %v7310_v46 = vmax.f32 %v5263_v23, 0.0 }
 0x2d6   :  { %v985_v45 = vadd.f32 %v984_v37, %v5306_v17  ;;  %v986_v16 = vpop.f32.mrb[63].mxu0  ;;  %v7311_v37 = vmax.f32 %v5267_v8, 0.0  ;;  %v7312_v23 = vmov 0  }
 0x2d7   :  { %v5591_v19 = vadd.f32 %v983_v15, %v7308_v63  ;;  %v987_v14 = vadd.f32 %v986_v16, %v5309_v6  ;;  %1367 = vmatprep.mubr.bf16.mxu1 %v1066_v32  ;;  %v5596_v7 = vadd.f32 %v981_v57, %v7309_v2  ;;  %v1766_v57 = vld [vmem:[%s7160_s0 + $0x88] sm:$0xff]  ;;  %v1767_v16 = vld [vmem:[%s7160_s0 + $0x90] sm:$0xff] }
 0x2d8   :  { %v5600_v17 = vadd.f32 %v985_v45, %v7310_v46  ;;  %1368 = vmatmul.mubr.bf16.gmra.mrb[56].mxu1 %v1065_v38  ;;  %v1765_v46 = vld [vmem:[%s7160_s0 + $0x80] sm:$0xff]  ;;  %v1768_v38 = vld [vmem:[%s7160_s0 + $0x98] sm:$0xff]  ;;  %v1770_v2 = vld [vmem:[%s7160_s0 + $0xa8] sm:$0xff] }
 0x2d9   :  { %v5604_v20 = vadd.f32 %v987_v14, %v7311_v37  ;;  %v7217_v15 = vmax.f32 %v5591_v19, 0.0  ;;  %v7218_v32 = vmax.f32 %v5596_v7, 0.0  ;;  %v1781_v45 = vpack.c.bf16 %v1766_v57, %v1765_v46  ;;  %v1769_v14 = vld [vmem:[%s7160_s0 + $0xa0] sm:$0xff] }
 0x2da   :  { %v7216_v40 = vmax.f32 %v5600_v17, 0.0  ;;  %v1782_v63 = vpack.c.bf16 %v1768_v38, %v1767_v16  ;;  %v1783_v37 = vpack.c.bf16 %v1770_v2, %v1769_v14  ;;  %v1773_v57 = vld [vmem:[%s7160_s0 + $0xc0] sm:$0xff]  ;;  %v4198_v16 = vld [vmem:[%s7164_s5 + $0x78] sm:$0xff]   ;;  %v1775_v2 = vld [vmem:[%s7160_s0 + $0xd0] sm:$0xff] }
 0x2db   :  { %v7215_v6 = vmax.f32 %v5604_v20, 0.0  ;;  %v4199_v38 = vld [vmem:[%s7164_s5 + $0x38] sm:$0xff]   ;;  %3897 = vmatprep.subr.bf16.mxu0 %v4198_v16  ;;  %v4202_v14 = vld [vmem:[%s7161_s3 + $0x4] ss:$8 sps:$4 sm:$0xff]  }
 0x2dc   :  { %v1067_v8 = vpack.c.bf16 %v7216_v40, %v7218_v32  ;;  %3898 = vmatpush3.bf16.msra.mxu0 %v4199_v38  ;;  %v1780_v16 = vld [vmem:[%s7160_s0 + $0xf8] sm:$0xff] }
 0x2dd   :  { %v1068_v60 = vpack.c.bf16 %v7215_v6, %v7217_v15  ;;  %2214 = vmatprep.subr.bf16.mxu0 %v4202_v14 }
 0x2df   :  { %1377 = vmatprep.mubr.bf16.mxu1 %v1068_v60  ;;  %v1771_v60 = vld [vmem:[%s7160_s0 + $0xb0] sm:$0xff] }
 0x2e0   :  { %1378 = vmatmul.mubr.bf16.gmra.mrb[60].mxu1 %v1067_v8  ;;  %v1772_v8 = vld [vmem:[%s7160_s0 + $0xb8] sm:$0xff] }
 0x2e1   :  { %1881 = vmatprep.mubr.bf16.mxu1 %v7312_v23  ;;  %v1784_v46 = vpack.c.bf16 %v1772_v8, %v1771_v60  ;;  %v1777_v8 = vld [vmem:[%s7160_s0 + $0xe0] sm:$0xff] }
 0x2e8   :  { %3696 = vmatmul.mubr.msk.bf16.vlgmr.msra.gmra.mrb[64].mxu1 %vm87_vm0, %v1781_v45  ;;  %v1774_v45 = vld [vmem:[%s7160_s0 + $0xc8] sm:$0xff] }
 0x2e9   :  { %1891 = vmatprep.mubr.bf16.mxu1 %v7312_v23 }
 0x2f0   :  { %3697 = vmatmul.mubr.msk.bf16.gmra.mrb[68].mxu1 %vm87_vm0, %v1782_v63  ;;  %v1785_v63 = vpack.c.bf16 %v1774_v45, %v1773_v57  ;;  %v1779_v45 = vld [vmem:[%s7160_s0 + $0xf0] sm:$0xff] }
 0x2f1   :  { %1901 = vmatprep.mubr.bf16.mxu1 %v7312_v23  ;;  %v1788_v38 = vpack.c.bf16 %v1780_v16, %v1779_v45 }
 0x2f8   :  { %3698 = vmatmul.mubr.msk.bf16.gmra.mrb[72].mxu1 %vm87_vm0, %v1783_v37  ;;  %v1776_v37 = vld [vmem:[%s7160_s0 + $0xd8] sm:$0xff] }
 0x2f9   :  { %1911 = vmatprep.mubr.bf16.mxu1 %v7312_v23  ;;  %v1786_v60 = vpack.c.bf16 %v1776_v37, %v1775_v2 }
 0x300   :  { %3699 = vmatmul.mubr.msk.bf16.gmra.mrb[76].mxu1 %vm87_vm0, %v1784_v46  ;;  %v1778_v46 = vld [vmem:[%s7160_s0 + $0xe8] sm:$0xff] }
 0x301   :  { %1921 = vmatprep.mubr.bf16.mxu1 %v7312_v23  ;;  %v1787_v57 = vpack.c.bf16 %v1778_v46, %v1777_v8 }
 0x308   :  { %3700 = vmatmul.mubr.msk.bf16.gmra.mrb[80].mxu1 %vm87_vm0, %v1785_v63  ;;  %v3642_v63 = vld [vmem:[%s7163_s4 + $0x4] sm:$0x3] }
 0x309   :  { %1931 = vmatprep.mubr.bf16.mxu1 %v7312_v23  ;;  %v5695_v14 = vrot.slane %v3642_v63, %v4720_v28 }
 0x310   :  { %3701 = vmatmul.mubr.msk.bf16.gmra.mrb[84].mxu1 %vm87_vm0, %v1786_v60 }
 0x311   :  { %1941 = vmatprep.mubr.bf16.mxu1 %v7312_v23 }
 0x318   :  { %3702 = vmatmul.mubr.msk.bf16.gmra.mrb[88].mxu1 %vm87_vm0, %v1787_v57 }
 0x319   :  { %1951 = vmatprep.mubr.bf16.mxu1 %v7312_v23  ;;  %v5698_v23 = vrot.slane %v3642_v63, %v4715_v26 }
 0x320   :  { %3703 = vmatmul.mubr.msk.bf16.gmra.mrb[92].mxu1 %vm87_vm0, %v1788_v38  ;;  %v7313_v38 = vmax.f32 %v5320_v43, 0.0 }
 0x37b   :  { %v1309_v2 = vpop.f32.mrb[32].mxu1 }
 0x37c   :  { %v1310_v37 = vadd.f32 %v1309_v2, %v5695_v14  ;;  %v1311_v60 = vpop.f32.mrb[33].mxu1  ;;  %v7314_v2 = vmax.f32 %v5331_v24, 0.0 }
 0x37d   :  { %v1312_v8 = vadd.f32 %v1311_v60, %v5698_v23  ;;  %v1313_v46 = vpop.f32.mrb[34].mxu1 }
 0x37e   :  { %v1388_v57 = vadd.f32 %v1310_v37, %v1021_v30  ;;  %v1314_v45 = vadd.f32 %v1313_v46, %v5695_v14  ;;  %v1315_v16 = vpop.f32.mrb[35].mxu1 }
 0x37f   :  { %v1389_v6 = vadd.f32 %v1312_v8, %v7313_v38  ;;  %v1316_v40 = vadd.f32 %v1315_v16, %v5698_v23 }
 0x380   :  { %v1390_v63 = vadd.f32 %v1314_v45, %v1023_v33  ;;  %v1420_v32 = vmax.f32 %v1388_v57, 0.0 }
 0x381   :  { %v1391_v15 = vadd.f32 %v1316_v40, %v7314_v2  ;;  %v1421_v21 = vmax.f32 %v1389_v6, 0.0 }
 0x382   :  { %v1422_v60 = vmax.f32 %v1390_v63, 0.0 }
 0x383   :  { %v1423_v27 = vmax.f32 %v1391_v15, 0.0  ;;  %v1319_v34 = vpop.f32.mrb[36].mxu1  ;;  %v4205_v15 = vld [vmem:[%s7161_s3 + $0x14] ss:$8 sps:$4 sm:$0xff]  }
 0x384   :  { %v1452_v30 = vpack.c.bf16 %v1422_v60, %v1420_v32  ;;  %v1320_v37 = vadd.f32 %v1319_v34, %v5695_v14  ;;  %v1321_v46 = vpop.f32.mrb[37].mxu1  ;;  %v4206_v60 = vld [vmem:[%s7161_s3 + $0x20] ss:$8 sps:$4 sm:$0xff]  }
 0x385   :  { %v1322_v43 = vadd.f32 %v1321_v46, %v5698_v23  ;;  %v1323_v8 = vpop.f32.mrb[38].mxu1  ;;  %v1453_v38 = vpack.c.bf16 %v1423_v27, %v1421_v21  ;;  %v4211_v46 = vld [vmem:[%s7161_s3 + $0x34] ss:$8 sps:$4 sm:$0xff]  }
 0x386   :  { %v1392_v24 = vadd.f32 %v1320_v37, %v1025_v47  ;;  %v1324_v33 = vadd.f32 %v1323_v8, %v5695_v14  ;;  %v1325_v40 = vpop.f32.mrb[39].mxu1  ;;  %v4203_v47 = vld [vmem:[%s7161_s3 + $0x10] ss:$8 sps:$4 sm:$0xff]  }
 0x387   :  { %v1393_v6 = vadd.f32 %v1322_v43, %v1026_v49  ;;  %v1326_v32 = vadd.f32 %v1325_v40, %v5698_v23  ;;  %1635 = vmatprep.mubr.bf16.mxu0 %v1453_v38  ;;  %v7315_v38 = vmax.f32 %v5425_v54, 0.0 }
 0x388   :  { %v1394_v21 = vadd.f32 %v1324_v33, %v1027_v1  ;;  %1636 = vmatmul.mubr.bf16.vlgmr.msra.gmra.mrb[64].mxu0 %v1452_v30  ;;  %v1424_v27 = vmax.f32 %v1392_v24, 0.0  ;;  %v4209_v24 = vld [vmem:[%s7161_s3 + $0x30] ss:$8 sps:$4 sm:$0xff]  }
 0x389   :  { %v1395_v29 = vadd.f32 %v1326_v32, %v1028_v59  ;;  %2215 = vmatpush1.bf16.msra.mxu0 %v4200_v13  ;;  %v1425_v49 = vmax.f32 %v1393_v6, 0.0 }
 0x38a   :  { %v1426_v57 = vmax.f32 %v1394_v21, 0.0  ;;  %2216 = vmatprep.subr.bf16.mxu0 %v4205_v15 }
 0x38b   :  { %v1427_v45 = vmax.f32 %v1395_v29, 0.0  ;;  %v1329_v55 = vpop.f32.mrb[40].mxu1 }
 0x38c   :  { %v1330_v1 = vadd.f32 %v1329_v55, %v5695_v14  ;;  %v1331_v16 = vpop.f32.mrb[41].mxu1  ;;  %v1454_v11 = vpack.c.bf16 %v1426_v57, %v1424_v27  ;;  %v4212_v27 = vld [vmem:[%s7161_s3 + $0x40] ss:$8 sps:$4 sm:$0xff]   ;;  %v7317_v55 = vmax.f32 %v5460_v42, 0.0  ;;  %v4220_v42 = vld [vmem:[%s7161_s3 + $0x64] ss:$8 sps:$4 sm:$0xff]  }
 0x38d   :  { %v1332_v59 = vadd.f32 %v1331_v16, %v5698_v23  ;;  %2217 = vmatpush1.bf16.msra.mxu0 %v4203_v47  ;;  %v1333_v63 = vpop.f32.mrb[42].mxu1  ;;  %v1455_v2 = vpack.c.bf16 %v1427_v45, %v1425_v49  ;;  %v4217_v45 = vld [vmem:[%s7161_s3 + $0x54] ss:$8 sps:$4 sm:$0xff]  }
 0x38e   :  { %v1396_v34 = vadd.f32 %v1330_v1, %v1029_v53  ;;  %v1334_v30 = vadd.f32 %v1333_v63, %v5695_v14  ;;  %v1335_v37 = vpop.f32.mrb[43].mxu1  ;;  %2218 = vmatprep.subr.bf16.mxu0 %v4208_v31  ;;  %v4215_v63 = vld [vmem:[%s7161_s3 + $0x50] ss:$8 sps:$4 sm:$0xff]  }
 0x38f   :  { %v1397_v43 = vadd.f32 %v1332_v59, %v1030_v5  ;;  %v1336_v8 = vadd.f32 %v1335_v37, %v5698_v23  ;;  %1643 = vmatprep.mubr.bf16.mxu0 %v1455_v2 }
 0x390   :  { %v1398_v13 = vadd.f32 %v1334_v30, %v7315_v38  ;;  %1644 = vmatmul.mubr.bf16.gmra.mrb[68].mxu0 %v1454_v11  ;;  %v1428_v33 = vmax.f32 %v1396_v34, 0.0  ;;  %v7318_v11 = vmax.f32 %v5469_v0, 0.0 }
 0x391   :  { %v1399_v53 = vadd.f32 %v1336_v8, %v7316_v25  ;;  %2219 = vmatpush1.bf16.msra.mxu0 %v4206_v60  ;;  %v1429_v5 = vmax.f32 %v1397_v43, 0.0 }
 0x392   :  { %v1430_v40 = vmax.f32 %v1398_v13, 0.0  ;;  %2220 = vmatprep.subr.bf16.mxu0 %v4211_v46  ;;  %v4218_v13 = vld [vmem:[%s7161_s3 + $0x60] ss:$8 sps:$4 sm:$0xff]  }
 0x393   :  { %v1431_v15 = vmax.f32 %v1399_v53, 0.0  ;;  %v1339_v54 = vpop.f32.mrb[44].mxu1 }
 0x394   :  { %v1340_v6 = vadd.f32 %v1339_v54, %v5695_v14  ;;  %v1341_v32 = vpop.f32.mrb[45].mxu1  ;;  %v1456_v51 = vpack.c.bf16 %v1430_v40, %v1428_v33  ;;  %v4223_v33 = vld [vmem:[%s7161_s3 + $0x74] ss:$8 sps:$4 sm:$0xff]   ;;  %v7320_v40 = vmax.f32 %v5495_v44, 0.0  ;;  %v4221_v54 = vld [vmem:[%s7161_s3 + $0x70] ss:$8 sps:$4 sm:$0xff]  }
 0x395   :  { %v1342_v21 = vadd.f32 %v1341_v32, %v5698_v23  ;;  %2221 = vmatpush1.bf16.msra.mxu0 %v4209_v24  ;;  %v1343_v29 = vpop.f32.mrb[46].mxu1  ;;  %v1457_v47 = vpack.c.bf16 %v1431_v15, %v1429_v5  ;;  %v4226_v44 = vld [vmem:[%s7161_s3 + $0x84] ss:$8 sps:$4 sm:$0xff]  }
 0x396   :  { %v1400_v57 = vadd.f32 %v1340_v6, %v1033_v10  ;;  %v1344_v31 = vadd.f32 %v1343_v29, %v5695_v14  ;;  %v1345_v49 = vpop.f32.mrb[47].mxu1  ;;  %2222 = vmatprep.subr.bf16.mxu0 %v4214_v48 }
 0x397   :  { %v1401_v1 = vadd.f32 %v1342_v21, %v7317_v55  ;;  %v1346_v16 = vadd.f32 %v1345_v49, %v5698_v23  ;;  %1651 = vmatprep.mubr.bf16.mxu0 %v1457_v47 }
 0x398   :  { %v1402_v59 = vadd.f32 %v1344_v31, %v7318_v11  ;;  %1652 = vmatmul.mubr.bf16.gmra.mrb[72].mxu0 %v1456_v51  ;;  %v1432_v2 = vmax.f32 %v1400_v57, 0.0  ;;  %v4224_v31 = vld [vmem:[%s7161_s3 + $0x80] ss:$8 sps:$4 sm:$0xff]  }
 0x399   :  { %v1403_v10 = vadd.f32 %v1346_v16, %v7319_v39  ;;  %2223 = vmatpush1.bf16.msra.mxu0 %v4212_v27  ;;  %v1433_v34 = vmax.f32 %v1401_v1, 0.0  ;;  %v4229_v1 = vld [vmem:[%s7161_s3 + $0x94] ss:$8 sps:$4 sm:$0xff]   ;;  %v7322_v16 = vmax.f32 %v5527_v56, 0.0  ;;  %v7323_v39 = vmax.f32 %v5536_v50, 0.0 }
 0x39a   :  { %v1434_v60 = vmax.f32 %v1402_v59, 0.0  ;;  %2224 = vmatprep.subr.bf16.mxu0 %v4217_v45  ;;  %v4232_v56 = vld [vmem:[%s7161_s3 + $0xa4] ss:$8 sps:$4 sm:$0xff]  }
 0x39b   :  { %v1435_v30 = vmax.f32 %v1403_v10, 0.0  ;;  %v1349_v0 = vpop.f32.mrb[48].mxu1 }
 0x39c   :  { %v1350_v37 = vadd.f32 %v1349_v0, %v5695_v14  ;;  %v1351_v46 = vpop.f32.mrb[49].mxu1  ;;  %v1458_v58 = vpack.c.bf16 %v1434_v60, %v1432_v2 }
 0x39d   :  { %v1352_v43 = vadd.f32 %v1351_v46, %v5698_v23  ;;  %2225 = vmatpush1.bf16.msra.mxu0 %v4215_v63  ;;  %v1353_v8 = vpop.f32.mrb[50].mxu1  ;;  %v1459_v38 = vpack.c.bf16 %v1435_v30, %v1433_v34  ;;  %v4227_v63 = vld [vmem:[%s7161_s3 + $0x90] ss:$8 sps:$4 sm:$0xff]  }
 0x39e   :  { %v1404_v25 = vadd.f32 %v1350_v37, %v1037_v3  ;;  %v1354_v53 = vadd.f32 %v1353_v8, %v5695_v14  ;;  %v1355_v24 = vpop.f32.mrb[51].mxu1  ;;  %2226 = vmatprep.subr.bf16.mxu0 %v4220_v42  ;;  %v7325_v8 = vmax.f32 %v5564_v61, 0.0  ;;  %v7328_v61 = vmax.f32 %v5572_v18, 0.0 }
 0x39f   :  { %v1405_v48 = vadd.f32 %v1352_v43, %v7320_v40  ;;  %v1356_v5 = vadd.f32 %v1355_v24, %v5698_v23  ;;  %1659 = vmatprep.mubr.bf16.mxu0 %v1459_v38  ;;  %v4230_v43 = vld [vmem:[%s7161_s3 + $0xa0] ss:$8 sps:$4 sm:$0xff]   ;;  %v7326_v24 = vmax.f32 %v5559_v4, 0.0  ;;  %v4238_v4 = vld [vmem:[%s7161_s3 + $0xc4] ss:$8 sps:$4 sm:$0xff]  }
 0x3a0   :  { %v1406_v15 = vadd.f32 %v1354_v53, %v1039_v41  ;;  %1660 = vmatmul.mubr.bf16.gmra.mrb[76].mxu0 %v1458_v58  ;;  %v1436_v6 = vmax.f32 %v1404_v25, 0.0  ;;  %v4235_v53 = vld [vmem:[%s7161_s3 + $0xb4] ss:$8 sps:$4 sm:$0xff]  }
 0x3a1   :  { %v1407_v3 = vadd.f32 %v1356_v5, %v7321_v9  ;;  %2227 = vmatpush1.bf16.msra.mxu0 %v4218_v13  ;;  %v1437_v51 = vmax.f32 %v1405_v48, 0.0  ;;  %v7327_v48 = vmax.f32 %v5568_v62, 0.0  ;;  %v4233_v9 = vld [vmem:[%s7161_s3 + $0xb0] ss:$8 sps:$4 sm:$0xff]  }
 0x3a2   :  { %v1438_v32 = vmax.f32 %v1406_v15, 0.0  ;;  %2228 = vmatprep.subr.bf16.mxu0 %v4223_v33 }
 0x3a3   :  { %v1439_v21 = vmax.f32 %v1407_v3, 0.0  ;;  %v1359_v22 = vpop.f32.mrb[52].mxu1 }
 0x3a4   :  { %v1360_v41 = vadd.f32 %v1359_v22, %v5695_v14  ;;  %v1361_v29 = vpop.f32.mrb[53].mxu1  ;;  %v1460_v35 = vpack.c.bf16 %v1438_v32, %v1436_v6 }
 0x3a5   :  { %v1362_v47 = vadd.f32 %v1361_v29, %v5698_v23  ;;  %2229 = vmatpush1.bf16.msra.mxu0 %v4221_v54  ;;  %v1363_v27 = vpop.f32.mrb[54].mxu1  ;;  %v1461_v57 = vpack.c.bf16 %v1439_v21, %v1437_v51  ;;  %v4236_v29 = vld [vmem:[%s7161_s3 + $0xc0] ss:$8 sps:$4 sm:$0xff]  }
 0x3a6   :  { %v1408_v49 = vadd.f32 %v1360_v41, %v1041_v12  ;;  %v1364_v45 = vadd.f32 %v1363_v27, %v5695_v14  ;;  %v1365_v55 = vpop.f32.mrb[55].mxu1  ;;  %2230 = vmatprep.subr.bf16.mxu0 %v4226_v44 }
 0x3a7   :  { %v1409_v11 = vadd.f32 %v1362_v47, %v7322_v16  ;;  %v1366_v59 = vadd.f32 %v1365_v55, %v5698_v23  ;;  %1667 = vmatprep.mubr.bf16.mxu0 %v1461_v57 }
 0x3a8   :  { %v1410_v10 = vadd.f32 %v1364_v45, %v7323_v39  ;;  %1668 = vmatmul.mubr.bf16.gmra.mrb[80].mxu0 %v1460_v35  ;;  %v1440_v2 = vmax.f32 %v1408_v49, 0.0  ;;  %v7329_v35 = vmax.f32 %v5596_v7, 0.0  ;;  %v4241_v49 = vld [vmem:[%s7161_s3 + $0xd4] ss:$8 sps:$4 sm:$0xff]   ;;  %v7330_v45 = vmax.f32 %v5591_v19, 0.0 }
 0x3a9   :  { %v1411_v12 = vadd.f32 %v1366_v59, %v7324_v36  ;;  %2231 = vmatpush1.bf16.msra.mxu0 %v4224_v31  ;;  %v1441_v42 = vmax.f32 %v1409_v11, 0.0  ;;  %v1793_v31 = vld [vmem:[%s7162_s2] sm:$0x3]  ;;  %v7331_v7 = vmax.f32 %v5600_v17, 0.0  ;;  %v4239_v59 = vld [vmem:[%s7161_s3 + $0xd0] ss:$8 sps:$4 sm:$0xff]  }
 0x3aa   :  { %v1442_v60 = vmax.f32 %v1410_v10, 0.0  ;;  %2232 = vmatprep.subr.bf16.mxu0 %v4229_v1  ;;  %v5881_v39 = vrot.slane %v1793_v31, %v4715_v26  ;;  %v4244_v17 = vld [vmem:[%s7161_s3 + $0xe4] ss:$8 sps:$4 sm:$0xff]  }
 0x3ab   :  { %v1443_v34 = vmax.f32 %v1411_v12, 0.0  ;;  %v1369_v50 = vpop.f32.mrb[56].mxu1 }
 0x3ac   :  { %v1370_v30 = vadd.f32 %v1369_v50, %v5695_v14  ;;  %v1371_v0 = vpop.f32.mrb[57].mxu1  ;;  %v1462_v52 = vpack.c.bf16 %v1442_v60, %v1440_v2 }
 0x3ad   :  { %v1372_v37 = vadd.f32 %v1371_v0, %v5698_v23  ;;  %2233 = vmatpush1.bf16.msra.mxu0 %v4227_v63  ;;  %v1373_v46 = vpop.f32.mrb[58].mxu1  ;;  %v1463_v58 = vpack.c.bf16 %v1443_v34, %v1441_v42  ;;  %v4242_v34 = vld [vmem:[%s7161_s3 + $0xe0] ss:$8 sps:$4 sm:$0xff]  }
 0x3ae   :  { %v1412_v38 = vadd.f32 %v1370_v30, %v7325_v8  ;;  %v1374_v13 = vadd.f32 %v1373_v46, %v5695_v14  ;;  %v1375_v25 = vpop.f32.mrb[59].mxu1  ;;  %2234 = vmatprep.subr.bf16.mxu0 %v4232_v56 }
 0x3af   :  { %v1413_v33 = vadd.f32 %v1372_v37, %v7326_v24  ;;  %v1376_v40 = vadd.f32 %v1375_v25, %v5698_v23  ;;  %1675 = vmatprep.mubr.bf16.mxu0 %v1463_v58 }
 0x3b0   :  { %v1414_v5 = vadd.f32 %v1374_v13, %v7327_v48  ;;  %1676 = vmatmul.mubr.bf16.gmra.mrb[84].mxu0 %v1462_v52  ;;  %v1444_v3 = vmax.f32 %v1412_v38, 0.0  ;;  %v4247_v52 = vld [vmem:[%s7161_s3 + $0xf4] ss:$8 sps:$4 sm:$0xff]  }
 0x3b1   :  { %v1415_v15 = vadd.f32 %v1376_v40, %v7328_v61  ;;  %2235 = vmatpush1.bf16.msra.mxu0 %v4230_v43  ;;  %v1445_v6 = vmax.f32 %v1413_v33, 0.0  ;;  %v4245_v43 = vld [vmem:[%s7161_s3 + $0xf0] ss:$8 sps:$4 sm:$0xff]  }
 0x3b2   :  { %v1446_v54 = vmax.f32 %v1414_v5, 0.0  ;;  %2236 = vmatprep.subr.bf16.mxu0 %v4235_v53 }
 0x3b3   :  { %v1447_v32 = vmax.f32 %v1415_v15, 0.0  ;;  %v1379_v62 = vpop.f32.mrb[60].mxu1 }
 0x3b4   :  { %v1380_v44 = vadd.f32 %v1379_v62, %v5695_v14  ;;  %v1381_v51 = vpop.f32.mrb[61].mxu1  ;;  %v1464_v18 = vpack.c.bf16 %v1446_v54, %v1444_v3 }
 0x3b5   :  { %v1382_v21 = vadd.f32 %v1381_v51, %v5698_v23  ;;  %2237 = vmatpush1.bf16.msra.mxu0 %v4233_v9  ;;  %v1383_v22 = vpop.f32.mrb[62].mxu1  ;;  %v1465_v41 = vpack.c.bf16 %v1447_v32, %v1445_v6 }
 0x3b6   :  { %v1416_v47 = vadd.f32 %v1380_v44, %v7329_v35  ;;  %v1384_v27 = vadd.f32 %v1383_v22, %v5695_v14  ;;  %v1385_v57 = vpop.f32.mrb[63].mxu1  ;;  %2238 = vmatprep.subr.bf16.mxu0 %v4238_v4  ;;  %v7332_v14 = vmax.f32 %v5604_v20, 0.0 }
 0x3b7   :  { %v1417_v55 = vadd.f32 %v1382_v21, %v7330_v45  ;;  %v1386_v1 = vadd.f32 %v1385_v57, %v5698_v23  ;;  %1683 = vmatprep.mubr.bf16.mxu0 %v1465_v41  ;;  %v5884_v23 = vrot.slane %v1793_v31, %v4720_v28 }
 0x3b8   :  { %v1418_v16 = vadd.f32 %v1384_v27, %v7331_v7  ;;  %1684 = vmatmul.mubr.bf16.gmra.mrb[88].mxu0 %v1464_v18  ;;  %v1448_v19 = vmax.f32 %v1416_v47, 0.0 }
 0x3b9   :  { %v1419_v11 = vadd.f32 %v1386_v1, %v7332_v14  ;;  %2239 = vmatpush1.bf16.msra.mxu0 %v4236_v29  ;;  %v1449_v20 = vmax.f32 %v1417_v55, 0.0 }
 0x3ba   :  { %v1450_v10 = vmax.f32 %v1418_v16, 0.0  ;;  %2240 = vmatprep.subr.bf16.mxu0 %v4241_v49 }
 0x3bb   :  { %v1451_v36 = vmax.f32 %v1419_v11, 0.0  ;;  %v1883_v12 = vpop.f32.mrb[64].mxu1 }
 0x3bc   :  { %v1885_v63 = vpop.f32.mrb[65].mxu1  ;;  %v1466_v2 = vpack.c.bf16 %v1450_v10, %v1448_v19  ;;  %v5896_v50 = vadd.f32 %v1883_v12, %v5884_v23 }
 0x3bd   :  { %v5890_v60 = vadd.f32 %v1885_v63, %v5881_v39  ;;  %2241 = vmatpush1.bf16.msra.mxu0 %v4239_v59  ;;  %v1887_v56 = vpop.f32.mrb[66].mxu1  ;;  %v1467_v42 = vpack.c.bf16 %v1451_v36, %v1449_v20 }
 0x3be   :  { %v5899_v30 = vadd.f32 %v1887_v56, %v5884_v23  ;;  %v1889_v0 = vpop.f32.mrb[67].mxu1  ;;  %2242 = vmatprep.subr.bf16.mxu0 %v4244_v17  ;;  %v1962_v8 = vmax.f32 %v5896_v50, 0.0 }
 0x3bf   :  { %v1963_v37 = vmax.f32 %v5890_v60, 0.0  ;;  %v5906_v46 = vadd.f32 %v1889_v0, %v5881_v39  ;;  %1691 = vmatprep.mubr.bf16.mxu0 %v1467_v42 }
 0x3c0   :  { %1692 = vmatmul.mubr.bf16.gmra.mrb[92].mxu0 %v1466_v2  ;;  %v1964_v38 = vmax.f32 %v5899_v30, 0.0 }
 0x3c1   :  { %v1965_v58 = vmax.f32 %v5906_v46, 0.0  ;;  %2243 = vmatpush1.bf16.msra.mxu0 %v4242_v34 }
 0x3c2   :  { %2244 = vmatprep.subr.bf16.mxu0 %v4247_v52  ;;  %v1994_v40 = vpack.c.bf16 %v1964_v38, %v1962_v8 }
 0x3c3   :  { %v1995_v13 = vpack.c.bf16 %v1965_v58, %v1963_v37  ;;  %v1893_v25 = vpop.f32.mrb[68].mxu1 }
 0x3c4   :  { %v1895_v53 = vpop.f32.mrb[69].mxu1  ;;  %v5926_v48 = vadd.f32 %v1893_v25, %v5884_v23 }
 0x3c5   :  { %v5919_v24 = vadd.f32 %v1895_v53, %v5881_v39  ;;  %2245 = vmatpush1.bf16.msra.mxu0 %v4245_v43  ;;  %v1897_v33 = vpop.f32.mrb[70].mxu1  ;;  %2246 = vmatprep.mubr.bf16.mxu0 %v1995_v13 }
 0x3c6   :  { %v5929_v5 = vadd.f32 %v1897_v33, %v5884_v23  ;;  %v1899_v61 = vpop.f32.mrb[71].mxu1  ;;  %v1966_v54 = vmax.f32 %v5926_v48, 0.0 }
 0x3c7   :  { %v1967_v15 = vmax.f32 %v5919_v24, 0.0  ;;  %v5933_v9 = vadd.f32 %v1899_v61, %v5881_v39 }
 0x3c8   :  { %2247 = vmatmul.mubr.bf16.vlgmr.msra.gmra.mrb[96].mxu0 %v1994_v40  ;;  %v1968_v4 = vmax.f32 %v5929_v5, 0.0 }
 0x3c9   :  { %v1969_v3 = vmax.f32 %v5933_v9, 0.0 }
 0x3ca   :  { %v1996_v18 = vpack.c.bf16 %v1968_v4, %v1966_v54 }
 0x3cb   :  { %v1997_v6 = vpack.c.bf16 %v1969_v3, %v1967_v15  ;;  %v1903_v32 = vpop.f32.mrb[72].mxu1 }
 0x3cc   :  { %v1905_v62 = vpop.f32.mrb[73].mxu1  ;;  %v5950_v21 = vadd.f32 %v1903_v32, %v5884_v23 }
 0x3cd   :  { %v5943_v44 = vadd.f32 %v1905_v62, %v5881_v39  ;;  %v1907_v51 = vpop.f32.mrb[74].mxu1  ;;  %2256 = vmatprep.mubr.bf16.mxu0 %v1997_v6 }
 0x3ce   :  { %v5953_v22 = vadd.f32 %v1907_v51, %v5884_v23  ;;  %v1909_v41 = vpop.f32.mrb[75].mxu1  ;;  %v1970_v27 = vmax.f32 %v5950_v21, 0.0 }
 0x3cf   :  { %v1971_v29 = vmax.f32 %v5943_v44, 0.0  ;;  %v5957_v35 = vadd.f32 %v1909_v41, %v5881_v39 }
 0x3d0   :  { %2257 = vmatmul.mubr.bf16.gmra.mrb[100].mxu0 %v1996_v18  ;;  %v1972_v57 = vmax.f32 %v5953_v22, 0.0 }
 0x3d1   :  { %v1973_v47 = vmax.f32 %v5957_v35, 0.0 }
 0x3d2   :  { %v1998_v7 = vpack.c.bf16 %v1972_v57, %v1970_v27 }
 0x3d3   :  { %v1999_v31 = vpack.c.bf16 %v1973_v47, %v1971_v29  ;;  %v1913_v49 = vpop.f32.mrb[76].mxu1 }
 0x3d4   :  { %v1915_v45 = vpop.f32.mrb[77].mxu1  ;;  %v5974_v16 = vadd.f32 %v1913_v49, %v5884_v23  ;;  %v4250_v49 = vld [vmem:[%s7161_s3 + $0x104] ss:$8 sps:$4 sm:$0xff]  }
 0x3d5   :  { %v5967_v55 = vadd.f32 %v1915_v45, %v5881_v39  ;;  %v1917_v1 = vpop.f32.mrb[78].mxu1  ;;  %2266 = vmatprep.mubr.bf16.mxu0 %v1999_v31  ;;  %2611 = vmatprep.subr.bf16.mxu1 %v4250_v49 }
 0x3d6   :  { %v5977_v14 = vadd.f32 %v1917_v1, %v5884_v23  ;;  %v1919_v11 = vpop.f32.mrb[79].mxu1  ;;  %v7239_v17 = vmax.f32 %v5974_v16, 0.0 }
 0x3d7   :  { %v1975_v59 = vmax.f32 %v5967_v55, 0.0  ;;  %v5981_v19 = vadd.f32 %v1919_v11, %v5881_v39 }
 0x3d8   :  { %2267 = vmatmul.mubr.bf16.gmra.mrb[104].mxu0 %v1998_v7  ;;  %v7238_v20 = vmax.f32 %v5977_v14, 0.0  ;;  %v4248_v7 = vld [vmem:[%s7161_s3 + $0x100] ss:$8 sps:$4 sm:$0xff]  }
 0x3d9   :  { %v7237_v10 = vmax.f32 %v5981_v19, 0.0  ;;  %2612 = vmatpush1.bf16.msra.mxu1 %v4248_v7  ;;  %v4256_v7 = vld [vmem:[%s7161_s3 + $0x124] ss:$8 sps:$4 sm:$0xff]  }
 0x3da   :  { %v2000_v42 = vpack.c.bf16 %v7238_v20, %v7239_v17 }
 0x3db   :  { %v2001_v36 = vpack.c.bf16 %v7237_v10, %v1975_v59  ;;  %v1923_v12 = vpop.f32.mrb[80].mxu1 }
 0x3dc   :  { %v1925_v63 = vpop.f32.mrb[81].mxu1  ;;  %v5998_v34 = vadd.f32 %v1923_v12, %v5884_v23 }
 0x3dd   :  { %v5991_v2 = vadd.f32 %v1925_v63, %v5881_v39  ;;  %v1927_v56 = vpop.f32.mrb[82].mxu1  ;;  %2276 = vmatprep.mubr.bf16.mxu0 %v2001_v36  ;;  %v4253_v63 = vld [vmem:[%s7161_s3 + $0x114] ss:$8 sps:$4 sm:$0xff]  }
 0x3de   :  { %v6001_v0 = vadd.f32 %v1927_v56, %v5884_v23  ;;  %v1929_v52 = vpop.f32.mrb[83].mxu1  ;;  %v7235_v53 = vmax.f32 %v5998_v34, 0.0  ;;  %2613 = vmatprep.subr.bf16.mxu1 %v4253_v63 }
 0x3df   :  { %v7236_v43 = vmax.f32 %v5991_v2, 0.0  ;;  %v6005_v13 = vadd.f32 %v1929_v52, %v5881_v39  ;;  %v4251_v52 = vld [vmem:[%s7161_s3 + $0x110] ss:$8 sps:$4 sm:$0xff]  }
 0x3e0   :  { %2277 = vmatmul.mubr.bf16.gmra.mrb[108].mxu0 %v2000_v42  ;;  %v7234_v33 = vmax.f32 %v6001_v0, 0.0  ;;  %2614 = vmatpush1.bf16.msra.mxu1 %v4251_v52  ;;  %v4254_v52 = vld [vmem:[%s7161_s3 + $0x120] ss:$8 sps:$4 sm:$0xff]  }
 0x3e1   :  { %v7227_v25 = vmax.f32 %v6005_v13, 0.0  ;;  %2615 = vmatprep.subr.bf16.mxu1 %v4256_v7 }
 0x3e2   :  { %v2002_v51 = vpack.c.bf16 %v7234_v33, %v7235_v53 }
 0x3e3   :  { %v2003_v40 = vpack.c.bf16 %v7227_v25, %v7236_v43  ;;  %v1933_v61 = vpop.f32.mrb[84].mxu1 }
 0x3e4   :  { %v1935_v6 = vpop.f32.mrb[85].mxu1  ;;  %v6022_v18 = vadd.f32 %v1933_v61, %v5884_v23  ;;  %2616 = vmatpush1.bf16.msra.mxu1 %v4254_v52 }
 0x3e5   :  { %v6015_v32 = vadd.f32 %v1935_v6, %v5881_v39  ;;  %v1937_v62 = vpop.f32.mrb[86].mxu1  ;;  %2286 = vmatprep.mubr.bf16.mxu0 %v2003_v40 }
 0x3e6   :  { %v6025_v41 = vadd.f32 %v1937_v62, %v5884_v23  ;;  %v1939_v31 = vpop.f32.mrb[87].mxu1  ;;  %v7223_v36 = vmax.f32 %v6022_v18, 0.0 }
 0x3e7   :  { %v7224_v45 = vmax.f32 %v6015_v32, 0.0  ;;  %v6032_v1 = vadd.f32 %v1939_v31, %v5881_v39 }
 0x3e8   :  { %2287 = vmatmul.mubr.bf16.gmra.mrb[112].mxu0 %v2002_v51  ;;  %v7222_v12 = vmax.f32 %v6025_v41, 0.0 }
 0x3e9   :  { %v7221_v11 = vmax.f32 %v6032_v1, 0.0 }
 0x3ea   :  { %v2004_v62 = vpack.c.bf16 %v7222_v12, %v7223_v36 }
 0x3eb   :  { %v2005_v56 = vpack.c.bf16 %v7221_v11, %v7224_v45  ;;  %v1943_v42 = vpop.f32.mrb[88].mxu1  ;;  %v4259_v11 = vld [vmem:[%s7161_s3 + $0x134] ss:$8 sps:$4 sm:$0xff]  }
 0x3ec   :  { %v1945_v40 = vpop.f32.mrb[89].mxu1  ;;  %v6058_v51 = vadd.f32 %v1943_v42, %v5884_v23  ;;  %2617 = vmatprep.subr.bf16.mxu1 %v4259_v11  ;;  %v4262_v11 = vld [vmem:[%s7161_s3 + $0x144] ss:$8 sps:$4 sm:$0xff]  }
 0x3ed   :  { %v6051_v61 = vadd.f32 %v1945_v40, %v5881_v39  ;;  %v1947_v6 = vpop.f32.mrb[90].mxu1  ;;  %2296 = vmatprep.mubr.bf16.mxu0 %v2005_v56 }
 0x3ee   :  { %v6061_v31 = vadd.f32 %v1947_v6, %v5884_v23  ;;  %v1949_v49 = vpop.f32.mrb[91].mxu1  ;;  %v7233_v40 = vmax.f32 %v6058_v51, 0.0 }
 0x3ef   :  { %v7226_v63 = vmax.f32 %v6051_v61, 0.0  ;;  %v6068_v56 = vadd.f32 %v1949_v49, %v5881_v39 }
 0x3f0   :  { %2297 = vmatmul.mubr.bf16.gmra.mrb[116].mxu0 %v2004_v62  ;;  %v7228_v6 = vmax.f32 %v6061_v31, 0.0  ;;  %v4257_v62 = vld [vmem:[%s7161_s3 + $0x130] ss:$8 sps:$4 sm:$0xff]  }
 0x3f1   :  { %v7225_v42 = vmax.f32 %v6068_v56, 0.0  ;;  %2618 = vmatpush1.bf16.msra.mxu1 %v4257_v62  ;;  %v4260_v62 = vld [vmem:[%s7161_s3 + $0x140] ss:$8 sps:$4 sm:$0xff]  }
 0x3f2   :  { %v2006_v45 = vpack.c.bf16 %v7228_v6, %v7233_v40  ;;  %2619 = vmatprep.subr.bf16.mxu1 %v4262_v11  ;;  %v4265_v6 = vld [vmem:[%s7161_s3 + $0x154] ss:$8 sps:$4 sm:$0xff]   ;;  %v4268_v11 = vld [vmem:[%s7161_s3 + $0x164] ss:$8 sps:$4 sm:$0xff]   ;;  %v4296_v40 = vld [vmem:[%s7161_s3 + $0x200] ss:$8 sps:$4 sm:$0xff]  }
 0x3f3   :  { %v2007_v49 = vpack.c.bf16 %v7225_v42, %v7226_v63  ;;  %v1953_v12 = vpop.f32.mrb[92].mxu1 }
 0x3f4   :  { %v1955_v7 = vpop.f32.mrb[93].mxu1  ;;  %v6094_v42 = vadd.f32 %v1953_v12, %v5884_v23 }
 0x3f5   :  { %v6087_v52 = vadd.f32 %v1955_v7, %v5881_v39  ;;  %v1957_v36 = vpop.f32.mrb[94].mxu1  ;;  %2306 = vmatprep.mubr.bf16.mxu0 %v2007_v49  ;;  %2620 = vmatpush1.bf16.msra.mxu1 %v4260_v62  ;;  %v4266_v62 = vld [vmem:[%s7161_s3 + $0x160] ss:$8 sps:$4 sm:$0xff]  }
 0x3f6   :  { %v6097_v63 = vadd.f32 %v1957_v36, %v5884_v23  ;;  %v1959_v25 = vpop.f32.mrb[95].mxu1  ;;  %v7231_v23 = vmax.f32 %v6094_v42, 0.0  ;;  %2621 = vmatprep.subr.bf16.mxu1 %v4265_v6  ;;  %v4271_v6 = vld [vmem:[%s7161_s3 + $0x174] ss:$8 sps:$4 sm:$0xff]  }
 0x3f7   :  { %v7232_v7 = vmax.f32 %v6087_v52, 0.0  ;;  %v6104_v49 = vadd.f32 %v1959_v25, %v5881_v39  ;;  %v4263_v25 = vld [vmem:[%s7161_s3 + $0x150] ss:$8 sps:$4 sm:$0xff]  }
 0x3f8   :  { %2307 = vmatmul.mubr.bf16.gmra.mrb[120].mxu0 %v2006_v45  ;;  %v7230_v36 = vmax.f32 %v6097_v63, 0.0 }
 0x3f9   :  { %v7229_v12 = vmax.f32 %v6104_v49, 0.0  ;;  %2622 = vmatpush1.bf16.msra.mxu1 %v4263_v25  ;;  %v4274_v25 = vld [vmem:[%s7161_s3 + $0x184] ss:$8 sps:$4 sm:$0xff]  }
 0x3fa   :  { %v2008_v45 = vpack.c.bf16 %v7230_v36, %v7231_v23  ;;  %2623 = vmatprep.subr.bf16.mxu1 %v4268_v11  ;;  %v4277_v11 = vld [vmem:[%s7161_s3 + $0x194] ss:$8 sps:$4 sm:$0xff]  }
 0x3fb   :  { %v2009_v39 = vpack.c.bf16 %v7229_v12, %v7232_v7 }
 0x3fd   :  { %2316 = vmatprep.mubr.bf16.mxu0 %v2009_v39  ;;  %2624 = vmatpush1.bf16.msra.mxu1 %v4266_v62  ;;  %v4269_v39 = vld [vmem:[%s7161_s3 + $0x170] ss:$8 sps:$4 sm:$0xff]  }
 0x3fe   :  { %2625 = vmatprep.subr.bf16.mxu1 %v4271_v6  ;;  %v4275_v62 = vld [vmem:[%s7161_s3 + $0x190] ss:$8 sps:$4 sm:$0xff]   ;;  %v4280_v6 = vld [vmem:[%s7161_s3 + $0x1a4] ss:$8 sps:$4 sm:$0xff]  }
 0x400   :  { %2317 = vmatmul.mubr.bf16.gmra.mrb[124].mxu0 %v2008_v45  ;;  %v4272_v45 = vld [vmem:[%s7161_s3 + $0x180] ss:$8 sps:$4 sm:$0xff]  }
 0x401   :  { %2626 = vmatpush1.bf16.msra.mxu1 %v4269_v39  ;;  %v4278_v39 = vld [vmem:[%s7161_s3 + $0x1a0] ss:$8 sps:$4 sm:$0xff]  }
 0x402   :  { %2627 = vmatprep.subr.bf16.mxu1 %v4274_v25  ;;  %v4283_v25 = vld [vmem:[%s7161_s3 + $0x1b4] ss:$8 sps:$4 sm:$0xff]  }
 0x405   :  { %2628 = vmatpush1.bf16.msra.mxu1 %v4272_v45  ;;  %v4281_v45 = vld [vmem:[%s7161_s3 + $0x1b0] ss:$8 sps:$4 sm:$0xff]  }
 0x406   :  { %2629 = vmatprep.subr.bf16.mxu1 %v4277_v11  ;;  %v4286_v11 = vld [vmem:[%s7161_s3 + $0x1c4] ss:$8 sps:$4 sm:$0xff]  }
 0x409   :  { %2630 = vmatpush1.bf16.msra.mxu1 %v4275_v62  ;;  %v4284_v62 = vld [vmem:[%s7161_s3 + $0x1c0] ss:$8 sps:$4 sm:$0xff]  }
 0x40a   :  { %2631 = vmatprep.subr.bf16.mxu1 %v4280_v6  ;;  %v4289_v6 = vld [vmem:[%s7161_s3 + $0x1d4] ss:$8 sps:$4 sm:$0xff]  }
 0x40d   :  { %2632 = vmatpush1.bf16.msra.mxu1 %v4278_v39  ;;  %v4287_v39 = vld [vmem:[%s7161_s3 + $0x1d0] ss:$8 sps:$4 sm:$0xff]  }
 0x40e   :  { %2633 = vmatprep.subr.bf16.mxu1 %v4283_v25  ;;  %v4292_v25 = vld [vmem:[%s7161_s3 + $0x1e4] ss:$8 sps:$4 sm:$0xff]  }
 0x411   :  { %2634 = vmatpush1.bf16.msra.mxu1 %v4281_v45  ;;  %v4290_v45 = vld [vmem:[%s7161_s3 + $0x1e0] ss:$8 sps:$4 sm:$0xff]  }
 0x412   :  { %2635 = vmatprep.subr.bf16.mxu1 %v4286_v11  ;;  %v4295_v11 = vld [vmem:[%s7161_s3 + $0x1f4] ss:$8 sps:$4 sm:$0xff]  }
 0x415   :  { %2636 = vmatpush1.bf16.msra.mxu1 %v4284_v62  ;;  %v4293_v62 = vld [vmem:[%s7161_s3 + $0x1f0] ss:$8 sps:$4 sm:$0xff]  }
 0x416   :  { %2637 = vmatprep.subr.bf16.mxu1 %v4289_v6 }
 0x419   :  { %2638 = vmatpush1.bf16.msra.mxu1 %v4287_v39  ;;  %v6189_v39 = vld [vmem:[%s7165_s6] ss:$0 sm:$0xff] }
 0x41a   :  { %2639 = vmatprep.subr.bf16.mxu1 %v4292_v25 }
 0x41d   :  { %2640 = vmatpush1.bf16.msra.mxu1 %v4290_v45 }
 0x41e   :  { %2641 = vmatprep.subr.bf16.mxu1 %v4295_v11  ;;  %v4298_v11 = vld [vmem:[%s7161_s3 + $0x204] ss:$8 sps:$4 sm:$0xff]  }
 0x41f   :  { %3008 = vmatprep.subr.bf16.mxu0 %v4298_v11  ;;  %v4307_v11 = vld [vmem:[%s7161_s3 + $0x234] ss:$8 sps:$4 sm:$0xff]  }
 0x420   :  { %3009 = vmatpush1.bf16.msra.mxu0 %v4296_v40  ;;  %v4302_v40 = vld [vmem:[%s7161_s3 + $0x220] ss:$8 sps:$4 sm:$0xff]  }
 0x421   :  { %2642 = vmatpush1.bf16.msra.mxu1 %v4293_v62 }
 0x45b   :  { %v3899_v6 = vpop.f32.mrb[64].mxu0 }
 0x45c   :  { %v3900_v12 = vpop.f32.mrb[65].mxu0 }
 0x45d   :  { %v3901_v36 = vadd.f32 %v3900_v12, %v3899_v6  ;;  %v3902_v25 = vpop.f32.mrb[66].mxu0  ;;  %v4301_v12 = vld [vmem:[%s7161_s3 + $0x214] ss:$8 sps:$4 sm:$0xff]  }
 0x45e   :  { %v3903_v45 = vpop.f32.mrb[67].mxu0  ;;  %3010 = vmatprep.subr.bf16.mxu0 %v4301_v12 }
 0x45f   :  { %v1638_v23 = vadd.f32 %v3901_v36, %v6189_v39  ;;  %v3904_v7 = vadd.f32 %v3903_v45, %v3902_v25  ;;  %v4299_v36 = vld [vmem:[%s7161_s3 + $0x210] ss:$8 sps:$4 sm:$0xff]  }
 0x460   :  { %3011 = vmatpush1.bf16.msra.mxu0 %v4299_v36 }
 0x461   :  { %4360 = vtanh.f32 %v1638_v23  ;;  %v1641_v62 = vadd.f32 %v3904_v7, %v6189_v39  ;;  %v4304_v23 = vld [vmem:[%s7161_s3 + $0x224] ss:$8 sps:$4 sm:$0xff]  }
 0x462   :  { %3012 = vmatprep.subr.bf16.mxu0 %v4304_v23  ;;  %v4310_v23 = vld [vmem:[%s7161_s3 + $0x244] ss:$8 sps:$4 sm:$0xff]  }
 0x463   :  { %4362 = vtanh.f32 %v1641_v62  ;;  %v3905_v6 = vpop.f32.mrb[68].mxu0 }
 0x464   :  { %v3906_v25 = vpop.f32.mrb[69].mxu0  ;;  %3013 = vmatpush1.bf16.msra.mxu0 %v4302_v40 }
 0x465   :  { %v3907_v45 = vadd.f32 %v3906_v25, %v3905_v6  ;;  %v3908_v7 = vpop.f32.mrb[70].mxu0  ;;  %3014 = vmatprep.subr.bf16.mxu0 %v4307_v11 }
 0x466   :  { %v3909_v33 = vpop.f32.mrb[71].mxu0 }
 0x467   :  { %v1646_v53 = vadd.f32 %v3907_v45, %v6189_v39  ;;  %v3910_v43 = vadd.f32 %v3909_v33, %v3908_v7  ;;  %v4305_v33 = vld [vmem:[%s7161_s3 + $0x230] ss:$8 sps:$4 sm:$0xff]  }
 0x468   :  { %3015 = vmatpush1.bf16.msra.mxu0 %v4305_v33 }
 0x469   :  { %4364 = vtanh.f32 %v1646_v53  ;;  %v1649_v62 = vadd.f32 %v3910_v43, %v6189_v39  ;;  %3016 = vmatprep.subr.bf16.mxu0 %v4310_v23 }
 0x46b   :  { %v4361_v12 = vpop.eup %4360  ;;  %4366 = vtanh.f32 %v1649_v62  ;;  %v3911_v6 = vpop.f32.mrb[72].mxu0 }
 0x46c   :  { %v1716_v36 = vmul.f32 0.5, %v4361_v12  ;;  %v3912_v25 = vpop.f32.mrb[73].mxu0  ;;  %v4308_v12 = vld [vmem:[%s7161_s3 + $0x240] ss:$8 sps:$4 sm:$0xff]  }
 0x46d   :  { %v4363_v45 = vpop.eup %4362  ;;  %v3913_v53 = vadd.f32 %v3912_v25, %v3911_v6  ;;  %v3914_v7 = vpop.f32.mrb[74].mxu0  ;;  %v4313_v6 = vld [vmem:[%s7161_s3 + $0x254] ss:$8 sps:$4 sm:$0xff]   ;;  %3017 = vmatpush1.bf16.msra.mxu0 %v4308_v12 }
 0x46e   :  { %v1732_v43 = vadd.f32 0.5, %v1716_v36  ;;  %v1717_v10 = vmul.f32 0.5, %v4363_v45  ;;  %v3915_v62 = vpop.f32.mrb[75].mxu0  ;;  %3018 = vmatprep.subr.bf16.mxu0 %v4313_v6 }
 0x46f   :  { %v1654_v40 = vadd.f32 %v3913_v53, %v6189_v39  ;;  %v3916_v20 = vadd.f32 %v3915_v62, %v3914_v7 }
 0x470   :  { %1749 = vst.msk [vmem:[%s7166_s7] sm:$0xff] %vm1748_vm1, %v1732_v43  ;;  %v1733_v11 = vadd.f32 0.5, %v1717_v10  ;;  %v4311_v10 = vld [vmem:[%s7161_s3 + $0x250] ss:$8 sps:$4 sm:$0xff]  }
 0x471   :  { %4368 = vtanh.f32 %v1654_v40  ;;  %v1657_v36 = vadd.f32 %v3916_v20, %v6189_v39  ;;  %v4316_v20 = vld [vmem:[%s7161_s3 + $0x264] ss:$8 sps:$4 sm:$0xff]   ;;  %3019 = vmatpush1.bf16.msra.mxu0 %v4311_v10 }
 0x472   :  { %1750 = vst.msk [vmem:[%s7166_s7 + $0x8] sm:$0xff] %vm1748_vm1, %v1733_v11  ;;  %3020 = vmatprep.subr.bf16.mxu0 %v4316_v20  ;;  %v4317_v20 = vld [vmem:[%s7161_s3 + $0x270] ss:$8 sps:$4 sm:$0xff]  }
 0x473   :  { %v4365_v33 = vpop.eup %4364  ;;  %4370 = vtanh.f32 %v1657_v36  ;;  %v3917_v25 = vpop.f32.mrb[76].mxu0 }
 0x474   :  { %v1718_v23 = vmul.f32 0.5, %v4365_v33  ;;  %v3918_v45 = vpop.f32.mrb[77].mxu0  ;;  %v4314_v33 = vld [vmem:[%s7161_s3 + $0x260] ss:$8 sps:$4 sm:$0xff]  }
 0x475   :  { %v4367_v53 = vpop.eup %4366  ;;  %v3919_v7 = vadd.f32 %v3918_v45, %v3917_v25  ;;  %v3920_v43 = vpop.f32.mrb[78].mxu0  ;;  %v4319_v25 = vld [vmem:[%s7161_s3 + $0x274] ss:$8 sps:$4 sm:$0xff]   ;;  %3021 = vmatpush1.bf16.msra.mxu0 %v4314_v33 }
 0x476   :  { %v1734_v62 = vadd.f32 0.5, %v1718_v23  ;;  %v1719_v40 = vmul.f32 0.5, %v4367_v53  ;;  %v3921_v11 = vpop.f32.mrb[79].mxu0  ;;  %3022 = vmatprep.subr.bf16.mxu0 %v4319_v25 }
 0x477   :  { %v1662_v36 = vadd.f32 %v3919_v7, %v6189_v39  ;;  %v3922_v12 = vadd.f32 %v3921_v11, %v3920_v43  ;;  %v4322_v43 = vld [vmem:[%s7161_s3 + $0x284] ss:$8 sps:$4 sm:$0xff]  }
 0x478   :  { %1751 = vst.msk [vmem:[%s7166_s7 + $0x10] sm:$0xff] %vm1748_vm1, %v1734_v62  ;;  %v1735_v6 = vadd.f32 0.5, %v1719_v40 }
 0x479   :  { %4372 = vtanh.f32 %v1662_v36  ;;  %v1665_v23 = vadd.f32 %v3922_v12, %v6189_v39  ;;  %3023 = vmatpush1.bf16.msra.mxu0 %v4317_v20 }
 0x47a   :  { %1752 = vst.msk [vmem:[%s7166_s7 + $0x18] sm:$0xff] %vm1748_vm1, %v1735_v6  ;;  %3024 = vmatprep.subr.bf16.mxu0 %v4322_v43  ;;  %v4323_v43 = vld [vmem:[%s7161_s3 + $0x290] ss:$8 sps:$4 sm:$0xff]  }
 0x47b   :  { %v4369_v10 = vpop.eup %4368  ;;  %4374 = vtanh.f32 %v1665_v23  ;;  %v3923_v45 = vpop.f32.mrb[80].mxu0 }
 0x47c   :  { %v1720_v53 = vmul.f32 0.5, %v4369_v10  ;;  %v3924_v7 = vpop.f32.mrb[81].mxu0  ;;  %v4320_v10 = vld [vmem:[%s7161_s3 + $0x280] ss:$8 sps:$4 sm:$0xff]  }
 0x47d   :  { %v4371_v62 = vpop.eup %4370  ;;  %v3925_v40 = vadd.f32 %v3924_v7, %v3923_v45  ;;  %v3926_v11 = vpop.f32.mrb[82].mxu0  ;;  %v4325_v45 = vld [vmem:[%s7161_s3 + $0x294] ss:$8 sps:$4 sm:$0xff]   ;;  %3025 = vmatpush1.bf16.msra.mxu0 %v4320_v10 }
 0x47e   :  { %v1736_v36 = vadd.f32 0.5, %v1720_v53  ;;  %v1721_v12 = vmul.f32 0.5, %v4371_v62  ;;  %v3927_v6 = vpop.f32.mrb[83].mxu0  ;;  %3026 = vmatprep.subr.bf16.mxu0 %v4325_v45 }
 0x47f   :  { %v1670_v23 = vadd.f32 %v3925_v40, %v6189_v39  ;;  %v3928_v33 = vadd.f32 %v3927_v6, %v3926_v11  ;;  %v4328_v11 = vld [vmem:[%s7161_s3 + $0x2a4] ss:$8 sps:$4 sm:$0xff]  }
 0x480   :  { %1753 = vst.msk [vmem:[%s7166_s7 + $0x20] sm:$0xff] %vm1748_vm1, %v1736_v36  ;;  %v1737_v25 = vadd.f32 0.5, %v1721_v12 }
 0x481   :  { %4376 = vtanh.f32 %v1670_v23  ;;  %v1673_v53 = vadd.f32 %v3928_v33, %v6189_v39  ;;  %3027 = vmatpush1.bf16.msra.mxu0 %v4323_v43 }
 0x482   :  { %1754 = vst.msk [vmem:[%s7166_s7 + $0x28] sm:$0xff] %vm1748_vm1, %v1737_v25  ;;  %3028 = vmatprep.subr.bf16.mxu0 %v4328_v11  ;;  %v4329_v11 = vld [vmem:[%s7161_s3 + $0x2b0] ss:$8 sps:$4 sm:$0xff]  }
 0x483   :  { %v4373_v20 = vpop.eup %4372  ;;  %4378 = vtanh.f32 %v1673_v53  ;;  %v3929_v7 = vpop.f32.mrb[84].mxu0 }
 0x484   :  { %v1722_v62 = vmul.f32 0.5, %v4373_v20  ;;  %v3930_v40 = vpop.f32.mrb[85].mxu0  ;;  %v4326_v20 = vld [vmem:[%s7161_s3 + $0x2a0] ss:$8 sps:$4 sm:$0xff]  }
 0x485   :  { %v4375_v36 = vpop.eup %4374  ;;  %v3931_v12 = vadd.f32 %v3930_v40, %v3929_v7  ;;  %v3932_v6 = vpop.f32.mrb[86].mxu0  ;;  %v4331_v7 = vld [vmem:[%s7161_s3 + $0x2b4] ss:$8 sps:$4 sm:$0xff]   ;;  %3029 = vmatpush1.bf16.msra.mxu0 %v4326_v20 }
 0x486   :  { %v1738_v23 = vadd.f32 0.5, %v1722_v62  ;;  %v1723_v33 = vmul.f32 0.5, %v4375_v36  ;;  %v3933_v25 = vpop.f32.mrb[87].mxu0  ;;  %3030 = vmatprep.subr.bf16.mxu0 %v4331_v7 }
 0x487   :  { %v1678_v53 = vadd.f32 %v3931_v12, %v6189_v39  ;;  %v3934_v10 = vadd.f32 %v3933_v25, %v3932_v6  ;;  %v4334_v6 = vld [vmem:[%s7161_s3 + $0x2c4] ss:$8 sps:$4 sm:$0xff]  }
 0x488   :  { %1755 = vst.msk [vmem:[%s7166_s7 + $0x30] sm:$0xff] %vm1748_vm1, %v1738_v23  ;;  %v1739_v45 = vadd.f32 0.5, %v1723_v33 }
 0x489   :  { %4380 = vtanh.f32 %v1678_v53  ;;  %v1681_v62 = vadd.f32 %v3934_v10, %v6189_v39  ;;  %3031 = vmatpush1.bf16.msra.mxu0 %v4329_v11 }
 0x48a   :  { %1756 = vst.msk [vmem:[%s7166_s7 + $0x38] sm:$0xff] %vm1748_vm1, %v1739_v45  ;;  %3032 = vmatprep.subr.bf16.mxu0 %v4334_v6  ;;  %v2042_v6 = vld [vmem:[%s7163_s4] sm:$0x3] }
 0x48b   :  { %v4377_v43 = vpop.eup %4376  ;;  %4382 = vtanh.f32 %v1681_v62  ;;  %v3935_v40 = vpop.f32.mrb[88].mxu0 }
 0x48c   :  { %v1724_v36 = vmul.f32 0.5, %v4377_v43  ;;  %v3936_v12 = vpop.f32.mrb[89].mxu0  ;;  %v4332_v43 = vld [vmem:[%s7161_s3 + $0x2c0] ss:$8 sps:$4 sm:$0xff]  }
 0x48d   :  { %v4379_v23 = vpop.eup %4378  ;;  %v3937_v33 = vadd.f32 %v3936_v12, %v3935_v40  ;;  %v3938_v25 = vpop.f32.mrb[90].mxu0  ;;  %3033 = vmatpush1.bf16.msra.mxu0 %v4332_v43 }
 0x48e   :  { %v1740_v53 = vadd.f32 0.5, %v1724_v36  ;;  %v1725_v10 = vmul.f32 0.5, %v4379_v23  ;;  %v3939_v45 = vpop.f32.mrb[91].mxu0 }
 0x48f   :  { %v1686_v62 = vadd.f32 %v3937_v33, %v6189_v39  ;;  %v3940_v20 = vadd.f32 %v3939_v45, %v3938_v25 }
 0x490   :  { %1757 = vst.msk [vmem:[%s7166_s7 + $0x40] sm:$0xff] %vm1748_vm1, %v1740_v53  ;;  %v1741_v7 = vadd.f32 0.5, %v1725_v10 }
 0x491   :  { %4384 = vtanh.f32 %v1686_v62  ;;  %v1689_v40 = vadd.f32 %v3940_v20, %v6189_v39 }
 0x492   :  { %1758 = vst.msk [vmem:[%s7166_s7 + $0x48] sm:$0xff] %vm1748_vm1, %v1741_v7  ;;  %v6332_v7 = vrot.slane %v2042_v6, %v4720_v28 }
 0x493   :  { %v4381_v11 = vpop.eup %4380  ;;  %4386 = vtanh.f32 %v1689_v40  ;;  %v3941_v36 = vpop.f32.mrb[92].mxu0 }
 0x494   :  { %v1726_v12 = vmul.f32 0.5, %v4381_v11  ;;  %v3942_v23 = vpop.f32.mrb[93].mxu0  ;;  %v6336_v11 = vrot.slane %v2042_v6, %v4715_v26 }
 0x495   :  { %v4383_v33 = vpop.eup %4382  ;;  %v3943_v25 = vadd.f32 %v3942_v23, %v3941_v36  ;;  %v3944_v45 = vpop.f32.mrb[94].mxu0 }
 0x496   :  { %v1742_v53 = vadd.f32 0.5, %v1726_v12  ;;  %v1727_v10 = vmul.f32 0.5, %v4383_v33  ;;  %v3945_v62 = vpop.f32.mrb[95].mxu0 }
 0x497   :  { %v1694_v20 = vadd.f32 %v3943_v25, %v6189_v39  ;;  %v3946_v17 = vadd.f32 %v3945_v62, %v3944_v45 }
 0x498   :  { %1759 = vst.msk [vmem:[%s7166_s7 + $0x50] sm:$0xff] %vm1748_vm1, %v1742_v53  ;;  %v1743_v43 = vadd.f32 0.5, %v1727_v10 }
 0x499   :  { %4388 = vtanh.f32 %v1694_v20  ;;  %v1697_v40 = vadd.f32 %v3946_v17, %v6189_v39 }
 0x49a   :  { %1760 = vst.msk [vmem:[%s7166_s7 + $0x58] sm:$0xff] %vm1748_vm1, %v1743_v43 }
 0x49b   :  { %v4385_v36 = vpop.eup %4384  ;;  %4390 = vtanh.f32 %v1697_v40  ;;  %v2248_v12 = vpop.f32.mrb[96].mxu0 }
 0x49c   :  { %v1728_v23 = vmul.f32 0.5, %v4385_v36  ;;  %v2249_v33 = vadd.f32 %v2248_v12, %v6332_v7  ;;  %v2250_v25 = vpop.f32.mrb[97].mxu0 }
 0x49d   :  { %v4387_v45 = vpop.eup %4386  ;;  %v2251_v53 = vadd.f32 %v2250_v25, %v6336_v11  ;;  %v2252_v10 = vpop.f32.mrb[98].mxu0 }
 0x49e   :  { %v1744_v17 = vadd.f32 0.5, %v1728_v23  ;;  %v1729_v39 = vmul.f32 0.5, %v4387_v45  ;;  %v2253_v6 = vadd.f32 %v2252_v10, %v6332_v7  ;;  %v2254_v62 = vpop.f32.mrb[99].mxu0  ;;  %v6356_v36 = vadd.f32 %v2249_v33, %v1962_v8 }
 0x49f   :  { %v6347_v20 = vadd.f32 %v2251_v53, %v1963_v37  ;;  %v2255_v43 = vadd.f32 %v2254_v62, %v6336_v11 }
 0x4a0   :  { %1761 = vst.msk [vmem:[%s7166_s7 + $0x60] sm:$0xff] %vm1748_vm1, %v1744_v17  ;;  %v1745_v40 = vadd.f32 0.5, %v1729_v39  ;;  %v6360_v12 = vadd.f32 %v2253_v6, %v1964_v38  ;;  %v2359_v38 = vmax.f32 %v6356_v36, 0.0 }
 0x4a1   :  { %v6364_v60 = vadd.f32 %v2255_v43, %v1965_v58  ;;  %v2360_v50 = vmax.f32 %v6347_v20, 0.0 }
 0x4a2   :  { %1762 = vst.msk [vmem:[%s7166_s7 + $0x68] sm:$0xff] %vm1748_vm1, %v1745_v40  ;;  %v2361_v37 = vmax.f32 %v6360_v12, 0.0 }
 0x4a3   :  { %v4389_v23 = vpop.eup %4388  ;;  %v2362_v8 = vmax.f32 %v6364_v60, 0.0  ;;  %v2258_v33 = vpop.f32.mrb[100].mxu0 }
 0x4a4   :  { %v1730_v30 = vmul.f32 0.5, %v4389_v23  ;;  %v2259_v46 = vadd.f32 %v2258_v33, %v6332_v7  ;;  %v2260_v58 = vpop.f32.mrb[101].mxu0  ;;  %v2391_v6 = vpack.c.bf16 %v2361_v37, %v2359_v38 }
 0x4a5   :  { %v4391_v25 = vpop.eup %4390  ;;  %v2261_v45 = vadd.f32 %v2260_v58, %v6336_v11  ;;  %v2262_v53 = vpop.f32.mrb[102].mxu0  ;;  %v2392_v10 = vpack.c.bf16 %v2362_v8, %v2360_v50 }
 0x4a6   :  { %v1746_v17 = vadd.f32 0.5, %v1730_v30  ;;  %v1731_v39 = vmul.f32 0.5, %v4391_v25  ;;  %v2263_v62 = vadd.f32 %v2262_v53, %v6332_v7  ;;  %v2264_v43 = vpop.f32.mrb[103].mxu0  ;;  %v6396_v30 = vadd.f32 %v2259_v46, %v1966_v54 }
 0x4a7   :  { %v6387_v40 = vadd.f32 %v2261_v45, %v1967_v15  ;;  %v2265_v23 = vadd.f32 %v2264_v43, %v6336_v11  ;;  %2643 = vmatprep.mubr.bf16.mxu1 %v2392_v10 }
 0x4a8   :  { %1763 = vst.msk [vmem:[%s7166_s7 + $0x70] sm:$0xff] %vm1748_vm1, %v1746_v17  ;;  %v1747_v33 = vadd.f32 0.5, %v1731_v39  ;;  %v6400_v58 = vadd.f32 %v2263_v62, %v1968_v4  ;;  %2644 = vmatmul.mubr.bf16.vlgmr.msra.gmra.mrb[96].mxu1 %v2391_v6  ;;  %v2363_v5 = vmax.f32 %v6396_v30, 0.0 }
 0x4a9   :  { %v6404_v24 = vadd.f32 %v2265_v23, %v1969_v3  ;;  %v2364_v48 = vmax.f32 %v6387_v40, 0.0 }
 0x4aa   :  { %1764 = vst.msk [vmem:[%s7166_s7 + $0x78] sm:$0xff] %vm1748_vm1, %v1747_v33  ;;  %v2365_v15 = vmax.f32 %v6400_v58, 0.0 }
 0x4ab   :  { %v2366_v54 = vmax.f32 %v6404_v24, 0.0  ;;  %v2268_v46 = vpop.f32.mrb[104].mxu0 }
 0x4ac   :  { %v2269_v4 = vadd.f32 %v2268_v46, %v6332_v7  ;;  %v2270_v25 = vpop.f32.mrb[105].mxu0  ;;  %v2393_v17 = vpack.c.bf16 %v2365_v15, %v2363_v5 }
 0x4ad   :  { %v2271_v9 = vadd.f32 %v2270_v25, %v6336_v11  ;;  %v2272_v3 = vpop.f32.mrb[106].mxu0  ;;  %v2394_v45 = vpack.c.bf16 %v2366_v54, %v2364_v48 }
 0x4ae   :  { %v2273_v53 = vadd.f32 %v2272_v3, %v6332_v7  ;;  %v2274_v10 = vpop.f32.mrb[107].mxu0  ;;  %v6432_v62 = vadd.f32 %v2269_v4, %v1970_v27 }
 0x4af   :  { %v6427_v39 = vadd.f32 %v2271_v9, %v1971_v29  ;;  %v2275_v6 = vadd.f32 %v2274_v10, %v6336_v11  ;;  %2653 = vmatprep.mubr.bf16.mxu1 %v2394_v45 }
 0x4b0   :  { %v6436_v43 = vadd.f32 %v2273_v53, %v1972_v57  ;;  %2654 = vmatmul.mubr.bf16.gmra.mrb[100].mxu1 %v2393_v17  ;;  %v7262_v21 = vmax.f32 %v6432_v62, 0.0  ;;  %v7333_v53 = vmax.f32 %v5974_v16, 0.0  ;;  %v7334_v17 = vmax.f32 %v5977_v14, 0.0 }
 0x4b1   :  { %v6440_v23 = vadd.f32 %v2275_v6, %v1973_v47  ;;  %v2368_v29 = vmax.f32 %v6427_v39, 0.0 }
 0x4b2   :  { %v7261_v44 = vmax.f32 %v6436_v43, 0.0 }
 0x4b3   :  { %v7242_v33 = vmax.f32 %v6440_v23, 0.0  ;;  %v2278_v46 = vpop.f32.mrb[108].mxu0 }
 0x4b4   :  { %v2279_v27 = vadd.f32 %v2278_v46, %v6332_v7  ;;  %v2280_v4 = vpop.f32.mrb[109].mxu0  ;;  %v2395_v9 = vpack.c.bf16 %v7261_v44, %v7262_v21  ;;  %v7335_v46 = vmax.f32 %v5981_v19, 0.0 }
 0x4b5   :  { %v2281_v22 = vadd.f32 %v2280_v4, %v6336_v11  ;;  %v2282_v57 = vpop.f32.mrb[110].mxu0  ;;  %v2396_v35 = vpack.c.bf16 %v7242_v33, %v2368_v29 }
 0x4b6   :  { %v2283_v47 = vadd.f32 %v2282_v57, %v6332_v7  ;;  %v2284_v25 = vpop.f32.mrb[111].mxu0  ;;  %v6464_v10 = vadd.f32 %v2279_v27, %v7333_v53  ;;  %v7336_v53 = vmax.f32 %v5991_v2, 0.0 }
 0x4b7   :  { %v6459_v3 = vadd.f32 %v2281_v22, %v1975_v59  ;;  %v2285_v45 = vadd.f32 %v2284_v25, %v6336_v11  ;;  %2663 = vmatprep.mubr.bf16.mxu1 %v2396_v35 }
 0x4b8   :  { %v6468_v6 = vadd.f32 %v2283_v47, %v7334_v17  ;;  %2664 = vmatmul.mubr.bf16.gmra.mrb[104].mxu1 %v2395_v9  ;;  %v7246_v16 = vmax.f32 %v6464_v10, 0.0 }
 0x4b9   :  { %v6472_v4 = vadd.f32 %v2285_v45, %v7335_v46  ;;  %v7241_v59 = vmax.f32 %v6459_v3, 0.0 }
 0x4ba   :  { %v7243_v55 = vmax.f32 %v6468_v6, 0.0 }
 0x4bb   :  { %v7240_v22 = vmax.f32 %v6472_v4, 0.0  ;;  %v2288_v57 = vpop.f32.mrb[112].mxu0 }
 0x4bc   :  { %v2289_v27 = vadd.f32 %v2288_v57, %v6332_v7  ;;  %v2290_v35 = vpop.f32.mrb[113].mxu0  ;;  %v2397_v45 = vpack.c.bf16 %v7243_v55, %v7246_v16  ;;  %v7337_v57 = vmax.f32 %v5998_v34, 0.0 }
 0x4bd   :  { %v2291_v14 = vadd.f32 %v2290_v35, %v6336_v11  ;;  %v2292_v47 = vpop.f32.mrb[114].mxu0  ;;  %v2398_v19 = vpack.c.bf16 %v7240_v22, %v7241_v59  ;;  %v7338_v22 = vmax.f32 %v6001_v0, 0.0  ;;  %v7339_v59 = vmax.f32 %v6005_v13, 0.0 }
 0x4be   :  { %v2293_v25 = vadd.f32 %v2292_v47, %v6332_v7  ;;  %v2294_v9 = vpop.f32.mrb[115].mxu0  ;;  %v6496_v35 = vadd.f32 %v2289_v27, %v7337_v57 }
 0x4bf   :  { %v6491_v17 = vadd.f32 %v2291_v14, %v7336_v53  ;;  %v2295_v46 = vadd.f32 %v2294_v9, %v6336_v11  ;;  %2673 = vmatprep.mubr.bf16.mxu1 %v2398_v19 }
 0x4c0   :  { %v6500_v47 = vadd.f32 %v2293_v25, %v7338_v22  ;;  %2674 = vmatmul.mubr.bf16.gmra.mrb[108].mxu1 %v2397_v45  ;;  %v7250_v34 = vmax.f32 %v6496_v35, 0.0 }
 0x4c1   :  { %v6504_v33 = vadd.f32 %v2295_v46, %v7339_v59  ;;  %v7245_v14 = vmax.f32 %v6491_v17, 0.0  ;;  %v7340_v46 = vmax.f32 %v6015_v32, 0.0 }
 0x4c2   :  { %v7247_v2 = vmax.f32 %v6500_v47, 0.0 }
 0x4c3   :  { %v7244_v9 = vmax.f32 %v6504_v33, 0.0  ;;  %v2298_v19 = vpop.f32.mrb[116].mxu0 }
 0x4c4   :  { %v2299_v27 = vadd.f32 %v2298_v19, %v6332_v7  ;;  %v2300_v53 = vpop.f32.mrb[117].mxu0  ;;  %v2399_v45 = vpack.c.bf16 %v7247_v2, %v7250_v34 }
 0x4c5   :  { %v2301_v0 = vadd.f32 %v2300_v53, %v6336_v11  ;;  %v2302_v22 = vpop.f32.mrb[118].mxu0  ;;  %v2400_v13 = vpack.c.bf16 %v7244_v9, %v7245_v14  ;;  %v7341_v53 = vmax.f32 %v6022_v18, 0.0  ;;  %v7342_v9 = vmax.f32 %v6025_v41, 0.0 }
 0x4c6   :  { %v2303_v59 = vadd.f32 %v2302_v22, %v6332_v7  ;;  %v2304_v25 = vpop.f32.mrb[119].mxu0  ;;  %v7343_v14 = vmax.f32 %v6032_v1, 0.0 }
 0x4c7   :  { %v6523_v57 = vadd.f32 %v2301_v0, %v7340_v46  ;;  %v2305_v19 = vadd.f32 %v2304_v25, %v6336_v11  ;;  %2683 = vmatprep.mubr.bf16.mxu1 %v2400_v13  ;;  %v6528_v55 = vadd.f32 %v2299_v27, %v7341_v53 }
 0x4c8   :  { %v6532_v22 = vadd.f32 %v2303_v59, %v7342_v9  ;;  %2684 = vmatmul.mubr.bf16.gmra.mrb[112].mxu1 %v2399_v45 }
 0x4c9   :  { %v6536_v16 = vadd.f32 %v2305_v19, %v7343_v14  ;;  %v7249_v0 = vmax.f32 %v6523_v57, 0.0  ;;  %v7260_v18 = vmax.f32 %v6528_v55, 0.0  ;;  %v7344_v19 = vmax.f32 %v6051_v61, 0.0 }
 0x4ca   :  { %v7251_v32 = vmax.f32 %v6532_v22, 0.0 }
 0x4cb   :  { %v7248_v25 = vmax.f32 %v6536_v16, 0.0  ;;  %v2308_v13 = vpop.f32.mrb[120].mxu0 }
 0x4cc   :  { %v2309_v27 = vadd.f32 %v2308_v13, %v6332_v7  ;;  %v2310_v46 = vpop.f32.mrb[121].mxu0  ;;  %v2401_v45 = vpack.c.bf16 %v7251_v32, %v7260_v18 }
 0x4cd   :  { %v2311_v41 = vadd.f32 %v2310_v46, %v6336_v11  ;;  %v2312_v9 = vpop.f32.mrb[122].mxu0  ;;  %v2402_v1 = vpack.c.bf16 %v7248_v25, %v7249_v0  ;;  %v7345_v46 = vmax.f32 %v6058_v51, 0.0  ;;  %v7346_v25 = vmax.f32 %v6061_v31, 0.0 }
 0x4ce   :  { %v2313_v14 = vadd.f32 %v2312_v9, %v6332_v7  ;;  %v2314_v59 = vpop.f32.mrb[123].mxu0  ;;  %v7347_v0 = vmax.f32 %v6068_v56, 0.0 }
 0x4cf   :  { %v6555_v53 = vadd.f32 %v2311_v41, %v7344_v19  ;;  %v2315_v13 = vadd.f32 %v2314_v59, %v6336_v11  ;;  %2693 = vmatprep.mubr.bf16.mxu1 %v2402_v1  ;;  %v6560_v2 = vadd.f32 %v2309_v27, %v7345_v46 }
 0x4d0   :  { %v6564_v9 = vadd.f32 %v2313_v14, %v7346_v25  ;;  %2694 = vmatmul.mubr.bf16.gmra.mrb[116].mxu1 %v2401_v45 }
 0x4d1   :  { %v6568_v34 = vadd.f32 %v2315_v13, %v7347_v0  ;;  %v7253_v41 = vmax.f32 %v6555_v53, 0.0  ;;  %v7259_v51 = vmax.f32 %v6560_v2, 0.0  ;;  %v7348_v13 = vmax.f32 %v6087_v52, 0.0 }
 0x4d2   :  { %v7258_v61 = vmax.f32 %v6564_v9, 0.0 }
 0x4d3   :  { %v7252_v59 = vmax.f32 %v6568_v34, 0.0  ;;  %v2318_v1 = vpop.f32.mrb[124].mxu0 }
 0x4d4   :  { %v2319_v27 = vadd.f32 %v2318_v1, %v6332_v7  ;;  %v2320_v19 = vpop.f32.mrb[125].mxu0  ;;  %v2403_v45 = vpack.c.bf16 %v7258_v61, %v7259_v51 }
 0x4d5   :  { %v2321_v31 = vadd.f32 %v2320_v19, %v6336_v11  ;;  %v2322_v25 = vpop.f32.mrb[126].mxu0  ;;  %v2404_v56 = vpack.c.bf16 %v7252_v59, %v7253_v41  ;;  %v7349_v19 = vmax.f32 %v6094_v42, 0.0  ;;  %v7350_v59 = vmax.f32 %v6097_v63, 0.0 }
 0x4d6   :  { %v2323_v0 = vadd.f32 %v2322_v25, %v6332_v7  ;;  %v2324_v14 = vpop.f32.mrb[127].mxu0  ;;  %v7351_v25 = vmax.f32 %v6104_v49, 0.0  ;;  %v4337_v49 = vld [vmem:[%s7161_s3 + $0x2d4] ss:$8 sps:$4 sm:$0xff]  }
 0x4d7   :  { %v6587_v46 = vadd.f32 %v2321_v31, %v7348_v13  ;;  %v2325_v1 = vadd.f32 %v2324_v14, %v6336_v11  ;;  %2703 = vmatprep.mubr.bf16.mxu1 %v2404_v56  ;;  %v6592_v32 = vadd.f32 %v2319_v27, %v7349_v19  ;;  %3034 = vmatprep.subr.bf16.mxu0 %v4337_v49  ;;  %v4340_v27 = vld [vmem:[%s7161_s3 + $0x2e4] ss:$8 sps:$4 sm:$0xff]   ;;  %v4343_v14 = vld [vmem:[%s7161_s3 + $0x2f4] ss:$8 sps:$4 sm:$0xff]  }
 0x4d8   :  { %v6596_v7 = vadd.f32 %v2323_v0, %v7350_v59  ;;  %2704 = vmatmul.mubr.bf16.gmra.mrb[120].mxu1 %v2403_v45  ;;  %v4335_v59 = vld [vmem:[%s7161_s3 + $0x2d0] ss:$8 sps:$4 sm:$0xff]   ;;  %v4338_v0 = vld [vmem:[%s7161_s3 + $0x2e0] ss:$8 sps:$4 sm:$0xff]  }
 0x4d9   :  { %v6600_v41 = vadd.f32 %v2325_v1, %v7351_v25  ;;  %v7257_v31 = vmax.f32 %v6587_v46, 0.0  ;;  %v7256_v56 = vmax.f32 %v6592_v32, 0.0  ;;  %3035 = vmatpush1.bf16.msra.mxu0 %v4335_v59  ;;  %v4341_v45 = vld [vmem:[%s7161_s3 + $0x2f0] ss:$8 sps:$4 sm:$0xff]   ;;  %v4344_v13 = vld [vmem:[%s7164_s5 + $0x40] sm:$0xff]   ;;  %v4346_v19 = vld [vmem:[%s7164_s5 + $0x48] sm:$0xff]  }
 0x4da   :  { %v7255_v52 = vmax.f32 %v6596_v7, 0.0  ;;  %3036 = vmatprep.subr.bf16.mxu0 %v4340_v27  ;;  %v4345_v1 = vld [vmem:[%s7164_s5] sm:$0xff]   ;;  %4011 = vmatprep.subr.bf16.mxu1 %v4344_v13  ;;  %v4347_v25 = vld [vmem:[%s7164_s5 + $0x8] sm:$0xff]   ;;  %v6658_v49 = vld [vmem:[%s7164_s5 + $0x58] sm:$0xff]  }
 0x4db   :  { %v7254_v11 = vmax.f32 %v6600_v41, 0.0  ;;  %4019 = vmatpush3.bf16.msra.mxu1 %v4345_v1  ;;  %v6665_v59 = vld [vmem:[%s7164_s5 + $0x18] sm:$0xff]   ;;  %v6670_v27 = vld [vmem:[%s7164_s5 + $0x60] sm:$0xff]  }
 0x4dc   :  { %v2405_v42 = vpack.c.bf16 %v7255_v52, %v7256_v56  ;;  %4012 = vmatprep.subr.bf16.mxu1 %v4346_v19 }
 0x4dd   :  { %v2406_v63 = vpack.c.bf16 %v7254_v11, %v7257_v31  ;;  %3037 = vmatpush1.bf16.msra.mxu0 %v4338_v0  ;;  %v6677_v0 = vld [vmem:[%s7164_s5 + $0x20] sm:$0xff]  }
 0x4de   :  { %3038 = vmatprep.subr.bf16.mxu0 %v4343_v14  ;;  %v3768_v14 = vld [vmem:[%s7163_s4 + $0x2] sm:$0x3] }
 0x4df   :  { %2713 = vmatprep.mubr.bf16.mxu1 %v2406_v63  ;;  %v6647_v63 = vld [vmem:[%s7164_s5 + $0x50] sm:$0xff]   ;;  %4020 = vmatpush3.bf16.msra.mxu1 %v4347_v25 }
 0x4e0   :  { %2714 = vmatmul.mubr.bf16.gmra.mrb[124].mxu1 %v2405_v42  ;;  %4013 = vmatprep.subr.bf16.mxu1 %v6647_v63  ;;  %v6653_v42 = vld [vmem:[%s7164_s5 + $0x10] sm:$0xff]  }
 0x4e1   :  { %3039 = vmatpush1.bf16.msra.mxu0 %v4341_v45  ;;  %v6684_v45 = vrot.slane %v3768_v14, %v4720_v28 }
 0x4e2   :  { %3947 = vmatprep.subr.bf16.mxu0 %v4344_v13  ;;  %v6687_v13 = vrot.slane %v3768_v14, %v4715_v26 }
 0x4e3   :  { %4021 = vmatpush3.bf16.msra.mxu1 %v6653_v42 }
 0x4e4   :  { %4014 = vmatprep.subr.bf16.mxu1 %v6658_v49 }
 0x4e7   :  { %4022 = vmatpush3.bf16.msra.mxu1 %v6665_v59 }
 0x4e8   :  { %4015 = vmatprep.subr.bf16.mxu1 %v6670_v27 }
 0x4eb   :  { %4023 = vmatpush3.bf16.msra.mxu1 %v6677_v0 }
 0x57b   :  { %v2645_v11 = vpop.f32.mrb[96].mxu1 }
 0x57c   :  { %v2646_v52 = vadd.f32 %v2645_v11, %v6684_v45  ;;  %v2647_v56 = vpop.f32.mrb[97].mxu1 }
 0x57d   :  { %v2648_v31 = vadd.f32 %v2647_v56, %v6687_v13  ;;  %v2649_v61 = vpop.f32.mrb[98].mxu1 }
 0x57e   :  { %v2650_v51 = vadd.f32 %v2649_v61, %v6684_v45  ;;  %v2651_v18 = vpop.f32.mrb[99].mxu1  ;;  %v6699_v14 = vadd.f32 %v2646_v52, %v2359_v38 }
 0x57f   :  { %v6694_v44 = vadd.f32 %v2648_v31, %v2360_v50  ;;  %v2652_v21 = vadd.f32 %v2651_v18, %v6687_v13 }
 0x580   :  { %v6703_v11 = vadd.f32 %v2650_v51, %v2361_v37  ;;  %v2756_v18 = vmax.f32 %v6699_v14, 0.0 }
 0x581   :  { %v6707_v56 = vadd.f32 %v2652_v21, %v2362_v8  ;;  %v2757_v20 = vmax.f32 %v6694_v44, 0.0 }
 0x582   :  { %v2758_v61 = vmax.f32 %v6703_v11, 0.0 }
 0x583   :  { %v7263_v50 = vmax.f32 %v6707_v56, 0.0  ;;  %v2655_v31 = vpop.f32.mrb[100].mxu1 }
 0x584   :  { %v2656_v36 = vadd.f32 %v2655_v31, %v6684_v45  ;;  %v2657_v38 = vpop.f32.mrb[101].mxu1  ;;  %v2788_v8 = vpack.c.bf16 %v2758_v61, %v2756_v18 }
 0x585   :  { %v2658_v12 = vadd.f32 %v2657_v38, %v6687_v13  ;;  %v2659_v37 = vpop.f32.mrb[102].mxu1  ;;  %v2789_v60 = vpack.c.bf16 %v7263_v50, %v2757_v20 }
 0x586   :  { %v2660_v21 = vadd.f32 %v2659_v37, %v6684_v45  ;;  %v2661_v51 = vpop.f32.mrb[103].mxu1  ;;  %v6731_v38 = vadd.f32 %v2656_v36, %v2363_v5 }
 0x587   :  { %v6726_v52 = vadd.f32 %v2658_v12, %v2364_v48  ;;  %v2662_v31 = vadd.f32 %v2661_v51, %v6687_v13  ;;  %3040 = vmatprep.mubr.bf16.mxu0 %v2789_v60  ;;  %v7352_v51 = vmax.f32 %v6432_v62, 0.0 }
 0x588   :  { %v6735_v50 = vadd.f32 %v2660_v21, %v2365_v15  ;;  %3041 = vmatmul.mubr.bf16.vlgmr.msra.gmra.mrb[128].mxu0 %v2788_v8  ;;  %v2760_v5 = vmax.f32 %v6731_v38, 0.0 }
 0x589   :  { %v6739_v37 = vadd.f32 %v2662_v31, %v2366_v54  ;;  %3948 = vmatpush3.bf16.msra.mxu0 %v4345_v1  ;;  %v2761_v48 = vmax.f32 %v6726_v52, 0.0  ;;  %v7353_v31 = vmax.f32 %v6436_v43, 0.0 }
 0x58a   :  { %v2762_v40 = vmax.f32 %v6735_v50, 0.0  ;;  %3949 = vmatprep.subr.bf16.mxu0 %v4346_v19 }
 0x58b   :  { %v2763_v12 = vmax.f32 %v6739_v37, 0.0  ;;  %v2665_v30 = vpop.f32.mrb[104].mxu1 }
 0x58c   :  { %v2666_v58 = vadd.f32 %v2665_v30, %v6684_v45  ;;  %v2667_v15 = vpop.f32.mrb[105].mxu1  ;;  %v2790_v19 = vpack.c.bf16 %v2762_v40, %v2760_v5 }
 0x58d   :  { %v2668_v36 = vadd.f32 %v2667_v15, %v6687_v13  ;;  %v2669_v60 = vpop.f32.mrb[106].mxu1  ;;  %v2791_v24 = vpack.c.bf16 %v2763_v12, %v2761_v48  ;;  %3950 = vmatpush3.bf16.msra.mxu0 %v4347_v25  ;;  %v7354_v15 = vmax.f32 %v6440_v23, 0.0 }
 0x58e   :  { %v2670_v54 = vadd.f32 %v2669_v60, %v6684_v45  ;;  %v2671_v1 = vpop.f32.mrb[107].mxu1  ;;  %3951 = vmatprep.subr.bf16.mxu0 %v6647_v63  ;;  %v6764_v25 = vadd.f32 %v2666_v58, %v7352_v51 }
 0x58f   :  { %v6759_v8 = vadd.f32 %v2668_v36, %v2368_v29  ;;  %v2672_v21 = vadd.f32 %v2671_v1, %v6687_v13  ;;  %3050 = vmatprep.mubr.bf16.mxu0 %v2791_v24 }
 0x590   :  { %v6768_v30 = vadd.f32 %v2670_v54, %v7353_v31  ;;  %3051 = vmatmul.mubr.bf16.gmra.mrb[132].mxu0 %v2790_v19  ;;  %v2764_v43 = vmax.f32 %v6764_v25, 0.0  ;;  %v7355_v19 = vmax.f32 %v6459_v3, 0.0  ;;  %v7356_v31 = vmax.f32 %v6464_v10, 0.0 }
 0x591   :  { %v6772_v60 = vadd.f32 %v2672_v21, %v7354_v15  ;;  %3952 = vmatpush3.bf16.msra.mxu0 %v6653_v42  ;;  %v2765_v29 = vmax.f32 %v6759_v8, 0.0  ;;  %v7357_v15 = vmax.f32 %v6468_v6, 0.0 }
 0x592   :  { %v2766_v39 = vmax.f32 %v6768_v30, 0.0  ;;  %3953 = vmatprep.subr.bf16.mxu0 %v6658_v49 }
 0x593   :  { %v2767_v62 = vmax.f32 %v6772_v60, 0.0  ;;  %v2675_v63 = vpop.f32.mrb[108].mxu1 }
 0x594   :  { %v2676_v58 = vadd.f32 %v2675_v63, %v6684_v45  ;;  %v2677_v36 = vpop.f32.mrb[109].mxu1  ;;  %v2792_v1 = vpack.c.bf16 %v2766_v39, %v2764_v43 }
 0x595   :  { %v2678_v23 = vadd.f32 %v2677_v36, %v6687_v13  ;;  %v2679_v24 = vpop.f32.mrb[110].mxu1  ;;  %v2793_v42 = vpack.c.bf16 %v2767_v62, %v2765_v29  ;;  %3954 = vmatpush3.bf16.msra.mxu0 %v6665_v59  ;;  %v7358_v36 = vmax.f32 %v6472_v4, 0.0 }
 0x596   :  { %v2680_v49 = vadd.f32 %v2679_v24, %v6684_v45  ;;  %v2681_v54 = vpop.f32.mrb[111].mxu1  ;;  %3955 = vmatprep.subr.bf16.mxu0 %v6670_v27  ;;  %v6800_v59 = vadd.f32 %v2676_v58, %v7356_v31 }
 0x597   :  { %v6795_v21 = vadd.f32 %v2678_v23, %v7355_v19  ;;  %v2682_v51 = vadd.f32 %v2681_v54, %v6687_v13  ;;  %3060 = vmatprep.mubr.bf16.mxu0 %v2793_v42 }
 0x598   :  { %v6804_v63 = vadd.f32 %v2680_v49, %v7357_v15  ;;  %3061 = vmatmul.mubr.bf16.gmra.mrb[136].mxu0 %v2792_v1  ;;  %v7269_v58 = vmax.f32 %v6800_v59, 0.0  ;;  %v7376_v30 = vmax.f32 %v6800_v59, 0.0 }
 0x599   :  { %v6808_v24 = vadd.f32 %v2682_v51, %v7358_v36  ;;  %3956 = vmatpush3.bf16.msra.mxu0 %v6677_v0  ;;  %v7265_v27 = vmax.f32 %v6795_v21, 0.0  ;;  %v7359_v51 = vmax.f32 %v6491_v17, 0.0  ;;  %v7360_v36 = vmax.f32 %v6496_v35, 0.0 }
 0x59a   :  { %v7266_v3 = vmax.f32 %v6804_v63, 0.0 }
 0x59b   :  { %v7264_v23 = vmax.f32 %v6808_v24, 0.0  ;;  %v2685_v10 = vpop.f32.mrb[112].mxu1 }
 0x59c   :  { %v2686_v6 = vadd.f32 %v2685_v10, %v6684_v45  ;;  %v2687_v42 = vpop.f32.mrb[113].mxu1  ;;  %v2794_v19 = vpack.c.bf16 %v7266_v3, %v7269_v58 }
 0x59d   :  { %v2688_v49 = vadd.f32 %v2687_v42, %v6687_v13  ;;  %v2689_v54 = vpop.f32.mrb[114].mxu1  ;;  %v2795_v4 = vpack.c.bf16 %v7264_v23, %v7265_v27  ;;  %v7361_v42 = vmax.f32 %v6500_v47, 0.0  ;;  %v7362_v23 = vmax.f32 %v6504_v33, 0.0 }
 0x59e   :  { %v2690_v0 = vadd.f32 %v2689_v54, %v6684_v45  ;;  %v2691_v1 = vpop.f32.mrb[115].mxu1  ;;  %v6833_v10 = vadd.f32 %v2686_v6, %v7360_v36  ;;  %v7363_v36 = vmax.f32 %v6523_v57, 0.0 }
 0x59f   :  { %v6828_v31 = vadd.f32 %v2688_v49, %v7359_v51  ;;  %v2692_v15 = vadd.f32 %v2691_v1, %v6687_v13  ;;  %3070 = vmatprep.mubr.bf16.mxu0 %v2795_v4 }
 0x5a0   :  { %v6837_v54 = vadd.f32 %v2690_v0, %v7361_v42  ;;  %3071 = vmatmul.mubr.bf16.gmra.mrb[140].mxu0 %v2794_v19  ;;  %v7273_v35 = vmax.f32 %v6833_v10, 0.0 }
 0x5a1   :  { %v6841_v27 = vadd.f32 %v2692_v15, %v7362_v23  ;;  %v7268_v49 = vmax.f32 %v6828_v31, 0.0 }
 0x5a2   :  { %v7270_v17 = vmax.f32 %v6837_v54, 0.0 }
 0x5a3   :  { %v7267_v1 = vmax.f32 %v6841_v27, 0.0  ;;  %v2695_v4 = vpop.f32.mrb[116].mxu1 }
 0x5a4   :  { %v2696_v6 = vadd.f32 %v2695_v4, %v6684_v45  ;;  %v2697_v51 = vpop.f32.mrb[117].mxu1  ;;  %v2796_v15 = vpack.c.bf16 %v7270_v17, %v7273_v35 }
 0x5a5   :  { %v2698_v47 = vadd.f32 %v2697_v51, %v6687_v13  ;;  %v2699_v0 = vpop.f32.mrb[118].mxu1  ;;  %v2797_v33 = vpack.c.bf16 %v7267_v1, %v7268_v49  ;;  %v7364_v51 = vmax.f32 %v6528_v55, 0.0  ;;  %v7365_v1 = vmax.f32 %v6532_v22, 0.0 }
 0x5a6   :  { %v2700_v23 = vadd.f32 %v2699_v0, %v6684_v45  ;;  %v2701_v19 = vpop.f32.mrb[119].mxu1  ;;  %v7366_v49 = vmax.f32 %v6536_v16, 0.0 }
 0x5a7   :  { %v6860_v42 = vadd.f32 %v2698_v47, %v7363_v36  ;;  %v2702_v4 = vadd.f32 %v2701_v19, %v6687_v13  ;;  %3080 = vmatprep.mubr.bf16.mxu0 %v2797_v33  ;;  %v6865_v3 = vadd.f32 %v2696_v6, %v7364_v51 }
 0x5a8   :  { %v6869_v0 = vadd.f32 %v2700_v23, %v7365_v1  ;;  %3081 = vmatmul.mubr.bf16.gmra.mrb[144].mxu0 %v2796_v15 }
 0x5a9   :  { %v6873_v58 = vadd.f32 %v2702_v4, %v7366_v49  ;;  %v7272_v47 = vmax.f32 %v6860_v42, 0.0  ;;  %v2776_v55 = vmax.f32 %v6865_v3, 0.0  ;;  %v7367_v4 = vmax.f32 %v6555_v53, 0.0 }
 0x5aa   :  { %v7274_v57 = vmax.f32 %v6869_v0, 0.0 }
 0x5ab   :  { %v7271_v19 = vmax.f32 %v6873_v58, 0.0  ;;  %v2705_v33 = vpop.f32.mrb[120].mxu1 }
 0x5ac   :  { %v2706_v6 = vadd.f32 %v2705_v33, %v6684_v45  ;;  %v2707_v36 = vpop.f32.mrb[121].mxu1  ;;  %v2798_v15 = vpack.c.bf16 %v7274_v57, %v2776_v55 }
 0x5ad   :  { %v2708_v22 = vadd.f32 %v2707_v36, %v6687_v13  ;;  %v2709_v1 = vpop.f32.mrb[122].mxu1  ;;  %v2799_v16 = vpack.c.bf16 %v7271_v19, %v7272_v47  ;;  %v7368_v36 = vmax.f32 %v6560_v2, 0.0  ;;  %v7369_v19 = vmax.f32 %v6564_v9, 0.0 }
 0x5ae   :  { %v2710_v49 = vadd.f32 %v2709_v1, %v6684_v45  ;;  %v2711_v23 = vpop.f32.mrb[123].mxu1  ;;  %v7370_v47 = vmax.f32 %v6568_v34, 0.0 }
 0x5af   :  { %v6892_v51 = vadd.f32 %v2708_v22, %v7367_v4  ;;  %v2712_v33 = vadd.f32 %v2711_v23, %v6687_v13  ;;  %3090 = vmatprep.mubr.bf16.mxu0 %v2799_v16  ;;  %v6897_v17 = vadd.f32 %v2706_v6, %v7368_v36 }
 0x5b0   :  { %v6901_v1 = vadd.f32 %v2710_v49, %v7369_v19  ;;  %3091 = vmatmul.mubr.bf16.gmra.mrb[148].mxu0 %v2798_v15 }
 0x5b1   :  { %v6905_v35 = vadd.f32 %v2712_v33, %v7370_v47  ;;  %v7276_v22 = vmax.f32 %v6892_v51, 0.0  ;;  %v2780_v2 = vmax.f32 %v6897_v17, 0.0  ;;  %v7371_v33 = vmax.f32 %v6587_v46, 0.0 }
 0x5b2   :  { %v2782_v53 = vmax.f32 %v6901_v1, 0.0 }
 0x5b3   :  { %v7275_v23 = vmax.f32 %v6905_v35, 0.0  ;;  %v2715_v16 = vpop.f32.mrb[124].mxu1 }
 0x5b4   :  { %v2716_v6 = vadd.f32 %v2715_v16, %v6684_v45  ;;  %v2717_v4 = vpop.f32.mrb[125].mxu1  ;;  %v2800_v15 = vpack.c.bf16 %v2782_v53, %v2780_v2 }
 0x5b5   :  { %v2718_v9 = vadd.f32 %v2717_v4, %v6687_v13  ;;  %v2719_v19 = vpop.f32.mrb[126].mxu1  ;;  %v2801_v34 = vpack.c.bf16 %v7275_v23, %v7276_v22  ;;  %v7372_v4 = vmax.f32 %v6592_v32, 0.0  ;;  %v7373_v23 = vmax.f32 %v6596_v7, 0.0  ;;  %v4354_v7 = vld [vmem:[%s7164_s5 + $0x68] sm:$0xff]  }
 0x5b6   :  { %v2720_v47 = vadd.f32 %v2719_v19, %v6684_v45  ;;  %v2721_v49 = vpop.f32.mrb[127].mxu1  ;;  %v7374_v19 = vmax.f32 %v6600_v41, 0.0  ;;  %3957 = vmatprep.subr.bf16.mxu0 %v4354_v7  ;;  %4016 = vmatprep.subr.bf16.mxu1 %v4354_v7 }
 0x5b7   :  { %v6924_v36 = vadd.f32 %v2718_v9, %v7371_v33  ;;  %v2722_v16 = vadd.f32 %v2721_v49, %v6687_v13  ;;  %3100 = vmatprep.mubr.bf16.mxu0 %v2801_v34  ;;  %v6929_v57 = vadd.f32 %v2716_v6, %v7372_v4  ;;  %v4356_v6 = vld [vmem:[%s7164_s5 + $0x70] sm:$0xff]   ;;  %v4358_v49 = vld [vmem:[%s7164_s5 + $0x78] sm:$0xff]   ;;  %v3833_v33 = vld [vmem:[%s7163_s4 + $0x4] sm:$0x3] }
 0x5b8   :  { %v6933_v45 = vadd.f32 %v2720_v47, %v7373_v23  ;;  %3101 = vmatmul.mubr.bf16.gmra.mrb[152].mxu0 %v2800_v15  ;;  %v4355_v23 = vld [vmem:[%s7164_s5 + $0x28] sm:$0xff]   ;;  %v4357_v47 = vld [vmem:[%s7164_s5 + $0x30] sm:$0xff]   ;;  %v4359_v15 = vld [vmem:[%s7164_s5 + $0x38] sm:$0xff]   ;;  %v6976_v4 = vrot.slane %v3833_v33, %v4715_v26 }
 0x5b9   :  { %v6937_v22 = vadd.f32 %v2722_v16, %v7374_v19  ;;  %v7279_v9 = vmax.f32 %v6924_v36, 0.0  ;;  %v2784_v34 = vmax.f32 %v6929_v57, 0.0  ;;  %3958 = vmatpush3.bf16.msra.mxu0 %v4355_v23  ;;  %4024 = vmatpush3.bf16.msra.mxu1 %v4355_v23  ;;  %v6973_v16 = vrot.slane %v3833_v33, %v4720_v28 }
 0x5ba   :  { %v7278_v46 = vmax.f32 %v6933_v45, 0.0  ;;  %3959 = vmatprep.subr.bf16.mxu0 %v4356_v6  ;;  %4017 = vmatprep.subr.bf16.mxu1 %v4356_v6  ;;  %v7375_v33 = vmax.f32 %v6707_v56, 0.0 }
 0x5bb   :  { %v7277_v13 = vmax.f32 %v6937_v22, 0.0 }
 0x5bc   :  { %v2802_v41 = vpack.c.bf16 %v7278_v46, %v2784_v34 }
 0x5bd   :  { %v2803_v32 = vpack.c.bf16 %v7277_v13, %v7279_v9  ;;  %3960 = vmatpush3.bf16.msra.mxu0 %v4357_v47  ;;  %4025 = vmatpush3.bf16.msra.mxu1 %v4357_v47 }
 0x5be   :  { %3961 = vmatprep.subr.bf16.mxu0 %v4358_v49  ;;  %4018 = vmatprep.subr.bf16.mxu1 %v4358_v49 }
 0x5bf   :  { %3110 = vmatprep.mubr.bf16.mxu0 %v2803_v32 }
 0x5c0   :  { %3111 = vmatmul.mubr.bf16.gmra.mrb[156].mxu0 %v2802_v41 }
 0x5c1   :  { %3962 = vmatpush3.bf16.msra.mxu0 %v4359_v15  ;;  %4026 = vmatpush3.bf16.msra.mxu1 %v4359_v15 }
 0x65b   :  { %v3042_v19 = vpop.f32.mrb[128].mxu0 }
 0x65c   :  { %v3043_v32 = vadd.f32 %v3042_v19, %v6973_v16  ;;  %v3044_v41 = vpop.f32.mrb[129].mxu0 }
 0x65d   :  { %v3045_v7 = vadd.f32 %v3044_v41, %v6976_v4  ;;  %v3046_v23 = vpop.f32.mrb[130].mxu0 }
 0x65e   :  { %v3121_v6 = vadd.f32 %v3043_v32, %v2756_v18  ;;  %v3047_v47 = vadd.f32 %v3046_v23, %v6973_v16  ;;  %v3048_v49 = vpop.f32.mrb[131].mxu0 }
 0x65f   :  { %v3122_v28 = vadd.f32 %v3045_v7, %v2757_v20  ;;  %v3049_v15 = vadd.f32 %v3048_v49, %v6976_v4 }
 0x660   :  { %v3123_v26 = vadd.f32 %v3047_v47, %v2758_v61  ;;  %v3153_v13 = vmax.f32 %v3121_v6, 0.0 }
 0x661   :  { %v3124_v19 = vadd.f32 %v3049_v15, %v7375_v33  ;;  %v3154_v46 = vmax.f32 %v3122_v28, 0.0 }
 0x662   :  { %v3155_v41 = vmax.f32 %v3123_v26, 0.0 }
 0x663   :  { %v3156_v9 = vmax.f32 %v3124_v19, 0.0  ;;  %v3052_v14 = vpop.f32.mrb[132].mxu0 }
 0x664   :  { %v3185_v18 = vpack.c.bf16 %v3155_v41, %v3153_v13  ;;  %v3053_v32 = vadd.f32 %v3052_v14, %v6973_v16  ;;  %v3054_v23 = vpop.f32.mrb[133].mxu0 }
 0x665   :  { %v3055_v44 = vadd.f32 %v3054_v23, %v6976_v4  ;;  %v3056_v20 = vpop.f32.mrb[134].mxu0  ;;  %v3186_v7 = vpack.c.bf16 %v3156_v9, %v3154_v46 }
 0x666   :  { %v3125_v11 = vadd.f32 %v3053_v32, %v2760_v5  ;;  %v3057_v61 = vadd.f32 %v3056_v20, %v6973_v16  ;;  %v3058_v56 = vpop.f32.mrb[135].mxu0 }
 0x667   :  { %v3126_v6 = vadd.f32 %v3055_v44, %v2761_v48  ;;  %v3059_v47 = vadd.f32 %v3058_v56, %v6976_v4  ;;  %3368 = vmatprep.mubr.bf16.mxu0 %v3186_v7 }
 0x668   :  { %v3127_v13 = vadd.f32 %v3057_v61, %v2762_v40  ;;  %3369 = vmatmul.mubr.bf16.vlgmr.msra.gmra.mrb[160].mxu0 %v3185_v18  ;;  %v3157_v46 = vmax.f32 %v3125_v11, 0.0 }
 0x669   :  { %v3128_v49 = vadd.f32 %v3059_v47, %v2763_v12  ;;  %v3158_v38 = vmax.f32 %v3126_v6, 0.0 }
 0x66a   :  { %v3159_v9 = vmax.f32 %v3127_v13, 0.0  ;;  %v7378_v13 = vmax.f32 %v6804_v63, 0.0  ;;  %v7380_v63 = vmax.f32 %v6833_v10, 0.0 }
 0x66b   :  { %v3160_v5 = vmax.f32 %v3128_v49, 0.0  ;;  %v3062_v28 = vpop.f32.mrb[136].mxu0 }
 0x66c   :  { %v3063_v15 = vadd.f32 %v3062_v28, %v6973_v16  ;;  %v3064_v26 = vpop.f32.mrb[137].mxu0  ;;  %v3187_v52 = vpack.c.bf16 %v3159_v9, %v3157_v46  ;;  %v7379_v46 = vmax.f32 %v6808_v24, 0.0 }
 0x66d   :  { %v3065_v48 = vadd.f32 %v3064_v26, %v6976_v4  ;;  %v3066_v33 = vpop.f32.mrb[138].mxu0  ;;  %v3188_v19 = vpack.c.bf16 %v3160_v5, %v3158_v38 }
 0x66e   :  { %v3129_v50 = vadd.f32 %v3063_v15, %v2764_v43  ;;  %v3067_v40 = vadd.f32 %v3066_v33, %v6973_v16  ;;  %v3068_v37 = vpop.f32.mrb[139].mxu0 }
 0x66f   :  { %v3130_v12 = vadd.f32 %v3065_v48, %v2765_v29  ;;  %v3069_v41 = vadd.f32 %v3068_v37, %v6976_v4  ;;  %3376 = vmatprep.mubr.bf16.mxu0 %v3188_v19  ;;  %v7381_v37 = vmax.f32 %v6828_v31, 0.0 }
 0x670   :  { %v3131_v14 = vadd.f32 %v3067_v40, %v2766_v39  ;;  %3377 = vmatmul.mubr.bf16.gmra.mrb[164].mxu0 %v3187_v52  ;;  %v3161_v32 = vmax.f32 %v3129_v50, 0.0 }
 0x671   :  { %v3132_v18 = vadd.f32 %v3069_v41, %v2767_v62  ;;  %v3162_v25 = vmax.f32 %v3130_v12, 0.0  ;;  %v7377_v62 = vmax.f32 %v6795_v21, 0.0 }
 0x672   :  { %v3163_v23 = vmax.f32 %v3131_v14, 0.0  ;;  %v7382_v14 = vmax.f32 %v6837_v54, 0.0 }
 0x673   :  { %v3164_v43 = vmax.f32 %v3132_v18, 0.0  ;;  %v3072_v44 = vpop.f32.mrb[140].mxu0 }
 0x674   :  { %v3073_v20 = vadd.f32 %v3072_v44, %v6973_v16  ;;  %v3074_v7 = vpop.f32.mrb[141].mxu0  ;;  %v3189_v8 = vpack.c.bf16 %v3163_v23, %v3161_v32  ;;  %v7383_v32 = vmax.f32 %v6841_v27, 0.0 }
 0x675   :  { %v3075_v29 = vadd.f32 %v3074_v7, %v6976_v4  ;;  %v3076_v11 = vpop.f32.mrb[142].mxu0  ;;  %v3190_v61 = vpack.c.bf16 %v3164_v43, %v3162_v25 }
 0x676   :  { %v3133_v39 = vadd.f32 %v3073_v20, %v7376_v30  ;;  %v3077_v56 = vadd.f32 %v3076_v11, %v6973_v16  ;;  %v3078_v60 = vpop.f32.mrb[143].mxu0 }
 0x677   :  { %v3134_v6 = vadd.f32 %v3075_v29, %v7377_v62  ;;  %v3079_v47 = vadd.f32 %v3078_v60, %v6976_v4  ;;  %3384 = vmatprep.mubr.bf16.mxu0 %v3190_v61  ;;  %v7385_v62 = vmax.f32 %v6869_v0, 0.0 }
 0x678   :  { %v3135_v49 = vadd.f32 %v3077_v56, %v7378_v13  ;;  %3385 = vmatmul.mubr.bf16.gmra.mrb[168].mxu0 %v3189_v8  ;;  %v3165_v38 = vmax.f32 %v3133_v39, 0.0  ;;  %v7384_v39 = vmax.f32 %v6860_v42, 0.0 }
 0x679   :  { %v3136_v9 = vadd.f32 %v3079_v47, %v7379_v46  ;;  %v3166_v59 = vmax.f32 %v3134_v6, 0.0  ;;  %v7386_v47 = vmax.f32 %v6873_v58, 0.0 }
 0x67a   :  { %v3167_v5 = vmax.f32 %v3135_v49, 0.0 }
 0x67b   :  { %v3168_v28 = vmax.f32 %v3136_v9, 0.0  ;;  %v3082_v15 = vpop.f32.mrb[144].mxu0 }
 0x67c   :  { %v3191_v26 = vpack.c.bf16 %v3167_v5, %v3165_v38  ;;  %v3083_v52 = vadd.f32 %v3082_v15, %v6973_v16  ;;  %v3084_v21 = vpop.f32.mrb[145].mxu0 }
 0x67d   :  { %v3085_v48 = vadd.f32 %v3084_v21, %v6976_v4  ;;  %v3086_v33 = vpop.f32.mrb[146].mxu0  ;;  %v3192_v19 = vpack.c.bf16 %v3168_v28, %v3166_v59 }
 0x67e   :  { %v3137_v50 = vadd.f32 %v3083_v52, %v7380_v63  ;;  %v3087_v40 = vadd.f32 %v3086_v33, %v6973_v16  ;;  %v3088_v24 = vpop.f32.mrb[147].mxu0  ;;  %v7387_v52 = vmax.f32 %v6892_v51, 0.0 }
 0x67f   :  { %v3138_v12 = vadd.f32 %v3085_v48, %v7381_v37  ;;  %v3089_v41 = vadd.f32 %v3088_v24, %v6976_v4  ;;  %3392 = vmatprep.mubr.bf16.mxu1 %v3192_v19  ;;  %v7388_v19 = vmax.f32 %v6905_v35, 0.0 }
 0x680   :  { %v3139_v18 = vadd.f32 %v3087_v40, %v7382_v14  ;;  %3393 = vmatmul.mubr.bf16.vlgmr.msra.gmra.mrb[128].mxu1 %v3191_v26  ;;  %v3169_v25 = vmax.f32 %v3137_v50, 0.0 }
 0x681   :  { %v3140_v23 = vadd.f32 %v3089_v41, %v7383_v32  ;;  %v3170_v10 = vmax.f32 %v3138_v12, 0.0  ;;  %v7389_v32 = vmax.f32 %v6924_v36, 0.0 }
 0x682   :  { %v3171_v43 = vmax.f32 %v3139_v18, 0.0 }
 0x683   :  { %v3172_v44 = vmax.f32 %v3140_v23, 0.0  ;;  %v3092_v20 = vpop.f32.mrb[148].mxu0 }
 0x684   :  { %v3093_v7 = vadd.f32 %v3092_v20, %v6973_v16  ;;  %v3094_v8 = vpop.f32.mrb[149].mxu0  ;;  %v3193_v31 = vpack.c.bf16 %v3171_v43, %v3169_v25  ;;  %v7390_v43 = vmax.f32 %v6933_v45, 0.0 }
 0x685   :  { %v3095_v29 = vadd.f32 %v3094_v8, %v6976_v4  ;;  %v3096_v11 = vpop.f32.mrb[150].mxu0  ;;  %v3194_v61 = vpack.c.bf16 %v3172_v44, %v3170_v10  ;;  %v7391_v44 = vmax.f32 %v6937_v22, 0.0 }
 0x686   :  { %v3141_v54 = vadd.f32 %v3093_v7, %v2776_v55  ;;  %v3097_v30 = vadd.f32 %v3096_v11, %v6973_v16  ;;  %v3098_v27 = vpop.f32.mrb[151].mxu0 }
 0x687   :  { %v3142_v56 = vadd.f32 %v3095_v29, %v7384_v39  ;;  %v3099_v60 = vadd.f32 %v3098_v27, %v6976_v4  ;;  %3400 = vmatprep.mubr.bf16.mxu1 %v3194_v61 }
 0x688   :  { %v3143_v6 = vadd.f32 %v3097_v30, %v7385_v62  ;;  %3401 = vmatmul.mubr.bf16.gmra.mrb[132].mxu1 %v3193_v31  ;;  %v3173_v49 = vmax.f32 %v3141_v54, 0.0 }
 0x689   :  { %v3144_v13 = vadd.f32 %v3099_v60, %v7386_v47  ;;  %v3174_v3 = vmax.f32 %v3142_v56, 0.0 }
 0x68a   :  { %v3175_v46 = vmax.f32 %v3143_v6, 0.0 }
 0x68b   :  { %v3176_v55 = vmax.f32 %v3144_v13, 0.0  ;;  %v3102_v9 = vpop.f32.mrb[152].mxu0 }
 0x68c   :  { %v3103_v38 = vadd.f32 %v3102_v9, %v6973_v16  ;;  %v3104_v5 = vpop.f32.mrb[153].mxu0  ;;  %v3195_v42 = vpack.c.bf16 %v3175_v46, %v3173_v49 }
 0x68d   :  { %v3105_v59 = vadd.f32 %v3104_v5, %v6976_v4  ;;  %v3106_v28 = vpop.f32.mrb[154].mxu0  ;;  %v3196_v15 = vpack.c.bf16 %v3176_v55, %v3174_v3 }
 0x68e   :  { %v3145_v0 = vadd.f32 %v3103_v38, %v2780_v2  ;;  %v3107_v26 = vadd.f32 %v3106_v28, %v6973_v16  ;;  %v3108_v58 = vpop.f32.mrb[155].mxu0 }
 0x68f   :  { %v3146_v21 = vadd.f32 %v3105_v59, %v7387_v52  ;;  %v3109_v48 = vadd.f32 %v3108_v58, %v6976_v4  ;;  %3408 = vmatprep.mubr.bf16.mxu1 %v3196_v15 }
 0x690   :  { %v3147_v33 = vadd.f32 %v3107_v26, %v2782_v53  ;;  %3409 = vmatmul.mubr.bf16.gmra.mrb[136].mxu1 %v3195_v42  ;;  %v3177_v50 = vmax.f32 %v3145_v0, 0.0 }
 0x691   :  { %v3148_v63 = vadd.f32 %v3109_v48, %v7388_v19  ;;  %v3178_v17 = vmax.f32 %v3146_v21, 0.0 }
 0x692   :  { %v3179_v40 = vmax.f32 %v3147_v33, 0.0 }
 0x693   :  { %v3180_v2 = vmax.f32 %v3148_v63, 0.0  ;;  %v3112_v24 = vpop.f32.mrb[156].mxu0 }
 0x694   :  { %v3113_v37 = vadd.f32 %v3112_v24, %v6973_v16  ;;  %v3114_v12 = vpop.f32.mrb[157].mxu0  ;;  %v3197_v51 = vpack.c.bf16 %v3179_v40, %v3177_v50 }
 0x695   :  { %v3115_v41 = vadd.f32 %v3114_v12, %v6976_v4  ;;  %v3116_v14 = vpop.f32.mrb[158].mxu0  ;;  %v3198_v18 = vpack.c.bf16 %v3180_v2, %v3178_v17 }
 0x696   :  { %v3149_v1 = vadd.f32 %v3113_v37, %v2784_v34  ;;  %v3117_v53 = vadd.f32 %v3116_v14, %v6973_v16  ;;  %v3118_v35 = vpop.f32.mrb[159].mxu0 }
 0x697   :  { %v3150_v23 = vadd.f32 %v3115_v41, %v7389_v32  ;;  %v3119_v25 = vadd.f32 %v3118_v35, %v6976_v4  ;;  %3416 = vmatprep.mubr.bf16.mxu1 %v3198_v18  ;;  %v7077_v4 = vld [vmem:[%s7165_s6] ss:$0 sm:$0xff] }
 0x698   :  { %v3151_v10 = vadd.f32 %v3117_v53, %v7390_v43  ;;  %3417 = vmatmul.mubr.bf16.gmra.mrb[140].mxu1 %v3197_v51  ;;  %v3181_v7 = vmax.f32 %v3149_v1, 0.0 }
 0x699   :  { %v3152_v20 = vadd.f32 %v3119_v25, %v7391_v44  ;;  %v3182_v57 = vmax.f32 %v3150_v23, 0.0 }
 0x69a   :  { %v3183_v8 = vmax.f32 %v3151_v10, 0.0 }
 0x69b   :  { %v3184_v34 = vmax.f32 %v3152_v20, 0.0 }
 0x69c   :  { %v3199_v31 = vpack.c.bf16 %v3183_v8, %v3181_v7 }
 0x69d   :  { %v3200_v16 = vpack.c.bf16 %v3184_v34, %v3182_v57 }
 0x69f   :  { %3424 = vmatprep.mubr.bf16.mxu1 %v3200_v16 }
 0x6a0   :  { %3425 = vmatmul.mubr.bf16.gmra.mrb[144].mxu1 %v3199_v31 }
 0x73b   :  { %v3963_v36 = vpop.f32.mrb[160].mxu0 }
 0x73c   :  { %v3964_v45 = vpop.f32.mrb[161].mxu0 }
 0x73d   :  { %v3965_v29 = vadd.f32 %v3964_v45, %v3963_v36  ;;  %v3966_v11 = vpop.f32.mrb[162].mxu0 }
 0x73e   :  { %v3967_v61 = vpop.f32.mrb[163].mxu0 }
 0x73f   :  { %v3371_v22 = vadd.f32 %v3965_v29, %v7077_v4  ;;  %v3968_v54 = vadd.f32 %v3967_v61, %v3966_v11 }
 0x741   :  { %4392 = vtanh.f32 %v3371_v22  ;;  %v3374_v30 = vadd.f32 %v3968_v54, %v7077_v4 }
 0x743   :  { %4394 = vtanh.f32 %v3374_v30  ;;  %v3969_v27 = vpop.f32.mrb[164].mxu0 }
 0x744   :  { %v3970_v39 = vpop.f32.mrb[165].mxu0 }
 0x745   :  { %v3971_v56 = vadd.f32 %v3970_v39, %v3969_v27  ;;  %v3972_v60 = vpop.f32.mrb[166].mxu0 }
 0x746   :  { %v3973_v62 = vpop.f32.mrb[167].mxu0 }
 0x747   :  { %v3379_v6 = vadd.f32 %v3971_v56, %v7077_v4  ;;  %v3974_v47 = vadd.f32 %v3973_v62, %v3972_v60 }
 0x749   :  { %4396 = vtanh.f32 %v3379_v6  ;;  %v3382_v13 = vadd.f32 %v3974_v47, %v7077_v4 }
 0x74b   :  { %v4393_v49 = vpop.eup %4392  ;;  %4398 = vtanh.f32 %v3382_v13  ;;  %v3975_v46 = vpop.f32.mrb[168].mxu0 }
 0x74c   :  { %v3449_v3 = vmul.f32 0.5, %v4393_v49  ;;  %v3976_v55 = vpop.f32.mrb[169].mxu0 }
 0x74d   :  { %v4395_v9 = vpop.eup %4394  ;;  %v3977_v38 = vadd.f32 %v3976_v55, %v3975_v46  ;;  %v3978_v5 = vpop.f32.mrb[170].mxu0 }
 0x74e   :  { %v3465_v42 = vadd.f32 0.5, %v3449_v3  ;;  %v3450_v59 = vmul.f32 0.5, %v4395_v9  ;;  %v3979_v28 = vpop.f32.mrb[171].mxu0 }
 0x74f   :  { %v3387_v15 = vadd.f32 %v3977_v38, %v7077_v4  ;;  %v3980_v0 = vadd.f32 %v3979_v28, %v3978_v5 }
 0x750   :  { %3481 = vst.msk [vmem:[%s7166_s7 + $0x80] sm:$0xff] %vm1748_vm1, %v3465_v42  ;;  %v3466_v26 = vadd.f32 0.5, %v3450_v59 }
 0x751   :  { %4400 = vtanh.f32 %v3387_v15  ;;  %v3390_v58 = vadd.f32 %v3980_v0, %v7077_v4 }
 0x752   :  { %3482 = vst.msk [vmem:[%s7166_s7 + $0x88] sm:$0xff] %vm1748_vm1, %v3466_v26 }
 0x753   :  { %v4397_v52 = vpop.eup %4396  ;;  %4402 = vtanh.f32 %v3390_v58  ;;  %v3981_v21 = vpop.f32.mrb[128].mxu1 }
 0x754   :  { %v3451_v48 = vmul.f32 0.5, %v4397_v52  ;;  %v3982_v33 = vpop.f32.mrb[129].mxu1 }
 0x755   :  { %v4399_v19 = vpop.eup %4398  ;;  %v3983_v63 = vadd.f32 %v3982_v33, %v3981_v21  ;;  %v3984_v50 = vpop.f32.mrb[130].mxu1 }
 0x756   :  { %v3467_v40 = vadd.f32 0.5, %v3451_v48  ;;  %v3452_v17 = vmul.f32 0.5, %v4399_v19  ;;  %v3985_v2 = vpop.f32.mrb[131].mxu1 }
 0x757   :  { %v3395_v24 = vadd.f32 %v3983_v63, %v7077_v4  ;;  %v3986_v37 = vadd.f32 %v3985_v2, %v3984_v50 }
 0x758   :  { %3483 = vst.msk [vmem:[%s7166_s7 + $0x90] sm:$0xff] %vm1748_vm1, %v3467_v40  ;;  %v3468_v12 = vadd.f32 0.5, %v3452_v17 }
 0x759   :  { %4404 = vtanh.f32 %v3395_v24  ;;  %v3398_v51 = vadd.f32 %v3986_v37, %v7077_v4 }
 0x75a   :  { %3484 = vst.msk [vmem:[%s7166_s7 + $0x98] sm:$0xff] %vm1748_vm1, %v3468_v12 }
 0x75b   :  { %v4401_v41 = vpop.eup %4400  ;;  %4406 = vtanh.f32 %v3398_v51  ;;  %v3987_v14 = vpop.f32.mrb[132].mxu1 }
 0x75c   :  { %v3453_v18 = vmul.f32 0.5, %v4401_v41  ;;  %v3988_v1 = vpop.f32.mrb[133].mxu1 }
 0x75d   :  { %v4403_v53 = vpop.eup %4402  ;;  %v3989_v35 = vadd.f32 %v3988_v1, %v3987_v14  ;;  %v3990_v32 = vpop.f32.mrb[134].mxu1 }
 0x75e   :  { %v3469_v23 = vadd.f32 0.5, %v3453_v18  ;;  %v3454_v25 = vmul.f32 0.5, %v4403_v53  ;;  %v3991_v43 = vpop.f32.mrb[135].mxu1 }
 0x75f   :  { %v3403_v10 = vadd.f32 %v3989_v35, %v7077_v4  ;;  %v3992_v44 = vadd.f32 %v3991_v43, %v3990_v32 }
 0x760   :  { %3485 = vst.msk [vmem:[%s7166_s7 + $0xa0] sm:$0xff] %vm1748_vm1, %v3469_v23  ;;  %v3470_v20 = vadd.f32 0.5, %v3454_v25 }
 0x761   :  { %4408 = vtanh.f32 %v3403_v10  ;;  %v3406_v7 = vadd.f32 %v3992_v44, %v7077_v4 }
 0x762   :  { %3486 = vst.msk [vmem:[%s7166_s7 + $0xa8] sm:$0xff] %vm1748_vm1, %v3470_v20 }
 0x763   :  { %v4405_v8 = vpop.eup %4404  ;;  %4410 = vtanh.f32 %v3406_v7  ;;  %v3993_v57 = vpop.f32.mrb[136].mxu1 }
 0x764   :  { %v3455_v34 = vmul.f32 0.5, %v4405_v8  ;;  %v3994_v31 = vpop.f32.mrb[137].mxu1 }
 0x765   :  { %v4407_v16 = vpop.eup %4406  ;;  %v3995_v36 = vadd.f32 %v3994_v31, %v3993_v57  ;;  %v3996_v45 = vpop.f32.mrb[138].mxu1 }
 0x766   :  { %v3471_v29 = vadd.f32 0.5, %v3455_v34  ;;  %v3456_v11 = vmul.f32 0.5, %v4407_v16  ;;  %v3997_v61 = vpop.f32.mrb[139].mxu1 }
 0x767   :  { %v3411_v22 = vadd.f32 %v3995_v36, %v7077_v4  ;;  %v3998_v54 = vadd.f32 %v3997_v61, %v3996_v45 }
 0x768   :  { %3487 = vst.msk [vmem:[%s7166_s7 + $0xb0] sm:$0xff] %vm1748_vm1, %v3471_v29  ;;  %v3472_v30 = vadd.f32 0.5, %v3456_v11 }
 0x769   :  { %4412 = vtanh.f32 %v3411_v22  ;;  %v3414_v27 = vadd.f32 %v3998_v54, %v7077_v4 }
 0x76a   :  { %3488 = vst.msk [vmem:[%s7166_s7 + $0xb8] sm:$0xff] %vm1748_vm1, %v3472_v30 }
 0x76b   :  { %v4409_v39 = vpop.eup %4408  ;;  %4414 = vtanh.f32 %v3414_v27  ;;  %v3999_v56 = vpop.f32.mrb[140].mxu1 }
 0x76c   :  { %v3457_v60 = vmul.f32 0.5, %v4409_v39  ;;  %v4000_v62 = vpop.f32.mrb[141].mxu1 }
 0x76d   :  { %v4411_v6 = vpop.eup %4410  ;;  %v4001_v47 = vadd.f32 %v4000_v62, %v3999_v56  ;;  %v4002_v13 = vpop.f32.mrb[142].mxu1 }
 0x76e   :  { %v3473_v49 = vadd.f32 0.5, %v3457_v60  ;;  %v3458_v46 = vmul.f32 0.5, %v4411_v6  ;;  %v4003_v3 = vpop.f32.mrb[143].mxu1 }
 0x76f   :  { %v3419_v55 = vadd.f32 %v4001_v47, %v7077_v4  ;;  %v4004_v9 = vadd.f32 %v4003_v3, %v4002_v13 }
 0x770   :  { %3489 = vst.msk [vmem:[%s7166_s7 + $0xc0] sm:$0xff] %vm1748_vm1, %v3473_v49  ;;  %v3474_v38 = vadd.f32 0.5, %v3458_v46 }
 0x771   :  { %4416 = vtanh.f32 %v3419_v55  ;;  %v3422_v5 = vadd.f32 %v4004_v9, %v7077_v4 }
 0x772   :  { %3490 = vst.msk [vmem:[%s7166_s7 + $0xc8] sm:$0xff] %vm1748_vm1, %v3474_v38 }
 0x773   :  { %v4413_v42 = vpop.eup %4412  ;;  %4418 = vtanh.f32 %v3422_v5  ;;  %v4005_v59 = vpop.f32.mrb[144].mxu1 }
 0x774   :  { %v3459_v28 = vmul.f32 0.5, %v4413_v42  ;;  %v4006_v15 = vpop.f32.mrb[145].mxu1 }
 0x775   :  { %v4415_v0 = vpop.eup %4414  ;;  %v4007_v26 = vadd.f32 %v4006_v15, %v4005_v59  ;;  %v4008_v58 = vpop.f32.mrb[146].mxu1 }
 0x776   :  { %v3475_v52 = vadd.f32 0.5, %v3459_v28  ;;  %v3460_v21 = vmul.f32 0.5, %v4415_v0  ;;  %v4009_v48 = vpop.f32.mrb[147].mxu1 }
 0x777   :  { %v3427_v33 = vadd.f32 %v4007_v26, %v7077_v4  ;;  %v4010_v19 = vadd.f32 %v4009_v48, %v4008_v58 }
 0x778   :  { %3491 = vst.msk [vmem:[%s7166_s7 + $0xd0] sm:$0xff] %vm1748_vm1, %v3475_v52  ;;  %v3476_v63 = vadd.f32 0.5, %v3460_v21 }
 0x779   :  { %4420 = vtanh.f32 %v3427_v33  ;;  %v3430_v50 = vadd.f32 %v4010_v19, %v7077_v4 }
 0x77a   :  { %3492 = vst.msk [vmem:[%s7166_s7 + $0xd8] sm:$0xff] %vm1748_vm1, %v3476_v63 }
 0x77b   :  { %v4417_v40 = vpop.eup %4416  ;;  %4422 = vtanh.f32 %v3430_v50 }
 0x77c   :  { %v3461_v17 = vmul.f32 0.5, %v4417_v40 }
 0x77d   :  { %v4419_v2 = vpop.eup %4418 }
 0x77e   :  { %v3477_v24 = vadd.f32 0.5, %v3461_v17  ;;  %v3462_v37 = vmul.f32 0.5, %v4419_v2 }
 0x780   :  { %3493 = vst.msk [vmem:[%s7166_s7 + $0xe0] sm:$0xff] %vm1748_vm1, %v3477_v24  ;;  %v3478_v12 = vadd.f32 0.5, %v3462_v37 }
 0x782   :  { %3494 = vst.msk [vmem:[%s7166_s7 + $0xe8] sm:$0xff] %vm1748_vm1, %v3478_v12 }
 0x783   :  { %v4421_v4 = vpop.eup %4420 }
 0x784   :  { %v3463_v51 = vmul.f32 0.5, %v4421_v4 }
 0x785   :  { %v4423_v41 = vpop.eup %4422 }
 0x786   :  { %v3479_v14 = vadd.f32 0.5, %v3463_v51  ;;  %v3464_v18 = vmul.f32 0.5, %v4423_v41 }
 0x788   :  { %3495 = vst.msk [vmem:[%s7166_s7 + $0xf0] sm:$0xff] %vm1748_vm1, %v3479_v14  ;;  %v3480_v1 = vadd.f32 0.5, %v3464_v18 }
 0x78a   :  { %3496 = vst.msk [vmem:[%s7166_s7 + $0xf8] sm:$0xff] %vm1748_vm1, %v3480_v1 }

</bundles_post_ra>
